<compile_context>
chip_gen: v6e
topology: v6e:2x2x1
jax: 0.10.0
libtpu: 0.0.40
codegen_flags: <defaults>
</compile_context>

<pallas_src>
import functools

import jax
import jax.numpy as jnp
from jax import lax
from jax.experimental import pallas as pl
from jax.experimental.pallas import tpu as pltpu


def _round_up(v, m):
    return (v + m - 1) // m * m


def _pad_gate_blocks(w, h, hp):
    """Pad each of the 4 gate blocks along the leading (4H) axis from h to hp."""
    parts = []
    for g in range(4):
        blk = w[g * h:(g + 1) * h]
        pad = [(0, hp - h)] + [(0, 0)] * (blk.ndim - 1)
        parts.append(jnp.pad(blk, pad))
    return jnp.concatenate(parts, axis=0)


def _lstm_qnet_kernel(x_ref, *refs, num_layers, seq_len, hidden_p):
    # refs: [w_ih_T_0, w_hh_T_0, b_0, ..., w_ih_T_{L-1}, w_hh_T_{L-1}, b_{L-1},
    #        lin_w_T, lin_b, out_ref, seq_scr, gx_scr, h_scr, c_scr]
    Hp = hidden_p
    n_layer_refs = 3 * num_layers
    layer_refs = refs[:n_layer_refs]
    lin_w_ref, lin_b_ref, out_ref = refs[n_layer_refs:n_layer_refs + 3]
    seq_scr, gx_scr, h_scr, c_scr = refs[n_layer_refs + 3:]
    bt = h_scr.shape[0]  # batch tile (multiple of 8)

    for l in range(num_layers):  # static -> unrolled at trace time
        w_ih_ref = layer_refs[3 * l]      # (in_p, 4Hp) bf16
        w_hh_ref = layer_refs[3 * l + 1]  # (Hp, 4Hp)  bf16
        b_ref = layer_refs[3 * l + 2]     # (1, 4Hp)   f32 (= b_ih + b_hh)

        # ---- hoisted input projection: one tall MXU matmul over all steps ----
        xin = x_ref[...] if l == 0 else seq_scr[...]       # (seq, bt, in_p) bf16
        in_dim = xin.shape[-1]
        gx = jnp.dot(xin.reshape(seq_len * bt, in_dim), w_ih_ref[...],
                     preferred_element_type=jnp.float32)    # (seq*bt, 4Hp) f32
        gx = gx + b_ref[...]                                 # bias added once/layer
        gx_scr[...] = gx.reshape(seq_len, bt, 4 * Hp)

        h_scr[...] = jnp.zeros_like(h_scr)                   # bf16
        c_scr[...] = jnp.zeros_like(c_scr)                   # f32

        write_seq = l < num_layers - 1  # last layer's output sequence is unused

        def step(t, carry, w_hh_ref=w_hh_ref, write_seq=write_seq):
            h = h_scr[...]            # (bt, Hp) bf16
            c = c_scr[...]            # (bt, Hp) f32
            gates = gx_scr[t] + jnp.dot(h, w_hh_ref[...],
                                        preferred_element_type=jnp.float32)
            # PyTorch gate order i, f, g, o; each slice is a lane-aligned vreg view.
            i_g = jax.nn.sigmoid(gates[:, 0 * Hp:1 * Hp])
            f_g = jax.nn.sigmoid(gates[:, 1 * Hp:2 * Hp])
            g_g = jnp.tanh(gates[:, 2 * Hp:3 * Hp])
            o_g = jax.nn.sigmoid(gates[:, 3 * Hp:4 * Hp])
            c_new = f_g * c + i_g * g_g
            h_new = o_g * jnp.tanh(c_new)
            c_scr[...] = c_new
            h_bf = h_new.astype(h_scr.dtype)
            h_scr[...] = h_bf
            if write_seq:
                seq_scr[t] = h_bf
            return carry

        lax.fori_loop(0, seq_len, step, 0, unroll=(seq_len <= 32))

    # Linear head on h_n[-1].
    out = jnp.dot(h_scr[...], lin_w_ref[...],
                  preferred_element_type=jnp.float32) + lin_b_ref[...]
    out_ref[...] = out.astype(out_ref.dtype)


def init_params(key, n_features, hidden_size, num_actions, num_layers):
    """Deterministic synthetic parameters with PyTorch-style shapes."""
    scale = 1.0 / jnp.sqrt(hidden_size)
    params = {"lstm": []}
    for l in range(num_layers):
        in_size = n_features if l == 0 else hidden_size
        key, k1, k2, k3, k4 = jax.random.split(key, 5)
        w_ih = jax.random.uniform(k1, (4 * hidden_size, in_size), jnp.float32, -scale, scale)
        w_hh = jax.random.uniform(k2, (4 * hidden_size, hidden_size), jnp.float32, -scale, scale)
        b_ih = jax.random.uniform(k3, (4 * hidden_size,), jnp.float32, -scale, scale)
        b_hh = jax.random.uniform(k4, (4 * hidden_size,), jnp.float32, -scale, scale)
        params["lstm"].append((w_ih, w_hh, b_ih, b_hh))
    key, k1, k2 = jax.random.split(key, 3)
    params["lin_w"] = jax.random.uniform(k1, (num_actions, hidden_size), jnp.float32, -scale, scale)
    params["lin_b"] = jax.random.uniform(k2, (num_actions,), jnp.float32, -scale, scale)
    return params


def lstm_qnet_forward(x, params, hidden_size, num_actions, num_layers):
    batch, seq_len, n_features = x.shape

    # Padded sizes: lane-align hidden/features/actions, sublane-align batch.
    Hp = _round_up(hidden_size, 128)
    Fp = _round_up(n_features, 128)
    Ap = _round_up(num_actions, 128)
    Bp = _round_up(batch, 8)
    bt = Bp if Bp <= 128 else 128      # batch tile (multiple of 8)
    Bp = _round_up(Bp, bt)
    grid = (Bp // bt,)

    # ---- input / weight prep (time-major, zero-padded, bf16 for MXU) ----
    x_tm = jnp.transpose(x, (1, 0, 2)).astype(jnp.float32)           # (seq, B, F)
    x_tm = jnp.pad(x_tm, ((0, 0), (0, Bp - batch), (0, Fp - n_features)))
    inputs = [x_tm.astype(jnp.bfloat16)]

    in_specs = [pl.BlockSpec((seq_len, bt, Fp), lambda b: (0, b, 0))]
    for l in range(num_layers):
        w_ih, w_hh, b_ih, b_hh = params["lstm"][l]
        in_size = n_features if l == 0 else hidden_size
        in_p = Fp if l == 0 else Hp
        w_ih_p = _pad_gate_blocks(w_ih, hidden_size, Hp)              # (4Hp, in)
        w_ih_p = jnp.pad(w_ih_p, ((0, 0), (0, in_p - in_size)))       # (4Hp, in_p)
        w_hh_p = _pad_gate_blocks(w_hh, hidden_size, Hp)              # (4Hp, H)
        w_hh_p = jnp.pad(w_hh_p, ((0, 0), (0, Hp - hidden_size)))     # (4Hp, Hp)
        b_p = _pad_gate_blocks(b_ih + b_hh, hidden_size, Hp)          # (4Hp,)
        inputs += [w_ih_p.T.astype(jnp.bfloat16),
                   w_hh_p.T.astype(jnp.bfloat16),
                   b_p[None, :].astype(jnp.float32)]
        in_specs += [pl.BlockSpec((in_p, 4 * Hp), lambda b: (0, 0)),
                     pl.BlockSpec((Hp, 4 * Hp), lambda b: (0, 0)),
                     pl.BlockSpec((1, 4 * Hp), lambda b: (0, 0))]

    lin_w_p = jnp.pad(params["lin_w"],
                      ((0, Ap - num_actions), (0, Hp - hidden_size)))  # (Ap, Hp)
    lin_b_p = jnp.pad(params["lin_b"], ((0, Ap - num_actions),))       # (Ap,)
    inputs += [lin_w_p.T.astype(jnp.bfloat16), lin_b_p[None, :].astype(jnp.float32)]
    in_specs += [pl.BlockSpec((Hp, Ap), lambda b: (0, 0)),
                 pl.BlockSpec((1, Ap), lambda b: (0, 0))]

    out_specs = pl.BlockSpec((bt, Ap), lambda b: (b, 0))

    # ---- VMEM budget estimate (inputs/outputs double-buffered + scratch) ----
    est = seq_len * bt * Fp * 2
    for l in range(num_layers):
        in_p = Fp if l == 0 else Hp
        est += (in_p + Hp) * 4 * Hp * 2 + 4 * Hp * 4
    est += Hp * Ap * 2 + Ap * 4
    est = 2 * (est + bt * Ap * 4)
    est += seq_len * bt * Hp * 2          # seq_scr (bf16)
    est += seq_len * bt * 4 * Hp * 4      # gx_scr  (f32)
    est += bt * Hp * (2 + 4)              # h (bf16), c (f32)
    vmem_limit = int(min(64 * 1024 * 1024, max(16 * 1024 * 1024, 2 * est)))
    # NOTE: for very large hidden sizes, per-layer weights should instead be
    # streamed from HBM (memory_space=pl.ANY + make_async_copy double-buffer).

    kernel = functools.partial(
        _lstm_qnet_kernel, num_layers=num_layers, seq_len=seq_len, hidden_p=Hp)

    out_padded = pl.pallas_call(
        kernel,
        out_shape=jax.ShapeDtypeStruct((Bp, Ap), jnp.float32),
        grid=grid,
        in_specs=in_specs,
        out_specs=out_specs,
        scratch_shapes=[
            pltpu.VMEM((seq_len, bt, Hp), jnp.bfloat16),      # per-layer output seq
            pltpu.VMEM((seq_len, bt, 4 * Hp), jnp.float32),   # hoisted gates_x (+bias)
            pltpu.VMEM((bt, Hp), jnp.bfloat16),               # h
            pltpu.VMEM((bt, Hp), jnp.float32),                # c
        ],
        compiler_params=pltpu.CompilerParams(
            dimension_semantics=("parallel",),
            vmem_limit_bytes=vmem_limit),
    )(*inputs)

    return out_padded[:batch, :num_actions]


def _reference_forward(x, params, hidden_size, num_layers):
    """Pure-JAX f32 reference matching torch.nn.LSTM(batch_first=True) + Linear."""
    batch = x.shape[0]
    layer_in = x.astype(jnp.float32)
    h_last = None
    for l in range(num_layers):
        w_ih, w_hh, b_ih, b_hh = params["lstm"][l]
        h = jnp.zeros((batch, hidden_size), jnp.float32)
        c = jnp.zeros((batch, hidden_size), jnp.float32)
        outs = []
        for t in range(layer_in.shape[1]):
            x_t = layer_in[:, t, :]
            gates = x_t @ w_ih.T + b_ih + h @ w_hh.T + b_hh
            i_g = jax.nn.sigmoid(gates[:, 0 * hidden_size:1 * hidden_size])
            f_g = jax.nn.sigmoid(gates[:, 1 * hidden_size:2 * hidden_size])
            g_g = jnp.tanh(gates[:, 2 * hidden_size:3 * hidden_size])
            o_g = jax.nn.sigmoid(gates[:, 3 * hidden_size:4 * hidden_size])
            c = f_g * c + i_g * g_g
            h = o_g * jnp.tanh(c)
            outs.append(h)
        layer_in = jnp.stack(outs, axis=1)
        h_last = h
    return h_last @ params["lin_w"].T + params["lin_b"]


if __name__ == "__main__":
    # Small shapes consistent with the module's forward.
    batch, seq_len = 2, 8
    n_features, hidden_size, num_actions, num_layers = 4, 32, 4, 2

    key = jax.random.PRNGKey(0)
    key, xk = jax.random.split(key)
    x = jax.random.normal(xk, (batch, seq_len, n_features), jnp.float32)

    params = init_params(key, n_features, hidden_size, num_actions, num_layers)

    out = lstm_qnet_forward(x, params, hidden_size, num_actions, num_layers)
    out = jax.block_until_ready(out)

    ref = _reference_forward(x, params, hidden_size, num_layers)
    assert out.shape == (batch, num_actions)
    # bf16 MXU inputs (f32 accumulation / cell state) -> slightly loose tolerance.
    assert jnp.allclose(out, ref, atol=2e-2, rtol=2e-2), "mismatch vs reference"

    print("KERNEL_OK")
</pallas_src>

<mosaic_0001>
module attributes {stable_mosaic.version = 11 : i64} {
  func.func @_lstm_qnet_kernel(%arg0: i32, %arg1: memref<8x8x128xbf16, #tpu.memory_space<vmem>>, %arg2: memref<128x512xbf16, #tpu.memory_space<vmem>>, %arg3: memref<128x512xbf16, #tpu.memory_space<vmem>>, %arg4: memref<1x512xf32, #tpu.memory_space<vmem>>, %arg5: memref<128x512xbf16, #tpu.memory_space<vmem>>, %arg6: memref<128x512xbf16, #tpu.memory_space<vmem>>, %arg7: memref<1x512xf32, #tpu.memory_space<vmem>>, %arg8: memref<128x128xbf16, #tpu.memory_space<vmem>>, %arg9: memref<1x128xf32, #tpu.memory_space<vmem>>, %arg10: memref<8x128xf32, #tpu.memory_space<vmem>>, %arg11: memref<8x8x128xbf16, #tpu.memory_space<vmem>>, %arg12: memref<8x8x512xf32, #tpu.memory_space<vmem>>, %arg13: memref<8x128xbf16, #tpu.memory_space<vmem>>, %arg14: memref<8x128xf32, #tpu.memory_space<vmem>>) attributes {dimension_semantics = [#tpu.dimension_semantics<parallel>], iteration_bounds = array<i64: 1>, scalar_prefetch = 0 : i64, scratch_operands = 4 : i64, tpu.core_type = #tpu.core_type<tc>, window_params = [{transform_indices = @transform_0, window_bounds = array<i64: 8, 8, 128>}, {pipeline_mode = #tpu.pipeline_mode<synchronous>, transform_indices = @transform_1, window_bounds = array<i64: 128, 512>}, {pipeline_mode = #tpu.pipeline_mode<synchronous>, transform_indices = @transform_2, window_bounds = array<i64: 128, 512>}, {pipeline_mode = #tpu.pipeline_mode<synchronous>, transform_indices = @transform_3, window_bounds = array<i64: 1, 512>}, {pipeline_mode = #tpu.pipeline_mode<synchronous>, transform_indices = @transform_4, window_bounds = array<i64: 128, 512>}, {pipeline_mode = #tpu.pipeline_mode<synchronous>, transform_indices = @transform_5, window_bounds = array<i64: 128, 512>}, {pipeline_mode = #tpu.pipeline_mode<synchronous>, transform_indices = @transform_6, window_bounds = array<i64: 1, 512>}, {pipeline_mode = #tpu.pipeline_mode<synchronous>, transform_indices = @transform_7, window_bounds = array<i64: 128, 128>}, {pipeline_mode = #tpu.pipeline_mode<synchronous>, transform_indices = @transform_8, window_bounds = array<i64: 1, 128>}, {transform_indices = @transform_9, window_bounds = array<i64: 8, 128>}]} {
    %c0 = arith.constant 0 : index
    %c0_0 = arith.constant 0 : index
    %c0_1 = arith.constant 0 : index
    %0 = vector.load %arg1[%c0, %c0_0, %c0_1] : memref<8x8x128xbf16, #tpu.memory_space<vmem>>, vector<8x8x128xbf16>
    %1 = vector.shape_cast %0 : vector<8x8x128xbf16> to vector<64x128xbf16>
    %c0_2 = arith.constant 0 : index
    %c0_3 = arith.constant 0 : index
    %2 = vector.load %arg2[%c0_2, %c0_3] : memref<128x512xbf16, #tpu.memory_space<vmem>>, vector<128x512xbf16>
    %cst = arith.constant dense<0.000000e+00> : vector<64x512xf32>
    %3 = tpu.matmul %1, %2, %cst {dimension_numbers = #tpu.dot_dimension_numbers<[1], [0], [0], [1], [0, 0, 1, 1], [], []>} : vector<64x128xbf16>, vector<128x512xbf16>, vector<64x512xf32> -> vector<64x512xf32>
    %c0_4 = arith.constant 0 : index
    %c0_5 = arith.constant 0 : index
    %4 = vector.load %arg4[%c0_4, %c0_5] : memref<1x512xf32, #tpu.memory_space<vmem>>, vector<1x512xf32>
    %5 = vector.broadcast %4 : vector<1x512xf32> to vector<64x512xf32>
    %6 = arith.addf %3, %5 : vector<64x512xf32>
    %7 = vector.shape_cast %6 : vector<64x512xf32> to vector<8x8x512xf32>
    %c0_6 = arith.constant 0 : index
    %c0_7 = arith.constant 0 : index
    %c0_8 = arith.constant 0 : index
    %8 = vector.load %arg12[%c0_6, %c0_7, %c0_8] : memref<8x8x512xf32, #tpu.memory_space<vmem>>, vector<8x8x512xf32>
    tpu.vector_store %arg12[%c0_6, %c0_7, %c0_8], %7 {strides = array<i32>} : memref<8x8x512xf32, #tpu.memory_space<vmem>>, vector<8x8x512xf32>,
    %cst_9 = arith.constant 0.000000e+00 : bf16
    %9 = vector.broadcast %cst_9 : bf16 to vector<8x128xbf16>
    %c0_10 = arith.constant 0 : index
    %c0_11 = arith.constant 0 : index
    %10 = vector.load %arg13[%c0_10, %c0_11] : memref<8x128xbf16, #tpu.memory_space<vmem>>, vector<8x128xbf16>
    tpu.vector_store %arg13[%c0_10, %c0_11], %9 {strides = array<i32>} : memref<8x128xbf16, #tpu.memory_space<vmem>>, vector<8x128xbf16>,
    %cst_12 = arith.constant 0.000000e+00 : f32
    %11 = vector.broadcast %cst_12 : f32 to vector<8x128xf32>
    %c0_13 = arith.constant 0 : index
    %c0_14 = arith.constant 0 : index
    %12 = vector.load %arg14[%c0_13, %c0_14] : memref<8x128xf32, #tpu.memory_space<vmem>>, vector<8x128xf32>
    tpu.vector_store %arg14[%c0_13, %c0_14], %11 {strides = array<i32>} : memref<8x128xf32, #tpu.memory_space<vmem>>, vector<8x128xf32>,
    %c0_i32 = arith.constant 0 : i32
    %c0_15 = arith.constant 0 : index
    %c0_16 = arith.constant 0 : index
    %13 = vector.load %arg13[%c0_15, %c0_16] : memref<8x128xbf16, #tpu.memory_space<vmem>>, vector<8x128xbf16>
    %c0_17 = arith.constant 0 : index
    %c0_18 = arith.constant 0 : index
    %14 = vector.load %arg14[%c0_17, %c0_18] : memref<8x128xf32, #tpu.memory_space<vmem>>, vector<8x128xf32>
    %15 = arith.index_cast %c0_i32 : i32 to index
    %c0_19 = arith.constant 0 : index
    %c0_20 = arith.constant 0 : index
    %16 = vector.load %arg12[%15, %c0_19, %c0_20] : memref<8x8x512xf32, #tpu.memory_space<vmem>>, vector<1x8x512xf32>
    %17 = vector.shape_cast %16 : vector<1x8x512xf32> to vector<8x512xf32>
    %c0_21 = arith.constant 0 : index
    %c0_22 = arith.constant 0 : index
    %18 = vector.load %arg3[%c0_21, %c0_22] : memref<128x512xbf16, #tpu.memory_space<vmem>>, vector<128x512xbf16>
    %cst_23 = arith.constant dense<0.000000e+00> : vector<8x512xf32>
    %19 = tpu.matmul %13, %18, %cst_23 {dimension_numbers = #tpu.dot_dimension_numbers<[1], [0], [0], [1], [0, 0, 1, 1], [], []>} : vector<8x128xbf16>, vector<128x512xbf16>, vector<8x512xf32> -> vector<8x512xf32>
    %20 = arith.addf %17, %19 : vector<8x512xf32>
    %21 = vector.extract_strided_slice %20 {offsets = [0, 0], sizes = [8, 128], strides = [1, 1]} : vector<8x512xf32> to vector<8x128xf32>
    %22 = arith.negf %21 : vector<8x128xf32>
    %23 = math.exp %22 : vector<8x128xf32>
    %cst_24 = arith.constant 1.000000e+00 : f32
    %24 = vector.broadcast %cst_24 : f32 to vector<8x128xf32>
    %25 = arith.addf %24, %23 : vector<8x128xf32>
    %26 = arith.divf %24, %25 : vector<8x128xf32>
    %27 = vector.extract_strided_slice %20 {offsets = [0, 128], sizes = [8, 128], strides = [1, 1]} : vector<8x512xf32> to vector<8x128xf32>
    %28 = arith.negf %27 : vector<8x128xf32>
    %29 = math.exp %28 : vector<8x128xf32>
    %cst_25 = arith.constant 1.000000e+00 : f32
    %30 = vector.broadcast %cst_25 : f32 to vector<8x128xf32>
    %31 = arith.addf %30, %29 : vector<8x128xf32>
    %32 = arith.divf %30, %31 : vector<8x128xf32>
    %33 = vector.extract_strided_slice %20 {offsets = [0, 256], sizes = [8, 128], strides = [1, 1]} : vector<8x512xf32> to vector<8x128xf32>
    %34 = math.tanh %33 : vector<8x128xf32>
    %35 = vector.extract_strided_slice %20 {offsets = [0, 384], sizes = [8, 128], strides = [1, 1]} : vector<8x512xf32> to vector<8x128xf32>
    %36 = arith.negf %35 : vector<8x128xf32>
    %37 = math.exp %36 : vector<8x128xf32>
    %cst_26 = arith.constant 1.000000e+00 : f32
    %38 = vector.broadcast %cst_26 : f32 to vector<8x128xf32>
    %39 = arith.addf %38, %37 : vector<8x128xf32>
    %40 = arith.divf %38, %39 : vector<8x128xf32>
    %41 = arith.mulf %32, %14 : vector<8x128xf32>
    %42 = arith.mulf %26, %34 : vector<8x128xf32>
    %43 = arith.addf %41, %42 : vector<8x128xf32>
    %44 = math.tanh %43 : vector<8x128xf32>
    %45 = arith.mulf %40, %44 : vector<8x128xf32>
    %c0_27 = arith.constant 0 : index
    %c0_28 = arith.constant 0 : index
    %46 = vector.load %arg14[%c0_27, %c0_28] : memref<8x128xf32, #tpu.memory_space<vmem>>, vector<8x128xf32>
    tpu.vector_store %arg14[%c0_27, %c0_28], %43 {strides = array<i32>} : memref<8x128xf32, #tpu.memory_space<vmem>>, vector<8x128xf32>,
    %47 = arith.truncf %45 : vector<8x128xf32> to vector<8x128xbf16>
    %c0_29 = arith.constant 0 : index
    %c0_30 = arith.constant 0 : index
    %48 = vector.load %arg13[%c0_29, %c0_30] : memref<8x128xbf16, #tpu.memory_space<vmem>>, vector<8x128xbf16>
    tpu.vector_store %arg13[%c0_29, %c0_30], %47 {strides = array<i32>} : memref<8x128xbf16, #tpu.memory_space<vmem>>, vector<8x128xbf16>,
    %49 = arith.index_cast %c0_i32 : i32 to index
    %c0_31 = arith.constant 0 : index
    %c0_32 = arith.constant 0 : index
    %50 = vector.load %arg11[%49, %c0_31, %c0_32] : memref<8x8x128xbf16, #tpu.memory_space<vmem>>, vector<1x8x128xbf16>
    %51 = vector.shape_cast %50 : vector<1x8x128xbf16> to vector<8x128xbf16>
    %52 = vector.shape_cast %47 : vector<8x128xbf16> to vector<1x8x128xbf16>
    tpu.vector_store %arg11[%49, %c0_31, %c0_32], %52 {strides = array<i32>} : memref<8x8x128xbf16, #tpu.memory_space<vmem>>, vector<1x8x128xbf16>,
    %c1_i32 = arith.constant 1 : i32
    %c0_33 = arith.constant 0 : index
    %c0_34 = arith.constant 0 : index
    %53 = vector.load %arg13[%c0_33, %c0_34] : memref<8x128xbf16, #tpu.memory_space<vmem>>, vector<8x128xbf16>
    %c0_35 = arith.constant 0 : index
    %c0_36 = arith.constant 0 : index
    %54 = vector.load %arg14[%c0_35, %c0_36] : memref<8x128xf32, #tpu.memory_space<vmem>>, vector<8x128xf32>
    %55 = arith.index_cast %c1_i32 : i32 to index
    %c0_37 = arith.constant 0 : index
    %c0_38 = arith.constant 0 : index
    %56 = vector.load %arg12[%55, %c0_37, %c0_38] : memref<8x8x512xf32, #tpu.memory_space<vmem>>, vector<1x8x512xf32>
    %57 = vector.shape_cast %56 : vector<1x8x512xf32> to vector<8x512xf32>
    %c0_39 = arith.constant 0 : index
    %c0_40 = arith.constant 0 : index
    %58 = vector.load %arg3[%c0_39, %c0_40] : memref<128x512xbf16, #tpu.memory_space<vmem>>, vector<128x512xbf16>
    %cst_41 = arith.constant dense<0.000000e+00> : vector<8x512xf32>
    %59 = tpu.matmul %53, %58, %cst_41 {dimension_numbers = #tpu.dot_dimension_numbers<[1], [0], [0], [1], [0, 0, 1, 1], [], []>} : vector<8x128xbf16>, vector<128x512xbf16>, vector<8x512xf32> -> vector<8x512xf32>
    %60 = arith.addf %57, %59 : vector<8x512xf32>
    %61 = vector.extract_strided_slice %60 {offsets = [0, 0], sizes = [8, 128], strides = [1, 1]} : vector<8x512xf32> to vector<8x128xf32>
    %62 = arith.negf %61 : vector<8x128xf32>
    %63 = math.exp %62 : vector<8x128xf32>
    %cst_42 = arith.constant 1.000000e+00 : f32
    %64 = vector.broadcast %cst_42 : f32 to vector<8x128xf32>
    %65 = arith.addf %64, %63 : vector<8x128xf32>
    %66 = arith.divf %64, %65 : vector<8x128xf32>
    %67 = vector.extract_strided_slice %60 {offsets = [0, 128], sizes = [8, 128], strides = [1, 1]} : vector<8x512xf32> to vector<8x128xf32>
    %68 = arith.negf %67 : vector<8x128xf32>
    %69 = math.exp %68 : vector<8x128xf32>
    %cst_43 = arith.constant 1.000000e+00 : f32
    %70 = vector.broadcast %cst_43 : f32 to vector<8x128xf32>
    %71 = arith.addf %70, %69 : vector<8x128xf32>
    %72 = arith.divf %70, %71 : vector<8x128xf32>
    %73 = vector.extract_strided_slice %60 {offsets = [0, 256], sizes = [8, 128], strides = [1, 1]} : vector<8x512xf32> to vector<8x128xf32>
    %74 = math.tanh %73 : vector<8x128xf32>
    %75 = vector.extract_strided_slice %60 {offsets = [0, 384], sizes = [8, 128], strides = [1, 1]} : vector<8x512xf32> to vector<8x128xf32>
    %76 = arith.negf %75 : vector<8x128xf32>
    %77 = math.exp %76 : vector<8x128xf32>
    %cst_44 = arith.constant 1.000000e+00 : f32
    %78 = vector.broadcast %cst_44 : f32 to vector<8x128xf32>
    %79 = arith.addf %78, %77 : vector<8x128xf32>
    %80 = arith.divf %78, %79 : vector<8x128xf32>
    %81 = arith.mulf %72, %54 : vector<8x128xf32>
    %82 = arith.mulf %66, %74 : vector<8x128xf32>
    %83 = arith.addf %81, %82 : vector<8x128xf32>
    %84 = math.tanh %83 : vector<8x128xf32>
    %85 = arith.mulf %80, %84 : vector<8x128xf32>
    %c0_45 = arith.constant 0 : index
    %c0_46 = arith.constant 0 : index
    %86 = vector.load %arg14[%c0_45, %c0_46] : memref<8x128xf32, #tpu.memory_space<vmem>>, vector<8x128xf32>
    tpu.vector_store %arg14[%c0_45, %c0_46], %83 {strides = array<i32>} : memref<8x128xf32, #tpu.memory_space<vmem>>, vector<8x128xf32>,
    %87 = arith.truncf %85 : vector<8x128xf32> to vector<8x128xbf16>
    %c0_47 = arith.constant 0 : index
    %c0_48 = arith.constant 0 : index
    %88 = vector.load %arg13[%c0_47, %c0_48] : memref<8x128xbf16, #tpu.memory_space<vmem>>, vector<8x128xbf16>
    tpu.vector_store %arg13[%c0_47, %c0_48], %87 {strides = array<i32>} : memref<8x128xbf16, #tpu.memory_space<vmem>>, vector<8x128xbf16>,
    %89 = arith.index_cast %c1_i32 : i32 to index
    %c0_49 = arith.constant 0 : index
    %c0_50 = arith.constant 0 : index
    %90 = vector.load %arg11[%89, %c0_49, %c0_50] : memref<8x8x128xbf16, #tpu.memory_space<vmem>>, vector<1x8x128xbf16>
    %91 = vector.shape_cast %90 : vector<1x8x128xbf16> to vector<8x128xbf16>
    %92 = vector.shape_cast %87 : vector<8x128xbf16> to vector<1x8x128xbf16>
    tpu.vector_store %arg11[%89, %c0_49, %c0_50], %92 {strides = array<i32>} : memref<8x8x128xbf16, #tpu.memory_space<vmem>>, vector<1x8x128xbf16>,
    %c2_i32 = arith.constant 2 : i32
    %c0_51 = arith.constant 0 : index
    %c0_52 = arith.constant 0 : index
    %93 = vector.load %arg13[%c0_51, %c0_52] : memref<8x128xbf16, #tpu.memory_space<vmem>>, vector<8x128xbf16>
    %c0_53 = arith.constant 0 : index
    %c0_54 = arith.constant 0 : index
    %94 = vector.load %arg14[%c0_53, %c0_54] : memref<8x128xf32, #tpu.memory_space<vmem>>, vector<8x128xf32>
    %95 = arith.index_cast %c2_i32 : i32 to index
    %c0_55 = arith.constant 0 : index
    %c0_56 = arith.constant 0 : index
    %96 = vector.load %arg12[%95, %c0_55, %c0_56] : memref<8x8x512xf32, #tpu.memory_space<vmem>>, vector<1x8x512xf32>
    %97 = vector.shape_cast %96 : vector<1x8x512xf32> to vector<8x512xf32>
    %c0_57 = arith.constant 0 : index
    %c0_58 = arith.constant 0 : index
    %98 = vector.load %arg3[%c0_57, %c0_58] : memref<128x512xbf16, #tpu.memory_space<vmem>>, vector<128x512xbf16>
    %cst_59 = arith.constant dense<0.000000e+00> : vector<8x512xf32>
    %99 = tpu.matmul %93, %98, %cst_59 {dimension_numbers = #tpu.dot_dimension_numbers<[1], [0], [0], [1], [0, 0, 1, 1], [], []>} : vector<8x128xbf16>, vector<128x512xbf16>, vector<8x512xf32> -> vector<8x512xf32>
    %100 = arith.addf %97, %99 : vector<8x512xf32>
    %101 = vector.extract_strided_slice %100 {offsets = [0, 0], sizes = [8, 128], strides = [1, 1]} : vector<8x512xf32> to vector<8x128xf32>
    %102 = arith.negf %101 : vector<8x128xf32>
    %103 = math.exp %102 : vector<8x128xf32>
    %cst_60 = arith.constant 1.000000e+00 : f32
    %104 = vector.broadcast %cst_60 : f32 to vector<8x128xf32>
    %105 = arith.addf %104, %103 : vector<8x128xf32>
    %106 = arith.divf %104, %105 : vector<8x128xf32>
    %107 = vector.extract_strided_slice %100 {offsets = [0, 128], sizes = [8, 128], strides = [1, 1]} : vector<8x512xf32> to vector<8x128xf32>
    %108 = arith.negf %107 : vector<8x128xf32>
    %109 = math.exp %108 : vector<8x128xf32>
    %cst_61 = arith.constant 1.000000e+00 : f32
    %110 = vector.broadcast %cst_61 : f32 to vector<8x128xf32>
    %111 = arith.addf %110, %109 : vector<8x128xf32>
    %112 = arith.divf %110, %111 : vector<8x128xf32>
    %113 = vector.extract_strided_slice %100 {offsets = [0, 256], sizes = [8, 128], strides = [1, 1]} : vector<8x512xf32> to vector<8x128xf32>
    %114 = math.tanh %113 : vector<8x128xf32>
    %115 = vector.extract_strided_slice %100 {offsets = [0, 384], sizes = [8, 128], strides = [1, 1]} : vector<8x512xf32> to vector<8x128xf32>
    %116 = arith.negf %115 : vector<8x128xf32>
    %117 = math.exp %116 : vector<8x128xf32>
    %cst_62 = arith.constant 1.000000e+00 : f32
    %118 = vector.broadcast %cst_62 : f32 to vector<8x128xf32>
    %119 = arith.addf %118, %117 : vector<8x128xf32>
    %120 = arith.divf %118, %119 : vector<8x128xf32>
    %121 = arith.mulf %112, %94 : vector<8x128xf32>
    %122 = arith.mulf %106, %114 : vector<8x128xf32>
    %123 = arith.addf %121, %122 : vector<8x128xf32>
    %124 = math.tanh %123 : vector<8x128xf32>
    %125 = arith.mulf %120, %124 : vector<8x128xf32>
    %c0_63 = arith.constant 0 : index
    %c0_64 = arith.constant 0 : index
    %126 = vector.load %arg14[%c0_63, %c0_64] : memref<8x128xf32, #tpu.memory_space<vmem>>, vector<8x128xf32>
    tpu.vector_store %arg14[%c0_63, %c0_64], %123 {strides = array<i32>} : memref<8x128xf32, #tpu.memory_space<vmem>>, vector<8x128xf32>,
    %127 = arith.truncf %125 : vector<8x128xf32> to vector<8x128xbf16>
    %c0_65 = arith.constant 0 : index
    %c0_66 = arith.constant 0 : index
    %128 = vector.load %arg13[%c0_65, %c0_66] : memref<8x128xbf16, #tpu.memory_space<vmem>>, vector<8x128xbf16>
    tpu.vector_store %arg13[%c0_65, %c0_66], %127 {strides = array<i32>} : memref<8x128xbf16, #tpu.memory_space<vmem>>, vector<8x128xbf16>,
    %129 = arith.index_cast %c2_i32 : i32 to index
    %c0_67 = arith.constant 0 : index
    %c0_68 = arith.constant 0 : index
    %130 = vector.load %arg11[%129, %c0_67, %c0_68] : memref<8x8x128xbf16, #tpu.memory_space<vmem>>, vector<1x8x128xbf16>
    %131 = vector.shape_cast %130 : vector<1x8x128xbf16> to vector<8x128xbf16>
    %132 = vector.shape_cast %127 : vector<8x128xbf16> to vector<1x8x128xbf16>
    tpu.vector_store %arg11[%129, %c0_67, %c0_68], %132 {strides = array<i32>} : memref<8x8x128xbf16, #tpu.memory_space<vmem>>, vector<1x8x128xbf16>,
    %c3_i32 = arith.constant 3 : i32
    %c0_69 = arith.constant 0 : index
    %c0_70 = arith.constant 0 : index
    %133 = vector.load %arg13[%c0_69, %c0_70] : memref<8x128xbf16, #tpu.memory_space<vmem>>, vector<8x128xbf16>
    %c0_71 = arith.constant 0 : index
    %c0_72 = arith.constant 0 : index
    %134 = vector.load %arg14[%c0_71, %c0_72] : memref<8x128xf32, #tpu.memory_space<vmem>>, vector<8x128xf32>
    %135 = arith.index_cast %c3_i32 : i32 to index
    %c0_73 = arith.constant 0 : index
    %c0_74 = arith.constant 0 : index
    %136 = vector.load %arg12[%135, %c0_73, %c0_74] : memref<8x8x512xf32, #tpu.memory_space<vmem>>, vector<1x8x512xf32>
    %137 = vector.shape_cast %136 : vector<1x8x512xf32> to vector<8x512xf32>
    %c0_75 = arith.constant 0 : index
    %c0_76 = arith.constant 0 : index
    %138 = vector.load %arg3[%c0_75, %c0_76] : memref<128x512xbf16, #tpu.memory_space<vmem>>, vector<128x512xbf16>
    %cst_77 = arith.constant dense<0.000000e+00> : vector<8x512xf32>
    %139 = tpu.matmul %133, %138, %cst_77 {dimension_numbers = #tpu.dot_dimension_numbers<[1], [0], [0], [1], [0, 0, 1, 1], [], []>} : vector<8x128xbf16>, vector<128x512xbf16>, vector<8x512xf32> -> vector<8x512xf32>
    %140 = arith.addf %137, %139 : vector<8x512xf32>
    %141 = vector.extract_strided_slice %140 {offsets = [0, 0], sizes = [8, 128], strides = [1, 1]} : vector<8x512xf32> to vector<8x128xf32>
    %142 = arith.negf %141 : vector<8x128xf32>
    %143 = math.exp %142 : vector<8x128xf32>
    %cst_78 = arith.constant 1.000000e+00 : f32
    %144 = vector.broadcast %cst_78 : f32 to vector<8x128xf32>
    %145 = arith.addf %144, %143 : vector<8x128xf32>
    %146 = arith.divf %144, %145 : vector<8x128xf32>
    %147 = vector.extract_strided_slice %140 {offsets = [0, 128], sizes = [8, 128], strides = [1, 1]} : vector<8x512xf32> to vector<8x128xf32>
    %148 = arith.negf %147 : vector<8x128xf32>
    %149 = math.exp %148 : vector<8x128xf32>
    %cst_79 = arith.constant 1.000000e+00 : f32
    %150 = vector.broadcast %cst_79 : f32 to vector<8x128xf32>
    %151 = arith.addf %150, %149 : vector<8x128xf32>
    %152 = arith.divf %150, %151 : vector<8x128xf32>
    %153 = vector.extract_strided_slice %140 {offsets = [0, 256], sizes = [8, 128], strides = [1, 1]} : vector<8x512xf32> to vector<8x128xf32>
    %154 = math.tanh %153 : vector<8x128xf32>
    %155 = vector.extract_strided_slice %140 {offsets = [0, 384], sizes = [8, 128], strides = [1, 1]} : vector<8x512xf32> to vector<8x128xf32>
    %156 = arith.negf %155 : vector<8x128xf32>
    %157 = math.exp %156 : vector<8x128xf32>
    %cst_80 = arith.constant 1.000000e+00 : f32
    %158 = vector.broadcast %cst_80 : f32 to vector<8x128xf32>
    %159 = arith.addf %158, %157 : vector<8x128xf32>
    %160 = arith.divf %158, %159 : vector<8x128xf32>
    %161 = arith.mulf %152, %134 : vector<8x128xf32>
    %162 = arith.mulf %146, %154 : vector<8x128xf32>
    %163 = arith.addf %161, %162 : vector<8x128xf32>
    %164 = math.tanh %163 : vector<8x128xf32>
    %165 = arith.mulf %160, %164 : vector<8x128xf32>
    %c0_81 = arith.constant 0 : index
    %c0_82 = arith.constant 0 : index
    %166 = vector.load %arg14[%c0_81, %c0_82] : memref<8x128xf32, #tpu.memory_space<vmem>>, vector<8x128xf32>
    tpu.vector_store %arg14[%c0_81, %c0_82], %163 {strides = array<i32>} : memref<8x128xf32, #tpu.memory_space<vmem>>, vector<8x128xf32>,
    %167 = arith.truncf %165 : vector<8x128xf32> to vector<8x128xbf16>
    %c0_83 = arith.constant 0 : index
    %c0_84 = arith.constant 0 : index
    %168 = vector.load %arg13[%c0_83, %c0_84] : memref<8x128xbf16, #tpu.memory_space<vmem>>, vector<8x128xbf16>
    tpu.vector_store %arg13[%c0_83, %c0_84], %167 {strides = array<i32>} : memref<8x128xbf16, #tpu.memory_space<vmem>>, vector<8x128xbf16>,
    %169 = arith.index_cast %c3_i32 : i32 to index
    %c0_85 = arith.constant 0 : index
    %c0_86 = arith.constant 0 : index
    %170 = vector.load %arg11[%169, %c0_85, %c0_86] : memref<8x8x128xbf16, #tpu.memory_space<vmem>>, vector<1x8x128xbf16>
    %171 = vector.shape_cast %170 : vector<1x8x128xbf16> to vector<8x128xbf16>
    %172 = vector.shape_cast %167 : vector<8x128xbf16> to vector<1x8x128xbf16>
    tpu.vector_store %arg11[%169, %c0_85, %c0_86], %172 {strides = array<i32>} : memref<8x8x128xbf16, #tpu.memory_space<vmem>>, vector<1x8x128xbf16>,
    %c4_i32 = arith.constant 4 : i32
    %c0_87 = arith.constant 0 : index
    %c0_88 = arith.constant 0 : index
    %173 = vector.load %arg13[%c0_87, %c0_88] : memref<8x128xbf16, #tpu.memory_space<vmem>>, vector<8x128xbf16>
    %c0_89 = arith.constant 0 : index
    %c0_90 = arith.constant 0 : index
    %174 = vector.load %arg14[%c0_89, %c0_90] : memref<8x128xf32, #tpu.memory_space<vmem>>, vector<8x128xf32>
    %175 = arith.index_cast %c4_i32 : i32 to index
    %c0_91 = arith.constant 0 : index
    %c0_92 = arith.constant 0 : index
    %176 = vector.load %arg12[%175, %c0_91, %c0_92] : memref<8x8x512xf32, #tpu.memory_space<vmem>>, vector<1x8x512xf32>
    %177 = vector.shape_cast %176 : vector<1x8x512xf32> to vector<8x512xf32>
    %c0_93 = arith.constant 0 : index
    %c0_94 = arith.constant 0 : index
    %178 = vector.load %arg3[%c0_93, %c0_94] : memref<128x512xbf16, #tpu.memory_space<vmem>>, vector<128x512xbf16>
    %cst_95 = arith.constant dense<0.000000e+00> : vector<8x512xf32>
    %179 = tpu.matmul %173, %178, %cst_95 {dimension_numbers = #tpu.dot_dimension_numbers<[1], [0], [0], [1], [0, 0, 1, 1], [], []>} : vector<8x128xbf16>, vector<128x512xbf16>, vector<8x512xf32> -> vector<8x512xf32>
    %180 = arith.addf %177, %179 : vector<8x512xf32>
    %181 = vector.extract_strided_slice %180 {offsets = [0, 0], sizes = [8, 128], strides = [1, 1]} : vector<8x512xf32> to vector<8x128xf32>
    %182 = arith.negf %181 : vector<8x128xf32>
    %183 = math.exp %182 : vector<8x128xf32>
    %cst_96 = arith.constant 1.000000e+00 : f32
    %184 = vector.broadcast %cst_96 : f32 to vector<8x128xf32>
    %185 = arith.addf %184, %183 : vector<8x128xf32>
    %186 = arith.divf %184, %185 : vector<8x128xf32>
    %187 = vector.extract_strided_slice %180 {offsets = [0, 128], sizes = [8, 128], strides = [1, 1]} : vector<8x512xf32> to vector<8x128xf32>
    %188 = arith.negf %187 : vector<8x128xf32>
    %189 = math.exp %188 : vector<8x128xf32>
    %cst_97 = arith.constant 1.000000e+00 : f32
    %190 = vector.broadcast %cst_97 : f32 to vector<8x128xf32>
    %191 = arith.addf %190, %189 : vector<8x128xf32>
    %192 = arith.divf %190, %191 : vector<8x128xf32>
    %193 = vector.extract_strided_slice %180 {offsets = [0, 256], sizes = [8, 128], strides = [1, 1]} : vector<8x512xf32> to vector<8x128xf32>
    %194 = math.tanh %193 : vector<8x128xf32>
    %195 = vector.extract_strided_slice %180 {offsets = [0, 384], sizes = [8, 128], strides = [1, 1]} : vector<8x512xf32> to vector<8x128xf32>
    %196 = arith.negf %195 : vector<8x128xf32>
    %197 = math.exp %196 : vector<8x128xf32>
    %cst_98 = arith.constant 1.000000e+00 : f32
    %198 = vector.broadcast %cst_98 : f32 to vector<8x128xf32>
    %199 = arith.addf %198, %197 : vector<8x128xf32>
    %200 = arith.divf %198, %199 : vector<8x128xf32>
    %201 = arith.mulf %192, %174 : vector<8x128xf32>
    %202 = arith.mulf %186, %194 : vector<8x128xf32>
    %203 = arith.addf %201, %202 : vector<8x128xf32>
    %204 = math.tanh %203 : vector<8x128xf32>
    %205 = arith.mulf %200, %204 : vector<8x128xf32>
    %c0_99 = arith.constant 0 : index
    %c0_100 = arith.constant 0 : index
    %206 = vector.load %arg14[%c0_99, %c0_100] : memref<8x128xf32, #tpu.memory_space<vmem>>, vector<8x128xf32>
    tpu.vector_store %arg14[%c0_99, %c0_100], %203 {strides = array<i32>} : memref<8x128xf32, #tpu.memory_space<vmem>>, vector<8x128xf32>,
    %207 = arith.truncf %205 : vector<8x128xf32> to vector<8x128xbf16>
    %c0_101 = arith.constant 0 : index
    %c0_102 = arith.constant 0 : index
    %208 = vector.load %arg13[%c0_101, %c0_102] : memref<8x128xbf16, #tpu.memory_space<vmem>>, vector<8x128xbf16>
    tpu.vector_store %arg13[%c0_101, %c0_102], %207 {strides = array<i32>} : memref<8x128xbf16, #tpu.memory_space<vmem>>, vector<8x128xbf16>,
    %209 = arith.index_cast %c4_i32 : i32 to index
    %c0_103 = arith.constant 0 : index
    %c0_104 = arith.constant 0 : index
    %210 = vector.load %arg11[%209, %c0_103, %c0_104] : memref<8x8x128xbf16, #tpu.memory_space<vmem>>, vector<1x8x128xbf16>
    %211 = vector.shape_cast %210 : vector<1x8x128xbf16> to vector<8x128xbf16>
    %212 = vector.shape_cast %207 : vector<8x128xbf16> to vector<1x8x128xbf16>
    tpu.vector_store %arg11[%209, %c0_103, %c0_104], %212 {strides = array<i32>} : memref<8x8x128xbf16, #tpu.memory_space<vmem>>, vector<1x8x128xbf16>,
    %c5_i32 = arith.constant 5 : i32
    %c0_105 = arith.constant 0 : index
    %c0_106 = arith.constant 0 : index
    %213 = vector.load %arg13[%c0_105, %c0_106] : memref<8x128xbf16, #tpu.memory_space<vmem>>, vector<8x128xbf16>
    %c0_107 = arith.constant 0 : index
    %c0_108 = arith.constant 0 : index
    %214 = vector.load %arg14[%c0_107, %c0_108] : memref<8x128xf32, #tpu.memory_space<vmem>>, vector<8x128xf32>
    %215 = arith.index_cast %c5_i32 : i32 to index
    %c0_109 = arith.constant 0 : index
    %c0_110 = arith.constant 0 : index
    %216 = vector.load %arg12[%215, %c0_109, %c0_110] : memref<8x8x512xf32, #tpu.memory_space<vmem>>, vector<1x8x512xf32>
    %217 = vector.shape_cast %216 : vector<1x8x512xf32> to vector<8x512xf32>
    %c0_111 = arith.constant 0 : index
    %c0_112 = arith.constant 0 : index
    %218 = vector.load %arg3[%c0_111, %c0_112] : memref<128x512xbf16, #tpu.memory_space<vmem>>, vector<128x512xbf16>
    %cst_113 = arith.constant dense<0.000000e+00> : vector<8x512xf32>
    %219 = tpu.matmul %213, %218, %cst_113 {dimension_numbers = #tpu.dot_dimension_numbers<[1], [0], [0], [1], [0, 0, 1, 1], [], []>} : vector<8x128xbf16>, vector<128x512xbf16>, vector<8x512xf32> -> vector<8x512xf32>
    %220 = arith.addf %217, %219 : vector<8x512xf32>
    %221 = vector.extract_strided_slice %220 {offsets = [0, 0], sizes = [8, 128], strides = [1, 1]} : vector<8x512xf32> to vector<8x128xf32>
    %222 = arith.negf %221 : vector<8x128xf32>
    %223 = math.exp %222 : vector<8x128xf32>
    %cst_114 = arith.constant 1.000000e+00 : f32
    %224 = vector.broadcast %cst_114 : f32 to vector<8x128xf32>
    %225 = arith.addf %224, %223 : vector<8x128xf32>
    %226 = arith.divf %224, %225 : vector<8x128xf32>
    %227 = vector.extract_strided_slice %220 {offsets = [0, 128], sizes = [8, 128], strides = [1, 1]} : vector<8x512xf32> to vector<8x128xf32>
    %228 = arith.negf %227 : vector<8x128xf32>
    %229 = math.exp %228 : vector<8x128xf32>
    %cst_115 = arith.constant 1.000000e+00 : f32
    %230 = vector.broadcast %cst_115 : f32 to vector<8x128xf32>
    %231 = arith.addf %230, %229 : vector<8x128xf32>
    %232 = arith.divf %230, %231 : vector<8x128xf32>
    %233 = vector.extract_strided_slice %220 {offsets = [0, 256], sizes = [8, 128], strides = [1, 1]} : vector<8x512xf32> to vector<8x128xf32>
    %234 = math.tanh %233 : vector<8x128xf32>
    %235 = vector.extract_strided_slice %220 {offsets = [0, 384], sizes = [8, 128], strides = [1, 1]} : vector<8x512xf32> to vector<8x128xf32>
    %236 = arith.negf %235 : vector<8x128xf32>
    %237 = math.exp %236 : vector<8x128xf32>
    %cst_116 = arith.constant 1.000000e+00 : f32
    %238 = vector.broadcast %cst_116 : f32 to vector<8x128xf32>
    %239 = arith.addf %238, %237 : vector<8x128xf32>
    %240 = arith.divf %238, %239 : vector<8x128xf32>
    %241 = arith.mulf %232, %214 : vector<8x128xf32>
    %242 = arith.mulf %226, %234 : vector<8x128xf32>
    %243 = arith.addf %241, %242 : vector<8x128xf32>
    %244 = math.tanh %243 : vector<8x128xf32>
    %245 = arith.mulf %240, %244 : vector<8x128xf32>
    %c0_117 = arith.constant 0 : index
    %c0_118 = arith.constant 0 : index
    %246 = vector.load %arg14[%c0_117, %c0_118] : memref<8x128xf32, #tpu.memory_space<vmem>>, vector<8x128xf32>
    tpu.vector_store %arg14[%c0_117, %c0_118], %243 {strides = array<i32>} : memref<8x128xf32, #tpu.memory_space<vmem>>, vector<8x128xf32>,
    %247 = arith.truncf %245 : vector<8x128xf32> to vector<8x128xbf16>
    %c0_119 = arith.constant 0 : index
    %c0_120 = arith.constant 0 : index
    %248 = vector.load %arg13[%c0_119, %c0_120] : memref<8x128xbf16, #tpu.memory_space<vmem>>, vector<8x128xbf16>
    tpu.vector_store %arg13[%c0_119, %c0_120], %247 {strides = array<i32>} : memref<8x128xbf16, #tpu.memory_space<vmem>>, vector<8x128xbf16>,
    %249 = arith.index_cast %c5_i32 : i32 to index
    %c0_121 = arith.constant 0 : index
    %c0_122 = arith.constant 0 : index
    %250 = vector.load %arg11[%249, %c0_121, %c0_122] : memref<8x8x128xbf16, #tpu.memory_space<vmem>>, vector<1x8x128xbf16>
    %251 = vector.shape_cast %250 : vector<1x8x128xbf16> to vector<8x128xbf16>
    %252 = vector.shape_cast %247 : vector<8x128xbf16> to vector<1x8x128xbf16>
    tpu.vector_store %arg11[%249, %c0_121, %c0_122], %252 {strides = array<i32>} : memref<8x8x128xbf16, #tpu.memory_space<vmem>>, vector<1x8x128xbf16>,
    %c6_i32 = arith.constant 6 : i32
    %c0_123 = arith.constant 0 : index
    %c0_124 = arith.constant 0 : index
    %253 = vector.load %arg13[%c0_123, %c0_124] : memref<8x128xbf16, #tpu.memory_space<vmem>>, vector<8x128xbf16>
    %c0_125 = arith.constant 0 : index
    %c0_126 = arith.constant 0 : index
    %254 = vector.load %arg14[%c0_125, %c0_126] : memref<8x128xf32, #tpu.memory_space<vmem>>, vector<8x128xf32>
    %255 = arith.index_cast %c6_i32 : i32 to index
    %c0_127 = arith.constant 0 : index
    %c0_128 = arith.constant 0 : index
    %256 = vector.load %arg12[%255, %c0_127, %c0_128] : memref<8x8x512xf32, #tpu.memory_space<vmem>>, vector<1x8x512xf32>
    %257 = vector.shape_cast %256 : vector<1x8x512xf32> to vector<8x512xf32>
    %c0_129 = arith.constant 0 : index
    %c0_130 = arith.constant 0 : index
    %258 = vector.load %arg3[%c0_129, %c0_130] : memref<128x512xbf16, #tpu.memory_space<vmem>>, vector<128x512xbf16>
    %cst_131 = arith.constant dense<0.000000e+00> : vector<8x512xf32>
    %259 = tpu.matmul %253, %258, %cst_131 {dimension_numbers = #tpu.dot_dimension_numbers<[1], [0], [0], [1], [0, 0, 1, 1], [], []>} : vector<8x128xbf16>, vector<128x512xbf16>, vector<8x512xf32> -> vector<8x512xf32>
    %260 = arith.addf %257, %259 : vector<8x512xf32>
    %261 = vector.extract_strided_slice %260 {offsets = [0, 0], sizes = [8, 128], strides = [1, 1]} : vector<8x512xf32> to vector<8x128xf32>
    %262 = arith.negf %261 : vector<8x128xf32>
    %263 = math.exp %262 : vector<8x128xf32>
    %cst_132 = arith.constant 1.000000e+00 : f32
    %264 = vector.broadcast %cst_132 : f32 to vector<8x128xf32>
    %265 = arith.addf %264, %263 : vector<8x128xf32>
    %266 = arith.divf %264, %265 : vector<8x128xf32>
    %267 = vector.extract_strided_slice %260 {offsets = [0, 128], sizes = [8, 128], strides = [1, 1]} : vector<8x512xf32> to vector<8x128xf32>
    %268 = arith.negf %267 : vector<8x128xf32>
    %269 = math.exp %268 : vector<8x128xf32>
    %cst_133 = arith.constant 1.000000e+00 : f32
    %270 = vector.broadcast %cst_133 : f32 to vector<8x128xf32>
    %271 = arith.addf %270, %269 : vector<8x128xf32>
    %272 = arith.divf %270, %271 : vector<8x128xf32>
    %273 = vector.extract_strided_slice %260 {offsets = [0, 256], sizes = [8, 128], strides = [1, 1]} : vector<8x512xf32> to vector<8x128xf32>
    %274 = math.tanh %273 : vector<8x128xf32>
    %275 = vector.extract_strided_slice %260 {offsets = [0, 384], sizes = [8, 128], strides = [1, 1]} : vector<8x512xf32> to vector<8x128xf32>
    %276 = arith.negf %275 : vector<8x128xf32>
    %277 = math.exp %276 : vector<8x128xf32>
    %cst_134 = arith.constant 1.000000e+00 : f32
    %278 = vector.broadcast %cst_134 : f32 to vector<8x128xf32>
    %279 = arith.addf %278, %277 : vector<8x128xf32>
    %280 = arith.divf %278, %279 : vector<8x128xf32>
    %281 = arith.mulf %272, %254 : vector<8x128xf32>
    %282 = arith.mulf %266, %274 : vector<8x128xf32>
    %283 = arith.addf %281, %282 : vector<8x128xf32>
    %284 = math.tanh %283 : vector<8x128xf32>
    %285 = arith.mulf %280, %284 : vector<8x128xf32>
    %c0_135 = arith.constant 0 : index
    %c0_136 = arith.constant 0 : index
    %286 = vector.load %arg14[%c0_135, %c0_136] : memref<8x128xf32, #tpu.memory_space<vmem>>, vector<8x128xf32>
    tpu.vector_store %arg14[%c0_135, %c0_136], %283 {strides = array<i32>} : memref<8x128xf32, #tpu.memory_space<vmem>>, vector<8x128xf32>,
    %287 = arith.truncf %285 : vector<8x128xf32> to vector<8x128xbf16>
    %c0_137 = arith.constant 0 : index
    %c0_138 = arith.constant 0 : index
    %288 = vector.load %arg13[%c0_137, %c0_138] : memref<8x128xbf16, #tpu.memory_space<vmem>>, vector<8x128xbf16>
    tpu.vector_store %arg13[%c0_137, %c0_138], %287 {strides = array<i32>} : memref<8x128xbf16, #tpu.memory_space<vmem>>, vector<8x128xbf16>,
    %289 = arith.index_cast %c6_i32 : i32 to index
    %c0_139 = arith.constant 0 : index
    %c0_140 = arith.constant 0 : index
    %290 = vector.load %arg11[%289, %c0_139, %c0_140] : memref<8x8x128xbf16, #tpu.memory_space<vmem>>, vector<1x8x128xbf16>
    %291 = vector.shape_cast %290 : vector<1x8x128xbf16> to vector<8x128xbf16>
    %292 = vector.shape_cast %287 : vector<8x128xbf16> to vector<1x8x128xbf16>
    tpu.vector_store %arg11[%289, %c0_139, %c0_140], %292 {strides = array<i32>} : memref<8x8x128xbf16, #tpu.memory_space<vmem>>, vector<1x8x128xbf16>,
    %c7_i32 = arith.constant 7 : i32
    %c0_141 = arith.constant 0 : index
    %c0_142 = arith.constant 0 : index
    %293 = vector.load %arg13[%c0_141, %c0_142] : memref<8x128xbf16, #tpu.memory_space<vmem>>, vector<8x128xbf16>
    %c0_143 = arith.constant 0 : index
    %c0_144 = arith.constant 0 : index
    %294 = vector.load %arg14[%c0_143, %c0_144] : memref<8x128xf32, #tpu.memory_space<vmem>>, vector<8x128xf32>
    %295 = arith.index_cast %c7_i32 : i32 to index
    %c0_145 = arith.constant 0 : index
    %c0_146 = arith.constant 0 : index
    %296 = vector.load %arg12[%295, %c0_145, %c0_146] : memref<8x8x512xf32, #tpu.memory_space<vmem>>, vector<1x8x512xf32>
    %297 = vector.shape_cast %296 : vector<1x8x512xf32> to vector<8x512xf32>
    %c0_147 = arith.constant 0 : index
    %c0_148 = arith.constant 0 : index
    %298 = vector.load %arg3[%c0_147, %c0_148] : memref<128x512xbf16, #tpu.memory_space<vmem>>, vector<128x512xbf16>
    %cst_149 = arith.constant dense<0.000000e+00> : vector<8x512xf32>
    %299 = tpu.matmul %293, %298, %cst_149 {dimension_numbers = #tpu.dot_dimension_numbers<[1], [0], [0], [1], [0, 0, 1, 1], [], []>} : vector<8x128xbf16>, vector<128x512xbf16>, vector<8x512xf32> -> vector<8x512xf32>
    %300 = arith.addf %297, %299 : vector<8x512xf32>
    %301 = vector.extract_strided_slice %300 {offsets = [0, 0], sizes = [8, 128], strides = [1, 1]} : vector<8x512xf32> to vector<8x128xf32>
    %302 = arith.negf %301 : vector<8x128xf32>
    %303 = math.exp %302 : vector<8x128xf32>
    %cst_150 = arith.constant 1.000000e+00 : f32
    %304 = vector.broadcast %cst_150 : f32 to vector<8x128xf32>
    %305 = arith.addf %304, %303 : vector<8x128xf32>
    %306 = arith.divf %304, %305 : vector<8x128xf32>
    %307 = vector.extract_strided_slice %300 {offsets = [0, 128], sizes = [8, 128], strides = [1, 1]} : vector<8x512xf32> to vector<8x128xf32>
    %308 = arith.negf %307 : vector<8x128xf32>
    %309 = math.exp %308 : vector<8x128xf32>
    %cst_151 = arith.constant 1.000000e+00 : f32
    %310 = vector.broadcast %cst_151 : f32 to vector<8x128xf32>
    %311 = arith.addf %310, %309 : vector<8x128xf32>
    %312 = arith.divf %310, %311 : vector<8x128xf32>
    %313 = vector.extract_strided_slice %300 {offsets = [0, 256], sizes = [8, 128], strides = [1, 1]} : vector<8x512xf32> to vector<8x128xf32>
    %314 = math.tanh %313 : vector<8x128xf32>
    %315 = vector.extract_strided_slice %300 {offsets = [0, 384], sizes = [8, 128], strides = [1, 1]} : vector<8x512xf32> to vector<8x128xf32>
    %316 = arith.negf %315 : vector<8x128xf32>
    %317 = math.exp %316 : vector<8x128xf32>
    %cst_152 = arith.constant 1.000000e+00 : f32
    %318 = vector.broadcast %cst_152 : f32 to vector<8x128xf32>
    %319 = arith.addf %318, %317 : vector<8x128xf32>
    %320 = arith.divf %318, %319 : vector<8x128xf32>
    %321 = arith.mulf %312, %294 : vector<8x128xf32>
    %322 = arith.mulf %306, %314 : vector<8x128xf32>
    %323 = arith.addf %321, %322 : vector<8x128xf32>
    %324 = math.tanh %323 : vector<8x128xf32>
    %325 = arith.mulf %320, %324 : vector<8x128xf32>
    %c0_153 = arith.constant 0 : index
    %c0_154 = arith.constant 0 : index
    %326 = vector.load %arg14[%c0_153, %c0_154] : memref<8x128xf32, #tpu.memory_space<vmem>>, vector<8x128xf32>
    tpu.vector_store %arg14[%c0_153, %c0_154], %323 {strides = array<i32>} : memref<8x128xf32, #tpu.memory_space<vmem>>, vector<8x128xf32>,
    %327 = arith.truncf %325 : vector<8x128xf32> to vector<8x128xbf16>
    %c0_155 = arith.constant 0 : index
    %c0_156 = arith.constant 0 : index
    %328 = vector.load %arg13[%c0_155, %c0_156] : memref<8x128xbf16, #tpu.memory_space<vmem>>, vector<8x128xbf16>
    tpu.vector_store %arg13[%c0_155, %c0_156], %327 {strides = array<i32>} : memref<8x128xbf16, #tpu.memory_space<vmem>>, vector<8x128xbf16>,
    %329 = arith.index_cast %c7_i32 : i32 to index
    %c0_157 = arith.constant 0 : index
    %c0_158 = arith.constant 0 : index
    %330 = vector.load %arg11[%329, %c0_157, %c0_158] : memref<8x8x128xbf16, #tpu.memory_space<vmem>>, vector<1x8x128xbf16>
    %331 = vector.shape_cast %330 : vector<1x8x128xbf16> to vector<8x128xbf16>
    %332 = vector.shape_cast %327 : vector<8x128xbf16> to vector<1x8x128xbf16>
    tpu.vector_store %arg11[%329, %c0_157, %c0_158], %332 {strides = array<i32>} : memref<8x8x128xbf16, #tpu.memory_space<vmem>>, vector<1x8x128xbf16>,
    %c8_i32 = arith.constant 8 : i32
    %c0_159 = arith.constant 0 : index
    %c0_160 = arith.constant 0 : index
    %c0_161 = arith.constant 0 : index
    %333 = vector.load %arg11[%c0_159, %c0_160, %c0_161] : memref<8x8x128xbf16, #tpu.memory_space<vmem>>, vector<8x8x128xbf16>
    %334 = vector.shape_cast %333 : vector<8x8x128xbf16> to vector<64x128xbf16>
    %c0_162 = arith.constant 0 : index
    %c0_163 = arith.constant 0 : index
    %335 = vector.load %arg5[%c0_162, %c0_163] : memref<128x512xbf16, #tpu.memory_space<vmem>>, vector<128x512xbf16>
    %cst_164 = arith.constant dense<0.000000e+00> : vector<64x512xf32>
    %336 = tpu.matmul %334, %335, %cst_164 {dimension_numbers = #tpu.dot_dimension_numbers<[1], [0], [0], [1], [0, 0, 1, 1], [], []>} : vector<64x128xbf16>, vector<128x512xbf16>, vector<64x512xf32> -> vector<64x512xf32>
    %c0_165 = arith.constant 0 : index
    %c0_166 = arith.constant 0 : index
    %337 = vector.load %arg7[%c0_165, %c0_166] : memref<1x512xf32, #tpu.memory_space<vmem>>, vector<1x512xf32>
    %338 = vector.broadcast %337 : vector<1x512xf32> to vector<64x512xf32>
    %339 = arith.addf %336, %338 : vector<64x512xf32>
    %340 = vector.shape_cast %339 : vector<64x512xf32> to vector<8x8x512xf32>
    %c0_167 = arith.constant 0 : index
    %c0_168 = arith.constant 0 : index
    %c0_169 = arith.constant 0 : index
    %341 = vector.load %arg12[%c0_167, %c0_168, %c0_169] : memref<8x8x512xf32, #tpu.memory_space<vmem>>, vector<8x8x512xf32>
    tpu.vector_store %arg12[%c0_167, %c0_168, %c0_169], %340 {strides = array<i32>} : memref<8x8x512xf32, #tpu.memory_space<vmem>>, vector<8x8x512xf32>,
    %cst_170 = arith.constant 0.000000e+00 : bf16
    %342 = vector.broadcast %cst_170 : bf16 to vector<8x128xbf16>
    %c0_171 = arith.constant 0 : index
    %c0_172 = arith.constant 0 : index
    %343 = vector.load %arg13[%c0_171, %c0_172] : memref<8x128xbf16, #tpu.memory_space<vmem>>, vector<8x128xbf16>
    tpu.vector_store %arg13[%c0_171, %c0_172], %342 {strides = array<i32>} : memref<8x128xbf16, #tpu.memory_space<vmem>>, vector<8x128xbf16>,
    %cst_173 = arith.constant 0.000000e+00 : f32
    %344 = vector.broadcast %cst_173 : f32 to vector<8x128xf32>
    %c0_174 = arith.constant 0 : index
    %c0_175 = arith.constant 0 : index
    %345 = vector.load %arg14[%c0_174, %c0_175] : memref<8x128xf32, #tpu.memory_space<vmem>>, vector<8x128xf32>
    tpu.vector_store %arg14[%c0_174, %c0_175], %344 {strides = array<i32>} : memref<8x128xf32, #tpu.memory_space<vmem>>, vector<8x128xf32>,
    %c0_i32_176 = arith.constant 0 : i32
    %c0_177 = arith.constant 0 : index
    %c0_178 = arith.constant 0 : index
    %346 = vector.load %arg13[%c0_177, %c0_178] : memref<8x128xbf16, #tpu.memory_space<vmem>>, vector<8x128xbf16>
    %c0_179 = arith.constant 0 : index
    %c0_180 = arith.constant 0 : index
    %347 = vector.load %arg14[%c0_179, %c0_180] : memref<8x128xf32, #tpu.memory_space<vmem>>, vector<8x128xf32>
    %348 = arith.index_cast %c0_i32_176 : i32 to index
    %c0_181 = arith.constant 0 : index
    %c0_182 = arith.constant 0 : index
    %349 = vector.load %arg12[%348, %c0_181, %c0_182] : memref<8x8x512xf32, #tpu.memory_space<vmem>>, vector<1x8x512xf32>
    %350 = vector.shape_cast %349 : vector<1x8x512xf32> to vector<8x512xf32>
    %c0_183 = arith.constant 0 : index
    %c0_184 = arith.constant 0 : index
    %351 = vector.load %arg6[%c0_183, %c0_184] : memref<128x512xbf16, #tpu.memory_space<vmem>>, vector<128x512xbf16>
    %cst_185 = arith.constant dense<0.000000e+00> : vector<8x512xf32>
    %352 = tpu.matmul %346, %351, %cst_185 {dimension_numbers = #tpu.dot_dimension_numbers<[1], [0], [0], [1], [0, 0, 1, 1], [], []>} : vector<8x128xbf16>, vector<128x512xbf16>, vector<8x512xf32> -> vector<8x512xf32>
    %353 = arith.addf %350, %352 : vector<8x512xf32>
    %354 = vector.extract_strided_slice %353 {offsets = [0, 0], sizes = [8, 128], strides = [1, 1]} : vector<8x512xf32> to vector<8x128xf32>
    %355 = arith.negf %354 : vector<8x128xf32>
    %356 = math.exp %355 : vector<8x128xf32>
    %cst_186 = arith.constant 1.000000e+00 : f32
    %357 = vector.broadcast %cst_186 : f32 to vector<8x128xf32>
    %358 = arith.addf %357, %356 : vector<8x128xf32>
    %359 = arith.divf %357, %358 : vector<8x128xf32>
    %360 = vector.extract_strided_slice %353 {offsets = [0, 128], sizes = [8, 128], strides = [1, 1]} : vector<8x512xf32> to vector<8x128xf32>
    %361 = arith.negf %360 : vector<8x128xf32>
    %362 = math.exp %361 : vector<8x128xf32>
    %cst_187 = arith.constant 1.000000e+00 : f32
    %363 = vector.broadcast %cst_187 : f32 to vector<8x128xf32>
    %364 = arith.addf %363, %362 : vector<8x128xf32>
    %365 = arith.divf %363, %364 : vector<8x128xf32>
    %366 = vector.extract_strided_slice %353 {offsets = [0, 256], sizes = [8, 128], strides = [1, 1]} : vector<8x512xf32> to vector<8x128xf32>
    %367 = math.tanh %366 : vector<8x128xf32>
    %368 = vector.extract_strided_slice %353 {offsets = [0, 384], sizes = [8, 128], strides = [1, 1]} : vector<8x512xf32> to vector<8x128xf32>
    %369 = arith.negf %368 : vector<8x128xf32>
    %370 = math.exp %369 : vector<8x128xf32>
    %cst_188 = arith.constant 1.000000e+00 : f32
    %371 = vector.broadcast %cst_188 : f32 to vector<8x128xf32>
    %372 = arith.addf %371, %370 : vector<8x128xf32>
    %373 = arith.divf %371, %372 : vector<8x128xf32>
    %374 = arith.mulf %365, %347 : vector<8x128xf32>
    %375 = arith.mulf %359, %367 : vector<8x128xf32>
    %376 = arith.addf %374, %375 : vector<8x128xf32>
    %377 = math.tanh %376 : vector<8x128xf32>
    %378 = arith.mulf %373, %377 : vector<8x128xf32>
    %c0_189 = arith.constant 0 : index
    %c0_190 = arith.constant 0 : index
    %379 = vector.load %arg14[%c0_189, %c0_190] : memref<8x128xf32, #tpu.memory_space<vmem>>, vector<8x128xf32>
    tpu.vector_store %arg14[%c0_189, %c0_190], %376 {strides = array<i32>} : memref<8x128xf32, #tpu.memory_space<vmem>>, vector<8x128xf32>,
    %380 = arith.truncf %378 : vector<8x128xf32> to vector<8x128xbf16>
    %c0_191 = arith.constant 0 : index
    %c0_192 = arith.constant 0 : index
    %381 = vector.load %arg13[%c0_191, %c0_192] : memref<8x128xbf16, #tpu.memory_space<vmem>>, vector<8x128xbf16>
    tpu.vector_store %arg13[%c0_191, %c0_192], %380 {strides = array<i32>} : memref<8x128xbf16, #tpu.memory_space<vmem>>, vector<8x128xbf16>,
    %c1_i32_193 = arith.constant 1 : i32
    %c0_194 = arith.constant 0 : index
    %c0_195 = arith.constant 0 : index
    %382 = vector.load %arg13[%c0_194, %c0_195] : memref<8x128xbf16, #tpu.memory_space<vmem>>, vector<8x128xbf16>
    %c0_196 = arith.constant 0 : index
    %c0_197 = arith.constant 0 : index
    %383 = vector.load %arg14[%c0_196, %c0_197] : memref<8x128xf32, #tpu.memory_space<vmem>>, vector<8x128xf32>
    %384 = arith.index_cast %c1_i32_193 : i32 to index
    %c0_198 = arith.constant 0 : index
    %c0_199 = arith.constant 0 : index
    %385 = vector.load %arg12[%384, %c0_198, %c0_199] : memref<8x8x512xf32, #tpu.memory_space<vmem>>, vector<1x8x512xf32>
    %386 = vector.shape_cast %385 : vector<1x8x512xf32> to vector<8x512xf32>
    %c0_200 = arith.constant 0 : index
    %c0_201 = arith.constant 0 : index
    %387 = vector.load %arg6[%c0_200, %c0_201] : memref<128x512xbf16, #tpu.memory_space<vmem>>, vector<128x512xbf16>
    %cst_202 = arith.constant dense<0.000000e+00> : vector<8x512xf32>
    %388 = tpu.matmul %382, %387, %cst_202 {dimension_numbers = #tpu.dot_dimension_numbers<[1], [0], [0], [1], [0, 0, 1, 1], [], []>} : vector<8x128xbf16>, vector<128x512xbf16>, vector<8x512xf32> -> vector<8x512xf32>
    %389 = arith.addf %386, %388 : vector<8x512xf32>
    %390 = vector.extract_strided_slice %389 {offsets = [0, 0], sizes = [8, 128], strides = [1, 1]} : vector<8x512xf32> to vector<8x128xf32>
    %391 = arith.negf %390 : vector<8x128xf32>
    %392 = math.exp %391 : vector<8x128xf32>
    %cst_203 = arith.constant 1.000000e+00 : f32
    %393 = vector.broadcast %cst_203 : f32 to vector<8x128xf32>
    %394 = arith.addf %393, %392 : vector<8x128xf32>
    %395 = arith.divf %393, %394 : vector<8x128xf32>
    %396 = vector.extract_strided_slice %389 {offsets = [0, 128], sizes = [8, 128], strides = [1, 1]} : vector<8x512xf32> to vector<8x128xf32>
    %397 = arith.negf %396 : vector<8x128xf32>
    %398 = math.exp %397 : vector<8x128xf32>
    %cst_204 = arith.constant 1.000000e+00 : f32
    %399 = vector.broadcast %cst_204 : f32 to vector<8x128xf32>
    %400 = arith.addf %399, %398 : vector<8x128xf32>
    %401 = arith.divf %399, %400 : vector<8x128xf32>
    %402 = vector.extract_strided_slice %389 {offsets = [0, 256], sizes = [8, 128], strides = [1, 1]} : vector<8x512xf32> to vector<8x128xf32>
    %403 = math.tanh %402 : vector<8x128xf32>
    %404 = vector.extract_strided_slice %389 {offsets = [0, 384], sizes = [8, 128], strides = [1, 1]} : vector<8x512xf32> to vector<8x128xf32>
    %405 = arith.negf %404 : vector<8x128xf32>
    %406 = math.exp %405 : vector<8x128xf32>
    %cst_205 = arith.constant 1.000000e+00 : f32
    %407 = vector.broadcast %cst_205 : f32 to vector<8x128xf32>
    %408 = arith.addf %407, %406 : vector<8x128xf32>
    %409 = arith.divf %407, %408 : vector<8x128xf32>
    %410 = arith.mulf %401, %383 : vector<8x128xf32>
    %411 = arith.mulf %395, %403 : vector<8x128xf32>
    %412 = arith.addf %410, %411 : vector<8x128xf32>
    %413 = math.tanh %412 : vector<8x128xf32>
    %414 = arith.mulf %409, %413 : vector<8x128xf32>
    %c0_206 = arith.constant 0 : index
    %c0_207 = arith.constant 0 : index
    %415 = vector.load %arg14[%c0_206, %c0_207] : memref<8x128xf32, #tpu.memory_space<vmem>>, vector<8x128xf32>
    tpu.vector_store %arg14[%c0_206, %c0_207], %412 {strides = array<i32>} : memref<8x128xf32, #tpu.memory_space<vmem>>, vector<8x128xf32>,
    %416 = arith.truncf %414 : vector<8x128xf32> to vector<8x128xbf16>
    %c0_208 = arith.constant 0 : index
    %c0_209 = arith.constant 0 : index
    %417 = vector.load %arg13[%c0_208, %c0_209] : memref<8x128xbf16, #tpu.memory_space<vmem>>, vector<8x128xbf16>
    tpu.vector_store %arg13[%c0_208, %c0_209], %416 {strides = array<i32>} : memref<8x128xbf16, #tpu.memory_space<vmem>>, vector<8x128xbf16>,
    %c2_i32_210 = arith.constant 2 : i32
    %c0_211 = arith.constant 0 : index
    %c0_212 = arith.constant 0 : index
    %418 = vector.load %arg13[%c0_211, %c0_212] : memref<8x128xbf16, #tpu.memory_space<vmem>>, vector<8x128xbf16>
    %c0_213 = arith.constant 0 : index
    %c0_214 = arith.constant 0 : index
    %419 = vector.load %arg14[%c0_213, %c0_214] : memref<8x128xf32, #tpu.memory_space<vmem>>, vector<8x128xf32>
    %420 = arith.index_cast %c2_i32_210 : i32 to index
    %c0_215 = arith.constant 0 : index
    %c0_216 = arith.constant 0 : index
    %421 = vector.load %arg12[%420, %c0_215, %c0_216] : memref<8x8x512xf32, #tpu.memory_space<vmem>>, vector<1x8x512xf32>
    %422 = vector.shape_cast %421 : vector<1x8x512xf32> to vector<8x512xf32>
    %c0_217 = arith.constant 0 : index
    %c0_218 = arith.constant 0 : index
    %423 = vector.load %arg6[%c0_217, %c0_218] : memref<128x512xbf16, #tpu.memory_space<vmem>>, vector<128x512xbf16>
    %cst_219 = arith.constant dense<0.000000e+00> : vector<8x512xf32>
    %424 = tpu.matmul %418, %423, %cst_219 {dimension_numbers = #tpu.dot_dimension_numbers<[1], [0], [0], [1], [0, 0, 1, 1], [], []>} : vector<8x128xbf16>, vector<128x512xbf16>, vector<8x512xf32> -> vector<8x512xf32>
    %425 = arith.addf %422, %424 : vector<8x512xf32>
    %426 = vector.extract_strided_slice %425 {offsets = [0, 0], sizes = [8, 128], strides = [1, 1]} : vector<8x512xf32> to vector<8x128xf32>
    %427 = arith.negf %426 : vector<8x128xf32>
    %428 = math.exp %427 : vector<8x128xf32>
    %cst_220 = arith.constant 1.000000e+00 : f32
    %429 = vector.broadcast %cst_220 : f32 to vector<8x128xf32>
    %430 = arith.addf %429, %428 : vector<8x128xf32>
    %431 = arith.divf %429, %430 : vector<8x128xf32>
    %432 = vector.extract_strided_slice %425 {offsets = [0, 128], sizes = [8, 128], strides = [1, 1]} : vector<8x512xf32> to vector<8x128xf32>
    %433 = arith.negf %432 : vector<8x128xf32>
    %434 = math.exp %433 : vector<8x128xf32>
    %cst_221 = arith.constant 1.000000e+00 : f32
    %435 = vector.broadcast %cst_221 : f32 to vector<8x128xf32>
    %436 = arith.addf %435, %434 : vector<8x128xf32>
    %437 = arith.divf %435, %436 : vector<8x128xf32>
    %438 = vector.extract_strided_slice %425 {offsets = [0, 256], sizes = [8, 128], strides = [1, 1]} : vector<8x512xf32> to vector<8x128xf32>
    %439 = math.tanh %438 : vector<8x128xf32>
    %440 = vector.extract_strided_slice %425 {offsets = [0, 384], sizes = [8, 128], strides = [1, 1]} : vector<8x512xf32> to vector<8x128xf32>
    %441 = arith.negf %440 : vector<8x128xf32>
    %442 = math.exp %441 : vector<8x128xf32>
    %cst_222 = arith.constant 1.000000e+00 : f32
    %443 = vector.broadcast %cst_222 : f32 to vector<8x128xf32>
    %444 = arith.addf %443, %442 : vector<8x128xf32>
    %445 = arith.divf %443, %444 : vector<8x128xf32>
    %446 = arith.mulf %437, %419 : vector<8x128xf32>
    %447 = arith.mulf %431, %439 : vector<8x128xf32>
    %448 = arith.addf %446, %447 : vector<8x128xf32>
    %449 = math.tanh %448 : vector<8x128xf32>
    %450 = arith.mulf %445, %449 : vector<8x128xf32>
    %c0_223 = arith.constant 0 : index
    %c0_224 = arith.constant 0 : index
    %451 = vector.load %arg14[%c0_223, %c0_224] : memref<8x128xf32, #tpu.memory_space<vmem>>, vector<8x128xf32>
    tpu.vector_store %arg14[%c0_223, %c0_224], %448 {strides = array<i32>} : memref<8x128xf32, #tpu.memory_space<vmem>>, vector<8x128xf32>,
    %452 = arith.truncf %450 : vector<8x128xf32> to vector<8x128xbf16>
    %c0_225 = arith.constant 0 : index
    %c0_226 = arith.constant 0 : index
    %453 = vector.load %arg13[%c0_225, %c0_226] : memref<8x128xbf16, #tpu.memory_space<vmem>>, vector<8x128xbf16>
    tpu.vector_store %arg13[%c0_225, %c0_226], %452 {strides = array<i32>} : memref<8x128xbf16, #tpu.memory_space<vmem>>, vector<8x128xbf16>,
    %c3_i32_227 = arith.constant 3 : i32
    %c0_228 = arith.constant 0 : index
    %c0_229 = arith.constant 0 : index
    %454 = vector.load %arg13[%c0_228, %c0_229] : memref<8x128xbf16, #tpu.memory_space<vmem>>, vector<8x128xbf16>
    %c0_230 = arith.constant 0 : index
    %c0_231 = arith.constant 0 : index
    %455 = vector.load %arg14[%c0_230, %c0_231] : memref<8x128xf32, #tpu.memory_space<vmem>>, vector<8x128xf32>
    %456 = arith.index_cast %c3_i32_227 : i32 to index
    %c0_232 = arith.constant 0 : index
    %c0_233 = arith.constant 0 : index
    %457 = vector.load %arg12[%456, %c0_232, %c0_233] : memref<8x8x512xf32, #tpu.memory_space<vmem>>, vector<1x8x512xf32>
    %458 = vector.shape_cast %457 : vector<1x8x512xf32> to vector<8x512xf32>
    %c0_234 = arith.constant 0 : index
    %c0_235 = arith.constant 0 : index
    %459 = vector.load %arg6[%c0_234, %c0_235] : memref<128x512xbf16, #tpu.memory_space<vmem>>, vector<128x512xbf16>
    %cst_236 = arith.constant dense<0.000000e+00> : vector<8x512xf32>
    %460 = tpu.matmul %454, %459, %cst_236 {dimension_numbers = #tpu.dot_dimension_numbers<[1], [0], [0], [1], [0, 0, 1, 1], [], []>} : vector<8x128xbf16>, vector<128x512xbf16>, vector<8x512xf32> -> vector<8x512xf32>
    %461 = arith.addf %458, %460 : vector<8x512xf32>
    %462 = vector.extract_strided_slice %461 {offsets = [0, 0], sizes = [8, 128], strides = [1, 1]} : vector<8x512xf32> to vector<8x128xf32>
    %463 = arith.negf %462 : vector<8x128xf32>
    %464 = math.exp %463 : vector<8x128xf32>
    %cst_237 = arith.constant 1.000000e+00 : f32
    %465 = vector.broadcast %cst_237 : f32 to vector<8x128xf32>
    %466 = arith.addf %465, %464 : vector<8x128xf32>
    %467 = arith.divf %465, %466 : vector<8x128xf32>
    %468 = vector.extract_strided_slice %461 {offsets = [0, 128], sizes = [8, 128], strides = [1, 1]} : vector<8x512xf32> to vector<8x128xf32>
    %469 = arith.negf %468 : vector<8x128xf32>
    %470 = math.exp %469 : vector<8x128xf32>
    %cst_238 = arith.constant 1.000000e+00 : f32
    %471 = vector.broadcast %cst_238 : f32 to vector<8x128xf32>
    %472 = arith.addf %471, %470 : vector<8x128xf32>
    %473 = arith.divf %471, %472 : vector<8x128xf32>
    %474 = vector.extract_strided_slice %461 {offsets = [0, 256], sizes = [8, 128], strides = [1, 1]} : vector<8x512xf32> to vector<8x128xf32>
    %475 = math.tanh %474 : vector<8x128xf32>
    %476 = vector.extract_strided_slice %461 {offsets = [0, 384], sizes = [8, 128], strides = [1, 1]} : vector<8x512xf32> to vector<8x128xf32>
    %477 = arith.negf %476 : vector<8x128xf32>
    %478 = math.exp %477 : vector<8x128xf32>
    %cst_239 = arith.constant 1.000000e+00 : f32
    %479 = vector.broadcast %cst_239 : f32 to vector<8x128xf32>
    %480 = arith.addf %479, %478 : vector<8x128xf32>
    %481 = arith.divf %479, %480 : vector<8x128xf32>
    %482 = arith.mulf %473, %455 : vector<8x128xf32>
    %483 = arith.mulf %467, %475 : vector<8x128xf32>
    %484 = arith.addf %482, %483 : vector<8x128xf32>
    %485 = math.tanh %484 : vector<8x128xf32>
    %486 = arith.mulf %481, %485 : vector<8x128xf32>
    %c0_240 = arith.constant 0 : index
    %c0_241 = arith.constant 0 : index
    %487 = vector.load %arg14[%c0_240, %c0_241] : memref<8x128xf32, #tpu.memory_space<vmem>>, vector<8x128xf32>
    tpu.vector_store %arg14[%c0_240, %c0_241], %484 {strides = array<i32>} : memref<8x128xf32, #tpu.memory_space<vmem>>, vector<8x128xf32>,
    %488 = arith.truncf %486 : vector<8x128xf32> to vector<8x128xbf16>
    %c0_242 = arith.constant 0 : index
    %c0_243 = arith.constant 0 : index
    %489 = vector.load %arg13[%c0_242, %c0_243] : memref<8x128xbf16, #tpu.memory_space<vmem>>, vector<8x128xbf16>
    tpu.vector_store %arg13[%c0_242, %c0_243], %488 {strides = array<i32>} : memref<8x128xbf16, #tpu.memory_space<vmem>>, vector<8x128xbf16>,
    %c4_i32_244 = arith.constant 4 : i32
    %c0_245 = arith.constant 0 : index
    %c0_246 = arith.constant 0 : index
    %490 = vector.load %arg13[%c0_245, %c0_246] : memref<8x128xbf16, #tpu.memory_space<vmem>>, vector<8x128xbf16>
    %c0_247 = arith.constant 0 : index
    %c0_248 = arith.constant 0 : index
    %491 = vector.load %arg14[%c0_247, %c0_248] : memref<8x128xf32, #tpu.memory_space<vmem>>, vector<8x128xf32>
    %492 = arith.index_cast %c4_i32_244 : i32 to index
    %c0_249 = arith.constant 0 : index
    %c0_250 = arith.constant 0 : index
    %493 = vector.load %arg12[%492, %c0_249, %c0_250] : memref<8x8x512xf32, #tpu.memory_space<vmem>>, vector<1x8x512xf32>
    %494 = vector.shape_cast %493 : vector<1x8x512xf32> to vector<8x512xf32>
    %c0_251 = arith.constant 0 : index
    %c0_252 = arith.constant 0 : index
    %495 = vector.load %arg6[%c0_251, %c0_252] : memref<128x512xbf16, #tpu.memory_space<vmem>>, vector<128x512xbf16>
    %cst_253 = arith.constant dense<0.000000e+00> : vector<8x512xf32>
    %496 = tpu.matmul %490, %495, %cst_253 {dimension_numbers = #tpu.dot_dimension_numbers<[1], [0], [0], [1], [0, 0, 1, 1], [], []>} : vector<8x128xbf16>, vector<128x512xbf16>, vector<8x512xf32> -> vector<8x512xf32>
    %497 = arith.addf %494, %496 : vector<8x512xf32>
    %498 = vector.extract_strided_slice %497 {offsets = [0, 0], sizes = [8, 128], strides = [1, 1]} : vector<8x512xf32> to vector<8x128xf32>
    %499 = arith.negf %498 : vector<8x128xf32>
    %500 = math.exp %499 : vector<8x128xf32>
    %cst_254 = arith.constant 1.000000e+00 : f32
    %501 = vector.broadcast %cst_254 : f32 to vector<8x128xf32>
    %502 = arith.addf %501, %500 : vector<8x128xf32>
    %503 = arith.divf %501, %502 : vector<8x128xf32>
    %504 = vector.extract_strided_slice %497 {offsets = [0, 128], sizes = [8, 128], strides = [1, 1]} : vector<8x512xf32> to vector<8x128xf32>
    %505 = arith.negf %504 : vector<8x128xf32>
    %506 = math.exp %505 : vector<8x128xf32>
    %cst_255 = arith.constant 1.000000e+00 : f32
    %507 = vector.broadcast %cst_255 : f32 to vector<8x128xf32>
    %508 = arith.addf %507, %506 : vector<8x128xf32>
    %509 = arith.divf %507, %508 : vector<8x128xf32>
    %510 = vector.extract_strided_slice %497 {offsets = [0, 256], sizes = [8, 128], strides = [1, 1]} : vector<8x512xf32> to vector<8x128xf32>
    %511 = math.tanh %510 : vector<8x128xf32>
    %512 = vector.extract_strided_slice %497 {offsets = [0, 384], sizes = [8, 128], strides = [1, 1]} : vector<8x512xf32> to vector<8x128xf32>
    %513 = arith.negf %512 : vector<8x128xf32>
    %514 = math.exp %513 : vector<8x128xf32>
    %cst_256 = arith.constant 1.000000e+00 : f32
    %515 = vector.broadcast %cst_256 : f32 to vector<8x128xf32>
    %516 = arith.addf %515, %514 : vector<8x128xf32>
    %517 = arith.divf %515, %516 : vector<8x128xf32>
    %518 = arith.mulf %509, %491 : vector<8x128xf32>
    %519 = arith.mulf %503, %511 : vector<8x128xf32>
    %520 = arith.addf %518, %519 : vector<8x128xf32>
    %521 = math.tanh %520 : vector<8x128xf32>
    %522 = arith.mulf %517, %521 : vector<8x128xf32>
    %c0_257 = arith.constant 0 : index
    %c0_258 = arith.constant 0 : index
    %523 = vector.load %arg14[%c0_257, %c0_258] : memref<8x128xf32, #tpu.memory_space<vmem>>, vector<8x128xf32>
    tpu.vector_store %arg14[%c0_257, %c0_258], %520 {strides = array<i32>} : memref<8x128xf32, #tpu.memory_space<vmem>>, vector<8x128xf32>,
    %524 = arith.truncf %522 : vector<8x128xf32> to vector<8x128xbf16>
    %c0_259 = arith.constant 0 : index
    %c0_260 = arith.constant 0 : index
    %525 = vector.load %arg13[%c0_259, %c0_260] : memref<8x128xbf16, #tpu.memory_space<vmem>>, vector<8x128xbf16>
    tpu.vector_store %arg13[%c0_259, %c0_260], %524 {strides = array<i32>} : memref<8x128xbf16, #tpu.memory_space<vmem>>, vector<8x128xbf16>,
    %c5_i32_261 = arith.constant 5 : i32
    %c0_262 = arith.constant 0 : index
    %c0_263 = arith.constant 0 : index
    %526 = vector.load %arg13[%c0_262, %c0_263] : memref<8x128xbf16, #tpu.memory_space<vmem>>, vector<8x128xbf16>
    %c0_264 = arith.constant 0 : index
    %c0_265 = arith.constant 0 : index
    %527 = vector.load %arg14[%c0_264, %c0_265] : memref<8x128xf32, #tpu.memory_space<vmem>>, vector<8x128xf32>
    %528 = arith.index_cast %c5_i32_261 : i32 to index
    %c0_266 = arith.constant 0 : index
    %c0_267 = arith.constant 0 : index
    %529 = vector.load %arg12[%528, %c0_266, %c0_267] : memref<8x8x512xf32, #tpu.memory_space<vmem>>, vector<1x8x512xf32>
    %530 = vector.shape_cast %529 : vector<1x8x512xf32> to vector<8x512xf32>
    %c0_268 = arith.constant 0 : index
    %c0_269 = arith.constant 0 : index
    %531 = vector.load %arg6[%c0_268, %c0_269] : memref<128x512xbf16, #tpu.memory_space<vmem>>, vector<128x512xbf16>
    %cst_270 = arith.constant dense<0.000000e+00> : vector<8x512xf32>
    %532 = tpu.matmul %526, %531, %cst_270 {dimension_numbers = #tpu.dot_dimension_numbers<[1], [0], [0], [1], [0, 0, 1, 1], [], []>} : vector<8x128xbf16>, vector<128x512xbf16>, vector<8x512xf32> -> vector<8x512xf32>
    %533 = arith.addf %530, %532 : vector<8x512xf32>
    %534 = vector.extract_strided_slice %533 {offsets = [0, 0], sizes = [8, 128], strides = [1, 1]} : vector<8x512xf32> to vector<8x128xf32>
    %535 = arith.negf %534 : vector<8x128xf32>
    %536 = math.exp %535 : vector<8x128xf32>
    %cst_271 = arith.constant 1.000000e+00 : f32
    %537 = vector.broadcast %cst_271 : f32 to vector<8x128xf32>
    %538 = arith.addf %537, %536 : vector<8x128xf32>
    %539 = arith.divf %537, %538 : vector<8x128xf32>
    %540 = vector.extract_strided_slice %533 {offsets = [0, 128], sizes = [8, 128], strides = [1, 1]} : vector<8x512xf32> to vector<8x128xf32>
    %541 = arith.negf %540 : vector<8x128xf32>
    %542 = math.exp %541 : vector<8x128xf32>
    %cst_272 = arith.constant 1.000000e+00 : f32
    %543 = vector.broadcast %cst_272 : f32 to vector<8x128xf32>
    %544 = arith.addf %543, %542 : vector<8x128xf32>
    %545 = arith.divf %543, %544 : vector<8x128xf32>
    %546 = vector.extract_strided_slice %533 {offsets = [0, 256], sizes = [8, 128], strides = [1, 1]} : vector<8x512xf32> to vector<8x128xf32>
    %547 = math.tanh %546 : vector<8x128xf32>
    %548 = vector.extract_strided_slice %533 {offsets = [0, 384], sizes = [8, 128], strides = [1, 1]} : vector<8x512xf32> to vector<8x128xf32>
    %549 = arith.negf %548 : vector<8x128xf32>
    %550 = math.exp %549 : vector<8x128xf32>
    %cst_273 = arith.constant 1.000000e+00 : f32
    %551 = vector.broadcast %cst_273 : f32 to vector<8x128xf32>
    %552 = arith.addf %551, %550 : vector<8x128xf32>
    %553 = arith.divf %551, %552 : vector<8x128xf32>
    %554 = arith.mulf %545, %527 : vector<8x128xf32>
    %555 = arith.mulf %539, %547 : vector<8x128xf32>
    %556 = arith.addf %554, %555 : vector<8x128xf32>
    %557 = math.tanh %556 : vector<8x128xf32>
    %558 = arith.mulf %553, %557 : vector<8x128xf32>
    %c0_274 = arith.constant 0 : index
    %c0_275 = arith.constant 0 : index
    %559 = vector.load %arg14[%c0_274, %c0_275] : memref<8x128xf32, #tpu.memory_space<vmem>>, vector<8x128xf32>
    tpu.vector_store %arg14[%c0_274, %c0_275], %556 {strides = array<i32>} : memref<8x128xf32, #tpu.memory_space<vmem>>, vector<8x128xf32>,
    %560 = arith.truncf %558 : vector<8x128xf32> to vector<8x128xbf16>
    %c0_276 = arith.constant 0 : index
    %c0_277 = arith.constant 0 : index
    %561 = vector.load %arg13[%c0_276, %c0_277] : memref<8x128xbf16, #tpu.memory_space<vmem>>, vector<8x128xbf16>
    tpu.vector_store %arg13[%c0_276, %c0_277], %560 {strides = array<i32>} : memref<8x128xbf16, #tpu.memory_space<vmem>>, vector<8x128xbf16>,
    %c6_i32_278 = arith.constant 6 : i32
    %c0_279 = arith.constant 0 : index
    %c0_280 = arith.constant 0 : index
    %562 = vector.load %arg13[%c0_279, %c0_280] : memref<8x128xbf16, #tpu.memory_space<vmem>>, vector<8x128xbf16>
    %c0_281 = arith.constant 0 : index
    %c0_282 = arith.constant 0 : index
    %563 = vector.load %arg14[%c0_281, %c0_282] : memref<8x128xf32, #tpu.memory_space<vmem>>, vector<8x128xf32>
    %564 = arith.index_cast %c6_i32_278 : i32 to index
    %c0_283 = arith.constant 0 : index
    %c0_284 = arith.constant 0 : index
    %565 = vector.load %arg12[%564, %c0_283, %c0_284] : memref<8x8x512xf32, #tpu.memory_space<vmem>>, vector<1x8x512xf32>
    %566 = vector.shape_cast %565 : vector<1x8x512xf32> to vector<8x512xf32>
    %c0_285 = arith.constant 0 : index
    %c0_286 = arith.constant 0 : index
    %567 = vector.load %arg6[%c0_285, %c0_286] : memref<128x512xbf16, #tpu.memory_space<vmem>>, vector<128x512xbf16>
    %cst_287 = arith.constant dense<0.000000e+00> : vector<8x512xf32>
    %568 = tpu.matmul %562, %567, %cst_287 {dimension_numbers = #tpu.dot_dimension_numbers<[1], [0], [0], [1], [0, 0, 1, 1], [], []>} : vector<8x128xbf16>, vector<128x512xbf16>, vector<8x512xf32> -> vector<8x512xf32>
    %569 = arith.addf %566, %568 : vector<8x512xf32>
    %570 = vector.extract_strided_slice %569 {offsets = [0, 0], sizes = [8, 128], strides = [1, 1]} : vector<8x512xf32> to vector<8x128xf32>
    %571 = arith.negf %570 : vector<8x128xf32>
    %572 = math.exp %571 : vector<8x128xf32>
    %cst_288 = arith.constant 1.000000e+00 : f32
    %573 = vector.broadcast %cst_288 : f32 to vector<8x128xf32>
    %574 = arith.addf %573, %572 : vector<8x128xf32>
    %575 = arith.divf %573, %574 : vector<8x128xf32>
    %576 = vector.extract_strided_slice %569 {offsets = [0, 128], sizes = [8, 128], strides = [1, 1]} : vector<8x512xf32> to vector<8x128xf32>
    %577 = arith.negf %576 : vector<8x128xf32>
    %578 = math.exp %577 : vector<8x128xf32>
    %cst_289 = arith.constant 1.000000e+00 : f32
    %579 = vector.broadcast %cst_289 : f32 to vector<8x128xf32>
    %580 = arith.addf %579, %578 : vector<8x128xf32>
    %581 = arith.divf %579, %580 : vector<8x128xf32>
    %582 = vector.extract_strided_slice %569 {offsets = [0, 256], sizes = [8, 128], strides = [1, 1]} : vector<8x512xf32> to vector<8x128xf32>
    %583 = math.tanh %582 : vector<8x128xf32>
    %584 = vector.extract_strided_slice %569 {offsets = [0, 384], sizes = [8, 128], strides = [1, 1]} : vector<8x512xf32> to vector<8x128xf32>
    %585 = arith.negf %584 : vector<8x128xf32>
    %586 = math.exp %585 : vector<8x128xf32>
    %cst_290 = arith.constant 1.000000e+00 : f32
    %587 = vector.broadcast %cst_290 : f32 to vector<8x128xf32>
    %588 = arith.addf %587, %586 : vector<8x128xf32>
    %589 = arith.divf %587, %588 : vector<8x128xf32>
    %590 = arith.mulf %581, %563 : vector<8x128xf32>
    %591 = arith.mulf %575, %583 : vector<8x128xf32>
    %592 = arith.addf %590, %591 : vector<8x128xf32>
    %593 = math.tanh %592 : vector<8x128xf32>
    %594 = arith.mulf %589, %593 : vector<8x128xf32>
    %c0_291 = arith.constant 0 : index
    %c0_292 = arith.constant 0 : index
    %595 = vector.load %arg14[%c0_291, %c0_292] : memref<8x128xf32, #tpu.memory_space<vmem>>, vector<8x128xf32>
    tpu.vector_store %arg14[%c0_291, %c0_292], %592 {strides = array<i32>} : memref<8x128xf32, #tpu.memory_space<vmem>>, vector<8x128xf32>,
    %596 = arith.truncf %594 : vector<8x128xf32> to vector<8x128xbf16>
    %c0_293 = arith.constant 0 : index
    %c0_294 = arith.constant 0 : index
    %597 = vector.load %arg13[%c0_293, %c0_294] : memref<8x128xbf16, #tpu.memory_space<vmem>>, vector<8x128xbf16>
    tpu.vector_store %arg13[%c0_293, %c0_294], %596 {strides = array<i32>} : memref<8x128xbf16, #tpu.memory_space<vmem>>, vector<8x128xbf16>,
    %c7_i32_295 = arith.constant 7 : i32
    %c0_296 = arith.constant 0 : index
    %c0_297 = arith.constant 0 : index
    %598 = vector.load %arg13[%c0_296, %c0_297] : memref<8x128xbf16, #tpu.memory_space<vmem>>, vector<8x128xbf16>
    %c0_298 = arith.constant 0 : index
    %c0_299 = arith.constant 0 : index
    %599 = vector.load %arg14[%c0_298, %c0_299] : memref<8x128xf32, #tpu.memory_space<vmem>>, vector<8x128xf32>
    %600 = arith.index_cast %c7_i32_295 : i32 to index
    %c0_300 = arith.constant 0 : index
    %c0_301 = arith.constant 0 : index
    %601 = vector.load %arg12[%600, %c0_300, %c0_301] : memref<8x8x512xf32, #tpu.memory_space<vmem>>, vector<1x8x512xf32>
    %602 = vector.shape_cast %601 : vector<1x8x512xf32> to vector<8x512xf32>
    %c0_302 = arith.constant 0 : index
    %c0_303 = arith.constant 0 : index
    %603 = vector.load %arg6[%c0_302, %c0_303] : memref<128x512xbf16, #tpu.memory_space<vmem>>, vector<128x512xbf16>
    %cst_304 = arith.constant dense<0.000000e+00> : vector<8x512xf32>
    %604 = tpu.matmul %598, %603, %cst_304 {dimension_numbers = #tpu.dot_dimension_numbers<[1], [0], [0], [1], [0, 0, 1, 1], [], []>} : vector<8x128xbf16>, vector<128x512xbf16>, vector<8x512xf32> -> vector<8x512xf32>
    %605 = arith.addf %602, %604 : vector<8x512xf32>
    %606 = vector.extract_strided_slice %605 {offsets = [0, 0], sizes = [8, 128], strides = [1, 1]} : vector<8x512xf32> to vector<8x128xf32>
    %607 = arith.negf %606 : vector<8x128xf32>
    %608 = math.exp %607 : vector<8x128xf32>
    %cst_305 = arith.constant 1.000000e+00 : f32
    %609 = vector.broadcast %cst_305 : f32 to vector<8x128xf32>
    %610 = arith.addf %609, %608 : vector<8x128xf32>
    %611 = arith.divf %609, %610 : vector<8x128xf32>
    %612 = vector.extract_strided_slice %605 {offsets = [0, 128], sizes = [8, 128], strides = [1, 1]} : vector<8x512xf32> to vector<8x128xf32>
    %613 = arith.negf %612 : vector<8x128xf32>
    %614 = math.exp %613 : vector<8x128xf32>
    %cst_306 = arith.constant 1.000000e+00 : f32
    %615 = vector.broadcast %cst_306 : f32 to vector<8x128xf32>
    %616 = arith.addf %615, %614 : vector<8x128xf32>
    %617 = arith.divf %615, %616 : vector<8x128xf32>
    %618 = vector.extract_strided_slice %605 {offsets = [0, 256], sizes = [8, 128], strides = [1, 1]} : vector<8x512xf32> to vector<8x128xf32>
    %619 = math.tanh %618 : vector<8x128xf32>
    %620 = vector.extract_strided_slice %605 {offsets = [0, 384], sizes = [8, 128], strides = [1, 1]} : vector<8x512xf32> to vector<8x128xf32>
    %621 = arith.negf %620 : vector<8x128xf32>
    %622 = math.exp %621 : vector<8x128xf32>
    %cst_307 = arith.constant 1.000000e+00 : f32
    %623 = vector.broadcast %cst_307 : f32 to vector<8x128xf32>
    %624 = arith.addf %623, %622 : vector<8x128xf32>
    %625 = arith.divf %623, %624 : vector<8x128xf32>
    %626 = arith.mulf %617, %599 : vector<8x128xf32>
    %627 = arith.mulf %611, %619 : vector<8x128xf32>
    %628 = arith.addf %626, %627 : vector<8x128xf32>
    %629 = math.tanh %628 : vector<8x128xf32>
    %630 = arith.mulf %625, %629 : vector<8x128xf32>
    %c0_308 = arith.constant 0 : index
    %c0_309 = arith.constant 0 : index
    %631 = vector.load %arg14[%c0_308, %c0_309] : memref<8x128xf32, #tpu.memory_space<vmem>>, vector<8x128xf32>
    tpu.vector_store %arg14[%c0_308, %c0_309], %628 {strides = array<i32>} : memref<8x128xf32, #tpu.memory_space<vmem>>, vector<8x128xf32>,
    %632 = arith.truncf %630 : vector<8x128xf32> to vector<8x128xbf16>
    %c0_310 = arith.constant 0 : index
    %c0_311 = arith.constant 0 : index
    %633 = vector.load %arg13[%c0_310, %c0_311] : memref<8x128xbf16, #tpu.memory_space<vmem>>, vector<8x128xbf16>
    tpu.vector_store %arg13[%c0_310, %c0_311], %632 {strides = array<i32>} : memref<8x128xbf16, #tpu.memory_space<vmem>>, vector<8x128xbf16>,
    %c8_i32_312 = arith.constant 8 : i32
    %c0_313 = arith.constant 0 : index
    %c0_314 = arith.constant 0 : index
    %634 = vector.load %arg13[%c0_313, %c0_314] : memref<8x128xbf16, #tpu.memory_space<vmem>>, vector<8x128xbf16>
    %c0_315 = arith.constant 0 : index
    %c0_316 = arith.constant 0 : index
    %635 = vector.load %arg8[%c0_315, %c0_316] : memref<128x128xbf16, #tpu.memory_space<vmem>>, vector<128x128xbf16>
    %cst_317 = arith.constant dense<0.000000e+00> : vector<8x128xf32>
    %636 = tpu.matmul %634, %635, %cst_317 {dimension_numbers = #tpu.dot_dimension_numbers<[1], [0], [0], [1], [0, 0, 1, 1], [], []>} : vector<8x128xbf16>, vector<128x128xbf16>, vector<8x128xf32> -> vector<8x128xf32>
    %c0_318 = arith.constant 0 : index
    %c0_319 = arith.constant 0 : index
    %637 = vector.load %arg9[%c0_318, %c0_319] : memref<1x128xf32, #tpu.memory_space<vmem>>, vector<1x128xf32>
    %638 = vector.broadcast %637 : vector<1x128xf32> to vector<8x128xf32>
    %639 = arith.addf %636, %638 : vector<8x128xf32>
    %c0_320 = arith.constant 0 : index
    %c0_321 = arith.constant 0 : index
    %640 = vector.load %arg10[%c0_320, %c0_321] : memref<8x128xf32, #tpu.memory_space<vmem>>, vector<8x128xf32>
    tpu.vector_store %arg10[%c0_320, %c0_321], %639 {strides = array<i32>} : memref<8x128xf32, #tpu.memory_space<vmem>>, vector<8x128xf32>,
    return
  }
  func.func @transform_0(%arg0: i32) -> (i32, i32, i32) {
    %c0_i32 = arith.constant 0 : i32
    %c0_i32_0 = arith.constant 0 : i32
    %c0_i32_1 = arith.constant 0 : i32
    return %c0_i32, %arg0, %c0_i32_0 : i32, i32, i32
  }
  func.func @transform_1(%arg0: i32) -> (i32, i32) {
    %c0_i32 = arith.constant 0 : i32
    %c0_i32_0 = arith.constant 0 : i32
    %c0_i32_1 = arith.constant 0 : i32
    return %c0_i32, %c0_i32_0 : i32, i32
  }
  func.func @transform_2(%arg0: i32) -> (i32, i32) {
    %c0_i32 = arith.constant 0 : i32
    %c0_i32_0 = arith.constant 0 : i32
    %c0_i32_1 = arith.constant 0 : i32
    return %c0_i32, %c0_i32_0 : i32, i32
  }
  func.func @transform_3(%arg0: i32) -> (i32, i32) {
    %c0_i32 = arith.constant 0 : i32
    %c0_i32_0 = arith.constant 0 : i32
    %c0_i32_1 = arith.constant 0 : i32
    return %c0_i32, %c0_i32_0 : i32, i32
  }
  func.func @transform_4(%arg0: i32) -> (i32, i32) {
    %c0_i32 = arith.constant 0 : i32
    %c0_i32_0 = arith.constant 0 : i32
    %c0_i32_1 = arith.constant 0 : i32
    return %c0_i32, %c0_i32_0 : i32, i32
  }
  func.func @transform_5(%arg0: i32) -> (i32, i32) {
    %c0_i32 = arith.constant 0 : i32
    %c0_i32_0 = arith.constant 0 : i32
    %c0_i32_1 = arith.constant 0 : i32
    return %c0_i32, %c0_i32_0 : i32, i32
  }
  func.func @transform_6(%arg0: i32) -> (i32, i32) {
    %c0_i32 = arith.constant 0 : i32
    %c0_i32_0 = arith.constant 0 : i32
    %c0_i32_1 = arith.constant 0 : i32
    return %c0_i32, %c0_i32_0 : i32, i32
  }
  func.func @transform_7(%arg0: i32) -> (i32, i32) {
    %c0_i32 = arith.constant 0 : i32
    %c0_i32_0 = arith.constant 0 : i32
    %c0_i32_1 = arith.constant 0 : i32
    return %c0_i32, %c0_i32_0 : i32, i32
  }
  func.func @transform_8(%arg0: i32) -> (i32, i32) {
    %c0_i32 = arith.constant 0 : i32
    %c0_i32_0 = arith.constant 0 : i32
    %c0_i32_1 = arith.constant 0 : i32
    return %c0_i32, %c0_i32_0 : i32, i32
  }
  func.func @transform_9(%arg0: i32) -> (i32, i32) {
    %c0_i32 = arith.constant 0 : i32
    %c0_i32_0 = arith.constant 0 : i32
    return %arg0, %c0_i32 : i32, i32
  }
}

</mosaic_0001>

<bundles_post_ra>
// kernel: tpu_custom_call.1
= control target key start
LH: loop header
LB: loop body
LE: loop exit
PB: predicated region body
PF: predicated region fallthrough
CT: control target
= control target key end

     0   :  { %14 = vsyncpa [#allocation7], 0  ;;  %s8739_s0 = inlined_call_operand.hbm [shape: bf16[8,8,128], index: 0, kind: input, shape index: {}]   ;;  %s8740_s1 = inlined_call_operand.hbm [shape: bf16[128,512], index: 1, kind: input, shape index: {}]   ;;  %s8741_s2 = inlined_call_operand.hbm [shape: bf16[128,512], index: 2, kind: input, shape index: {}]   ;;  %s8742_s3 = inlined_call_operand.vmem [shape: f32[1,512], index: 3, kind: input, shape index: {}]   ;;  %s8743_s4 = inlined_call_operand.hbm [shape: bf16[128,512], index: 4, kind: input, shape index: {}]   ;;  %s8744_s5 = inlined_call_operand.hbm [shape: bf16[128,512], index: 5, kind: input, shape index: {}]   ;;  %s8745_s6 = inlined_call_operand.vmem [shape: f32[1,512], index: 6, kind: input, shape index: {}]   ;;  %s8746_s7 = inlined_call_operand.hbm [shape: bf16[128,128], index: 7, kind: input, shape index: {}]   ;;  %s8747_s8 = inlined_call_operand.vmem [shape: f32[1,128], index: 8, kind: input, shape index: {}]   ;;  %s8748_s9 = inlined_call_operand.hbm [shape: f32[8,128], index: 9, kind: output, shape index: {}]  }
   0x1   :  { %15 = vsyncpa [#allocation10], 0 }
   0x2   :  { %16 = vsyncpa [#allocation13], 0 }
   0x3   :  { %17 = vsyncpa [#allocation16], 0 }
   0x4   :  { %18 = vsyncpa [#allocation8], 0  ;;  %s7491_s30 = smov [#allocation9]  }
   0x5   :  { %s36_s10 = sshll.u32 %s7491_s30, 4  ;;  %s37_s10 = int_to_ptr.vmem [resolvable:$true] %s36_s10 }
   0x6   :  { %s7349_s11 = scalar_lea.vmem %s37_s10, 4096  ;;  %p7354_p1 = scmp.lt.s32.totalorder %s37_s10, %s37_s10 }
   0x7   :  { %p7350_p0 = scmp.ne.s32.totalorder %s37_s10, %s7349_s11  ;;  %p7355_p2 = scmp.lt.s32.totalorder %s7349_s11, %s7349_s11 }
   0x9   :  { %p7356_p3 = por %p7355_p2, %p7354_p1 }
   0xb   :  { %p7357_p4 = pnand %p7356_p3, %p7350_p0 }
   0xd   :  { %7360 = shalt.err (!%p7357_p4)
}
   0xe   :  { %s7492_s12 = smov 256   ;;  %s7493_s13 = smov 16  }
   0xf   :  { %42 = dma.hbm_to_vmem [thread:$0]  %s8740_s1, 4096, %s37_s10, [#allocation10], %s7492_s12, %s7492_s12, %s7493_s13  }
  0x10   :  { %s7494_s16 = smov [#allocation12]   ;;  %s7495_s18 = smov [#allocation6]  }
  0x11   :  { %s62_s17 = sshll.u32 %s7494_s16, 4  ;;  %s24_s19 = sshll.u32 %s7495_s18, 4  ;;  %s63_s17 = int_to_ptr.vmem [resolvable:$true] %s62_s17  ;;  %s25_s19 = int_to_ptr.vmem [resolvable:$true] %s24_s19 }
  0x12   :  { %s7369_s20 = scalar_lea.vmem %s63_s17, 4096  ;;  %p7374_p6 = scmp.lt.s32.totalorder %s63_s17, %s63_s17 }
  0x13   :  { %p7370_p5 = scmp.ne.s32.totalorder %s63_s17, %s7369_s20  ;;  %p7375_p7 = scmp.lt.s32.totalorder %s7369_s20, %s7369_s20 }
  0x15   :  { %p7376_p8 = por %p7375_p7, %p7374_p6 }
  0x17   :  { %p7377_p9 = pnand %p7376_p8, %p7370_p5 }
  0x19   :  { %7380 = shalt.err (!%p7377_p9)
}
  0x1a   :  { %68 = dma.hbm_to_vmem [thread:$0]  %s8743_s4, 4096, %s63_s17, [#allocation13], %s7492_s12, %s7492_s12, %s7493_s13  }
  0x1b   :  { %s7389_s1 = scalar_lea.vmem %s25_s19, 512  ;;  %p7394_p11 = scmp.lt.s32.totalorder %s25_s19, %s25_s19 }
  0x1c   :  { %p7390_p10 = scmp.ne.s32.totalorder %s25_s19, %s7389_s1  ;;  %p7395_p12 = scmp.lt.s32.totalorder %s7389_s1, %s7389_s1 }
  0x1e   :  { %p7396_p13 = por %p7395_p12, %p7394_p11 }
  0x20   :  { %p7397_p0 = pnand %p7396_p13, %p7390_p10 }
  0x22   :  { %7400 = shalt.err (!%p7397_p0)
}
  0x23   :  { %s7496_s23 = smov 64   ;;  %s7497_s24 = smov 4  }
  0x24   :  { %30 = dma.hbm_to_vmem [thread:$0]  %s8739_s0, 512, %s25_s19, [#allocation7], %s7496_s23, %s7496_s23, %s7497_s24  }
  0x25   :  { %s7498_s27 = smov [#allocation11]   ;;  %s7499_s4 = smov [#allocation14]  }
  0x26   :  { %s48_s28 = sshll.u32 %s7498_s27, 4  ;;  %s74_s29 = sshll.u32 %s7499_s4, 4  ;;  %s49_s28 = int_to_ptr.vmem [resolvable:$true] %s48_s28  ;;  %s75_s29 = int_to_ptr.vmem [resolvable:$true] %s74_s29 }
  0x27   :  { %s7409_s30 = scalar_lea.vmem %s49_s28, 4096  ;;  %p7414_p2 = scmp.lt.s32.totalorder %s49_s28, %s49_s28 }
  0x28   :  { %p7410_p1 = scmp.ne.s32.totalorder %s49_s28, %s7409_s30  ;;  %p7415_p3 = scmp.lt.s32.totalorder %s7409_s30, %s7409_s30 }
  0x2a   :  { %p7416_p4 = por %p7415_p3, %p7414_p2 }
  0x2c   :  { %p7417_p5 = pnand %p7416_p4, %p7410_p1 }
  0x2e   :  { %7420 = shalt.err (!%p7417_p5)
}
  0x2f   :  { %54 = dma.hbm_to_vmem [thread:$0]  %s8741_s2, 4096, %s49_s28, [#allocation10], %s7492_s12, %s7492_s12, %s7493_s13  }
  0x30   :  { %s7429_s0 = scalar_lea.vmem %s75_s29, 4096  ;;  %p7434_p7 = scmp.lt.s32.totalorder %s75_s29, %s75_s29 }
  0x31   :  { %p7430_p6 = scmp.ne.s32.totalorder %s75_s29, %s7429_s0  ;;  %p7435_p8 = scmp.lt.s32.totalorder %s7429_s0, %s7429_s0 }
  0x33   :  { %p7436_p9 = por %p7435_p8, %p7434_p7 }
  0x35   :  { %p7437_p10 = pnand %p7436_p9, %p7430_p6 }
  0x37   :  { %7440 = shalt.err (!%p7437_p10)
}
  0x38   :  { %80 = dma.hbm_to_vmem [thread:$0]  %s8744_s5, 4096, %s75_s29, [#allocation13], %s7492_s12, %s7492_s12, %s7493_s13  }
  0x39   :  { %s7500_s16 = smov [#allocation15]  }
  0x3a   :  { %s88_s17 = sshll.u32 %s7500_s16, 4  ;;  %s89_s17 = int_to_ptr.vmem [resolvable:$true] %s88_s17 }
  0x3b   :  { %s7449_s18 = scalar_lea.vmem %s89_s17, 1024  ;;  %p7454_p12 = scmp.lt.s32.totalorder %s89_s17, %s89_s17 }
  0x3c   :  { %p7450_p11 = scmp.ne.s32.totalorder %s89_s17, %s7449_s18  ;;  %p7455_p13 = scmp.lt.s32.totalorder %s7449_s18, %s7449_s18 }
  0x3e   :  { %p7456_p0 = por %p7455_p13, %p7454_p12 }
  0x40   :  { %p7457_p1 = pnand %p7456_p0, %p7450_p11 }
  0x42   :  { %7460 = shalt.err (!%p7457_p1)
}
  0x43   :  { %94 = dma.hbm_to_vmem [thread:$0]  %s8746_s7, 1024, %s89_s17, [#allocation16], %s7496_s23, %s7496_s23, %s7497_s24  }
  0x44   :  { %7481 = dma.done.wait [#allocation7], 512  }
  0x45   :  { %7482 = vsyncadd [#allocation7], 4294966784 }
  0x46   :  { %7483 = dma.done.wait [#allocation10], 8192  }
  0x47   :  { %7484 = vsyncadd [#allocation10], 4294959104 }
  0x48   :  { %7485 = dma.done.wait [#allocation13], 8192  }
  0x49   :  { %7486 = vsyncadd [#allocation13], 4294959104 }
  0x4a   :  { %7487 = dma.done.wait [#allocation16], 1024  }
  0x4b   :  { %7488 = vsyncadd [#allocation16], 4294966272  ;;  %v8753_v0 = vmov 0   ;;  %v6781_v1 = vld [vmem:[#allocation9 + $0xe4] ss:$16 sps:$4 sm:$0xff]   ;;  %v6842_v44 = vld [vmem:[#allocation6 + $0x8] sm:$0xff]  }
  0x4c   :  { %394 = vmatprep.mubr.bf16.mxu0 %v8753_v0  ;;  %540 = vst [vmem:[#allocation4] sm:$0xf] %v8753_v0  ;;  %467 = vmatprep.mubr.bf16.mxu1 %v8753_v0  ;;  %v6783_v2 = vld [vmem:[#allocation9 + $0xec] ss:$16 sps:$4 sm:$0xff]   ;;  %v6785_v3 = vld [vmem:[#allocation9 + $0xe0] ss:$16 sps:$4 sm:$0xff]  }
  0x4d   :  { %362 = vmatprep.subr.bf16.mxu0 %v6781_v1  ;;  %v6786_v4 = vld [vmem:[#allocation9 + $0xe8] ss:$16 sps:$4 sm:$0xff]   ;;  %435 = vmatprep.subr.bf16.mxu1 %v6783_v2  ;;  %v6787_v5 = vld [vmem:[#allocation9 + $0xc4] ss:$16 sps:$4 sm:$0xff]   ;;  %v6789_v6 = vld [vmem:[#allocation9 + $0xcc] ss:$16 sps:$4 sm:$0xff]  }
  0x4e   :  { %363 = vmatpush1.bf16.msra.mxu0 %v6785_v3  ;;  %436 = vmatpush1.bf16.msra.mxu1 %v6786_v4  ;;  %v6791_v7 = vld [vmem:[#allocation9 + $0xc0] ss:$16 sps:$4 sm:$0xff]   ;;  %v6792_v8 = vld [vmem:[#allocation9 + $0xc8] ss:$16 sps:$4 sm:$0xff]   ;;  %v6793_v9 = vld [vmem:[#allocation9 + $0xa4] ss:$16 sps:$4 sm:$0xff]  }
  0x4f   :  { %364 = vmatprep.subr.bf16.mxu0 %v6787_v5  ;;  %437 = vmatprep.subr.bf16.mxu1 %v6789_v6  ;;  %v6795_v10 = vld [vmem:[#allocation9 + $0xac] ss:$16 sps:$4 sm:$0xff]   ;;  %v6797_v11 = vld [vmem:[#allocation9 + $0xa0] ss:$16 sps:$4 sm:$0xff]   ;;  %v6798_v12 = vld [vmem:[#allocation9 + $0xa8] ss:$16 sps:$4 sm:$0xff]  }
  0x50   :  { %v6799_v13 = vld [vmem:[#allocation9 + $0x84] ss:$16 sps:$4 sm:$0xff]   ;;  %v6801_v14 = vld [vmem:[#allocation9 + $0x8c] ss:$16 sps:$4 sm:$0xff]   ;;  %v6803_v15 = vld [vmem:[#allocation9 + $0x80] ss:$16 sps:$4 sm:$0xff]  }
  0x51   :  { %v6804_v16 = vld [vmem:[#allocation9 + $0x88] ss:$16 sps:$4 sm:$0xff]   ;;  %v6805_v17 = vld [vmem:[#allocation9 + $0x64] ss:$16 sps:$4 sm:$0xff]   ;;  %v6807_v18 = vld [vmem:[#allocation9 + $0x6c] ss:$16 sps:$4 sm:$0xff]  }
  0x52   :  { %365 = vmatpush1.bf16.msra.mxu0 %v6791_v7  ;;  %438 = vmatpush1.bf16.msra.mxu1 %v6792_v8  ;;  %v6809_v19 = vld [vmem:[#allocation9 + $0x60] ss:$16 sps:$4 sm:$0xff]   ;;  %v6810_v20 = vld [vmem:[#allocation9 + $0x68] ss:$16 sps:$4 sm:$0xff]   ;;  %v6811_v21 = vld [vmem:[#allocation9 + $0x44] ss:$16 sps:$4 sm:$0xff]   ;;  %v158_v7 = vlaneseq }
  0x53   :  { %366 = vmatprep.subr.bf16.mxu0 %v6793_v9  ;;  %439 = vmatprep.subr.bf16.mxu1 %v6795_v10  ;;  %v6813_v22 = vld [vmem:[#allocation9 + $0x4c] ss:$16 sps:$4 sm:$0xff]   ;;  %v6815_v23 = vld [vmem:[#allocation9 + $0x40] ss:$16 sps:$4 sm:$0xff]   ;;  %v6816_v24 = vld [vmem:[#allocation9 + $0x48] ss:$16 sps:$4 sm:$0xff]  }
  0x54   :  { %v6817_v25 = vld [vmem:[#allocation9 + $0x24] ss:$16 sps:$4 sm:$0xff]   ;;  %v6819_v26 = vld [vmem:[#allocation9 + $0x2c] ss:$16 sps:$4 sm:$0xff]   ;;  %v6821_v27 = vld [vmem:[#allocation9 + $0x20] ss:$16 sps:$4 sm:$0xff]  }
  0x55   :  { %v6822_v28 = vld [vmem:[#allocation9 + $0x28] ss:$16 sps:$4 sm:$0xff]   ;;  %v6823_v29 = vld [vmem:[#allocation9 + $0x4] ss:$16 sps:$4 sm:$0xff]   ;;  %v6825_v30 = vld [vmem:[#allocation9 + $0xc] ss:$16 sps:$4 sm:$0xff]  }
  0x56   :  { %367 = vmatpush1.bf16.msra.mxu0 %v6797_v11  ;;  %440 = vmatpush1.bf16.msra.mxu1 %v6798_v12  ;;  %v6827_v31 = vld [vmem:[#allocation9] ss:$16 sps:$4 sm:$0xff]   ;;  %v6828_v32 = vld [vmem:[#allocation9 + $0x8] ss:$16 sps:$4 sm:$0xff]   ;;  %v7594_v33 = vld [vmem:[#allocation11 + $0xe4] ss:$16 sps:$4 sm:$0xff]  }
  0x57   :  { %368 = vmatprep.subr.bf16.mxu0 %v6799_v13  ;;  %441 = vmatprep.subr.bf16.mxu1 %v6801_v14  ;;  %v7596_v34 = vld [vmem:[#allocation11 + $0xec] ss:$16 sps:$4 sm:$0xff]   ;;  %v6829_v35 = vld [vmem:[#allocation6] sm:$0xff]   ;;  %v7600_v37 = vld [vmem:[#allocation11 + $0xe8] ss:$16 sps:$4 sm:$0xff]   ;;  %v7734_v8 = vshrl.u32 %v158_v7, 7 }
  0x58   :  { %v7598_v36 = vld [vmem:[#allocation11 + $0xe0] ss:$16 sps:$4 sm:$0xff]   ;;  %v7604_v38 = vld [vmem:[#allocation11 + $0xc4] ss:$16 sps:$4 sm:$0xff]   ;;  %v7606_v39 = vld [vmem:[#allocation11 + $0xcc] ss:$16 sps:$4 sm:$0xff]  }
  0x59   :  { %v7608_v40 = vld [vmem:[#allocation11 + $0xc0] ss:$16 sps:$4 sm:$0xff]   ;;  %v7612_v41 = vld [vmem:[#allocation11 + $0xc8] ss:$16 sps:$4 sm:$0xff]   ;;  %v7616_v42 = vld [vmem:[#allocation11 + $0xa4] ss:$16 sps:$4 sm:$0xff]  }
  0x5a   :  { %369 = vmatpush1.bf16.msra.mxu0 %v6803_v15  ;;  %442 = vmatpush1.bf16.msra.mxu1 %v6804_v16  ;;  %v7618_v43 = vld [vmem:[#allocation11 + $0xac] ss:$16 sps:$4 sm:$0xff]   ;;  %v7622_v45 = vld [vmem:[#allocation11 + $0xa0] ss:$16 sps:$4 sm:$0xff]   ;;  %v7624_v46 = vld [vmem:[#allocation11 + $0xa8] ss:$16 sps:$4 sm:$0xff]  }
  0x5b   :  { %370 = vmatprep.subr.bf16.mxu0 %v6805_v17  ;;  %443 = vmatprep.subr.bf16.mxu1 %v6807_v18  ;;  %v7628_v47 = vld [vmem:[#allocation11 + $0x84] ss:$16 sps:$4 sm:$0xff]   ;;  %v7632_v48 = vld [vmem:[#allocation11 + $0x8c] ss:$16 sps:$4 sm:$0xff]   ;;  %v7634_v49 = vld [vmem:[#allocation11 + $0x80] ss:$16 sps:$4 sm:$0xff]  }
  0x5c   :  { %v7636_v50 = vld [vmem:[#allocation11 + $0x88] ss:$16 sps:$4 sm:$0xff]   ;;  %v7640_v51 = vld [vmem:[#allocation11 + $0x64] ss:$16 sps:$4 sm:$0xff]   ;;  %v7644_v52 = vld [vmem:[#allocation11 + $0x6c] ss:$16 sps:$4 sm:$0xff]  }
  0x5d   :  { %v6855_v53 = vld [vmem:[#allocation6 + $0x10] sm:$0xff]   ;;  %v7650_v55 = vld [vmem:[#allocation11 + $0x68] ss:$16 sps:$4 sm:$0xff]   ;;  %v7654_v57 = vld [vmem:[#allocation11 + $0x4c] ss:$16 sps:$4 sm:$0xff]   ;;  %8757 = vst [vmem:[#allocation23_spill] sm:$0xff] %v7734_v8 }
  0x5e   :  { %371 = vmatpush1.bf16.msra.mxu0 %v6809_v19  ;;  %444 = vmatpush1.bf16.msra.mxu1 %v6810_v20  ;;  %v7648_v54 = vld [vmem:[#allocation11 + $0x60] ss:$16 sps:$4 sm:$0xff]   ;;  %v7652_v56 = vld [vmem:[#allocation11 + $0x44] ss:$16 sps:$4 sm:$0xff]   ;;  %v7662_v59 = vld [vmem:[#allocation11 + $0x48] ss:$16 sps:$4 sm:$0xff]  }
  0x5f   :  { %372 = vmatprep.subr.bf16.mxu0 %v6811_v21  ;;  %445 = vmatprep.subr.bf16.mxu1 %v6813_v22  ;;  %v7660_v58 = vld [vmem:[#allocation11 + $0x40] ss:$16 sps:$4 sm:$0xff]   ;;  %v7664_v60 = vld [vmem:[#allocation11 + $0x24] ss:$16 sps:$4 sm:$0xff]   ;;  %v7666_v61 = vld [vmem:[#allocation11 + $0x2c] ss:$16 sps:$4 sm:$0xff]  }
  0x60   :  { %v6868_v62 = vld [vmem:[#allocation6 + $0x18] sm:$0xff]   ;;  %v7674_v63 = vld [vmem:[#allocation11 + $0x20] ss:$16 sps:$4 sm:$0xff]   ;;  %v7678_v2 = vld [vmem:[#allocation11 + $0x4] ss:$16 sps:$4 sm:$0xff]   ;;  %v8749_v9 = vsub.s32 2, %v7734_v8 }
  0x61   :  { %v7676_v1 = vld [vmem:[#allocation11 + $0x28] ss:$16 sps:$4 sm:$0xff]   ;;  %v7680_v3 = vld [vmem:[#allocation11 + $0xc] ss:$16 sps:$4 sm:$0xff]   ;;  %v7686_v4 = vld [vmem:[#allocation11] ss:$16 sps:$4 sm:$0xff]  }
  0x62   :  { %373 = vmatpush1.bf16.msra.mxu0 %v6815_v23  ;;  %446 = vmatpush1.bf16.msra.mxu1 %v6816_v24  ;;  %v7688_v5 = vld [vmem:[#allocation11 + $0x8] ss:$16 sps:$4 sm:$0xff]   ;;  %v542_v6 = vld [vmem:[#allocation4] sm:$0xf]  ;;  %v8752_v10 = vsub.s32 0, %v7734_v8  ;;  %v8750_v11 = vsub.s32 3, %v7734_v8 }
  0x63   :  { %374 = vmatprep.subr.bf16.mxu0 %v6817_v25  ;;  %447 = vmatprep.subr.bf16.mxu1 %v6819_v26  ;;  %v156_v12 = vld [vmem:[%s8742_s3] sm:$0xf]  ;;  %v8751_v16 = vsub.s32 1, %v7734_v8  ;;  %vm7503_vm0 = vmmov 0   ;;  %s7504_s20 = smov [#allocation17]  }
  0x64   :  { %v7748_v15 = vrot.slane %v156_v12, %v8749_v9  ;;  %v161_v19 = vrot.slane %v156_v12, %v8752_v10  ;;  %v7759_v20 = vrot.slane %v156_v12, %v8750_v11  ;;  %s6085_s21 = sshll.u32 %s7504_s20, 4  ;;  %s6086_s21 = int_to_ptr.vmem [resolvable:$true] %s6085_s21 }
  0x65   :  { %v165_v23 = vrot.slane %v156_v12, %v8751_v16  ;;  %s7461_s22 = scalar_lea.vmem %s6086_s21, 128  ;;  %p7466_p3 = scmp.lt.s32.totalorder %s6086_s21, %s6086_s21 }
  0x66   :  { %375 = vmatpush1.bf16.msra.mxu0 %v6821_v27  ;;  %448 = vmatpush1.bf16.msra.mxu1 %v6822_v28  ;;  %p7462_p2 = scmp.ne.s32.totalorder %s6086_s21, %s7461_s22  ;;  %p7467_p4 = scmp.lt.s32.totalorder %s7461_s22, %s7461_s22 }
  0x67   :  { %376 = vmatprep.subr.bf16.mxu0 %v6823_v29  ;;  %449 = vmatprep.subr.bf16.mxu1 %v6825_v30 }
  0x68   :  { %p7468_p5 = por %p7467_p4, %p7466_p3 }
  0x6a   :  { %377 = vmatpush1.bf16.msra.mxu0 %v6827_v31  ;;  %450 = vmatpush1.bf16.msra.mxu1 %v6828_v32  ;;  %p7469_p6 = pnand %p7468_p5, %p7462_p2 }
  0x6b   :  { %740 = vmatprep.subr.bf16.mxu0 %v7594_v33  ;;  %781 = vmatprep.subr.bf16.mxu1 %v7596_v34 }
  0x6d   :  { %395 = vmatmul.mubr.bf16.vlgmr.msra.gmra.mxu0 %v6829_v35  ;;  %468 = vmatmul.mubr.bf16.vlgmr.msra.gmra.mxu1 %v6829_v35 }
  0x6e   :  { %741 = vmatpush1.bf16.msra.mxu0 %v7598_v36  ;;  %782 = vmatpush1.bf16.msra.mxu1 %v7600_v37 }
  0x6f   :  { %742 = vmatprep.subr.bf16.mxu0 %v7604_v38  ;;  %783 = vmatprep.subr.bf16.mxu1 %v7606_v39 }
  0x70   :  { %404 = vmatprep.mubr.bf16.mxu0 %v8753_v0  ;;  %477 = vmatprep.mubr.bf16.mxu1 %v8753_v0 }
  0x72   :  { %743 = vmatpush1.bf16.msra.mxu0 %v7608_v40  ;;  %784 = vmatpush1.bf16.msra.mxu1 %v7612_v41 }
  0x73   :  { %744 = vmatprep.subr.bf16.mxu0 %v7616_v42  ;;  %785 = vmatprep.subr.bf16.mxu1 %v7618_v43 }
  0x75   :  { %405 = vmatmul.mubr.bf16.gmra.mxu0 %v6842_v44  ;;  %478 = vmatmul.mubr.bf16.gmra.mxu1 %v6842_v44 }
  0x76   :  { %745 = vmatpush1.bf16.msra.mxu0 %v7622_v45  ;;  %786 = vmatpush1.bf16.msra.mxu1 %v7624_v46 }
  0x77   :  { %746 = vmatprep.subr.bf16.mxu0 %v7628_v47  ;;  %787 = vmatprep.subr.bf16.mxu1 %v7632_v48 }
  0x78   :  { %414 = vmatprep.mubr.bf16.mxu0 %v8753_v0  ;;  %487 = vmatprep.mubr.bf16.mxu1 %v8753_v0 }
  0x7a   :  { %747 = vmatpush1.bf16.msra.mxu0 %v7634_v49  ;;  %788 = vmatpush1.bf16.msra.mxu1 %v7636_v50 }
  0x7b   :  { %748 = vmatprep.subr.bf16.mxu0 %v7640_v51  ;;  %789 = vmatprep.subr.bf16.mxu1 %v7644_v52 }
  0x7d   :  { %415 = vmatmul.mubr.bf16.gmra.mxu0 %v6855_v53  ;;  %488 = vmatmul.mubr.bf16.gmra.mxu1 %v6855_v53 }
  0x7e   :  { %749 = vmatpush1.bf16.msra.mxu0 %v7648_v54  ;;  %790 = vmatpush1.bf16.msra.mxu1 %v7650_v55 }
  0x7f   :  { %750 = vmatprep.subr.bf16.mxu0 %v7652_v56  ;;  %791 = vmatprep.subr.bf16.mxu1 %v7654_v57 }
  0x80   :  { %424 = vmatprep.mubr.bf16.mxu0 %v8753_v0  ;;  %497 = vmatprep.mubr.bf16.mxu1 %v8753_v0 }
  0x82   :  { %751 = vmatpush1.bf16.msra.mxu0 %v7660_v58  ;;  %792 = vmatpush1.bf16.msra.mxu1 %v7662_v59 }
  0x83   :  { %752 = vmatprep.subr.bf16.mxu0 %v7664_v60  ;;  %793 = vmatprep.subr.bf16.mxu1 %v7666_v61 }
  0x85   :  { %425 = vmatmul.mubr.bf16.gmra.mxu0 %v6868_v62  ;;  %498 = vmatmul.mubr.bf16.gmra.mxu1 %v6868_v62 }
  0x86   :  { %753 = vmatpush1.bf16.msra.mxu0 %v7674_v63  ;;  %794 = vmatpush1.bf16.msra.mxu1 %v7676_v1 }
  0x87   :  { %754 = vmatprep.subr.bf16.mxu0 %v7678_v2  ;;  %795 = vmatprep.subr.bf16.mxu1 %v7680_v3 }
  0x88   :  { %772 = vmatprep.mubr.bf16.mxu0 %v8753_v0  ;;  %813 = vmatprep.mubr.bf16.mxu1 %v8753_v0 }
  0x8a   :  { %755 = vmatpush1.bf16.msra.mxu0 %v7686_v4  ;;  %796 = vmatpush1.bf16.msra.mxu1 %v7688_v5 }
  0x8b   :  { %1053 = vmatprep.subr.bf16.mxu0 %v7594_v33  ;;  %1094 = vmatprep.subr.bf16.mxu1 %v7596_v34 }
  0x8d   :  { %773 = vmatmul.mubr.bf16.vlgmr.msra.gmra.mxu0 %v542_v6  ;;  %814 = vmatmul.mubr.bf16.vlgmr.msra.gmra.mxu1 %v542_v6 }
  0x8e   :  { %1054 = vmatpush1.bf16.msra.mxu0 %v7598_v36  ;;  %1095 = vmatpush1.bf16.msra.mxu1 %v7600_v37 }
  0x8f   :  { %1055 = vmatprep.subr.bf16.mxu0 %v7604_v38  ;;  %1096 = vmatprep.subr.bf16.mxu1 %v7606_v39 }
  0x90   :  { %1085 = vmatprep.mubr.bf16.mxu0 %v8753_v0  ;;  %1126 = vmatprep.mubr.bf16.mxu1 %v8753_v0 }
  0x92   :  { %1056 = vmatpush1.bf16.msra.mxu0 %v7608_v40  ;;  %1097 = vmatpush1.bf16.msra.mxu1 %v7612_v41 }
  0x93   :  { %1057 = vmatprep.subr.bf16.mxu0 %v7616_v42  ;;  %1098 = vmatprep.subr.bf16.mxu1 %v7618_v43 }
  0x96   :  { %1058 = vmatpush1.bf16.msra.mxu0 %v7622_v45  ;;  %1099 = vmatpush1.bf16.msra.mxu1 %v7624_v46 }
  0x97   :  { %1059 = vmatprep.subr.bf16.mxu0 %v7628_v47  ;;  %1100 = vmatprep.subr.bf16.mxu1 %v7632_v48 }
  0x9a   :  { %1060 = vmatpush1.bf16.msra.mxu0 %v7634_v49  ;;  %1101 = vmatpush1.bf16.msra.mxu1 %v7636_v50 }
  0x9b   :  { %1061 = vmatprep.subr.bf16.mxu0 %v7640_v51  ;;  %1102 = vmatprep.subr.bf16.mxu1 %v7644_v52 }
  0x9e   :  { %1062 = vmatpush1.bf16.msra.mxu0 %v7648_v54  ;;  %1103 = vmatpush1.bf16.msra.mxu1 %v7650_v55 }
  0x9f   :  { %1063 = vmatprep.subr.bf16.mxu0 %v7652_v56  ;;  %1104 = vmatprep.subr.bf16.mxu1 %v7654_v57 }
  0xa2   :  { %1064 = vmatpush1.bf16.msra.mxu0 %v7660_v58  ;;  %1105 = vmatpush1.bf16.msra.mxu1 %v7662_v59 }
  0xa3   :  { %1065 = vmatprep.subr.bf16.mxu0 %v7664_v60  ;;  %1106 = vmatprep.subr.bf16.mxu1 %v7666_v61 }
  0xa6   :  { %1066 = vmatpush1.bf16.msra.mxu0 %v7674_v63  ;;  %1107 = vmatpush1.bf16.msra.mxu1 %v7676_v1 }
  0xa7   :  { %1067 = vmatprep.subr.bf16.mxu0 %v7678_v2  ;;  %1108 = vmatprep.subr.bf16.mxu1 %v7680_v3 }
  0xaa   :  { %1068 = vmatpush1.bf16.msra.mxu0 %v7686_v4  ;;  %1109 = vmatpush1.bf16.msra.mxu1 %v7688_v5 }
  0xab   :  { %1367 = vmatprep.subr.bf16.mxu0 %v7594_v33  ;;  %1408 = vmatprep.subr.bf16.mxu1 %v7596_v34 }
 0x12d   :  { %v7742_v13 = vpop.f32.mrf.mxu0  ;;  %v7744_v14 = vpop.f32.mrf.mxu1 }
 0x12f   :  { %v7751_v17 = vpop.f32.mrf.mxu0  ;;  %v7753_v18 = vpop.f32.mrf.mxu1 }
 0x131   :  { %v400_v21 = vpop.f32.mrf.mxu0  ;;  %v473_v22 = vpop.f32.mrf.mxu1 }
 0x132   :  { %v7763_v24 = vadd.f32 %v400_v21, %v161_v19  ;;  %v7766_v25 = vadd.f32 %v473_v22, %v7748_v15 }
 0x133   :  { %v402_v26 = vpop.f32.mrf.mxu0  ;;  %v475_v27 = vpop.f32.mrf.mxu1 }
 0x134   :  { %v7768_v28 = vadd.f32 %v402_v26, %v165_v23  ;;  %v7771_v29 = vadd.f32 %v475_v27, %v7759_v20 }
 0x135   :  { %v406_v30 = vpop.f32.mrf.mxu0  ;;  %v479_v31 = vpop.f32.mrf.mxu1 }
 0x136   :  { %v7773_v32 = vadd.f32 %v406_v30, %v161_v19  ;;  %v7776_v35 = vadd.f32 %v479_v31, %v7748_v15 }
 0x137   :  { %v408_v44 = vpop.f32.mrf.mxu0  ;;  %v481_v53 = vpop.f32.mrf.mxu1 }
 0x138   :  { %8758 = vst [vmem:[#allocation24_spill] sm:$0xff] %v7776_v35  ;;  %v7778_v62 = vadd.f32 %v408_v44, %v165_v23  ;;  %v7781_v6 = vadd.f32 %v481_v53, %v7759_v20 }
 0x139   :  { %v410_v7 = vpop.f32.mrf.mxu0  ;;  %v483_v12 = vpop.f32.mrf.mxu1 }
 0x13a   :  { %v7783_v21 = vadd.f32 %v410_v7, %v161_v19  ;;  %v7786_v22 = vadd.f32 %v483_v12, %v7748_v15 }
 0x13b   :  { %v412_v26 = vpop.f32.mrf.mxu0  ;;  %v485_v27 = vpop.f32.mrf.mxu1 }
 0x13c   :  { %8759 = vst [vmem:[#allocation25_spill] sm:$0xff] %v7783_v21  ;;  %8760 = vst [vmem:[#allocation26_spill] sm:$0xff] %v7786_v22  ;;  %v7788_v30 = vadd.f32 %v412_v26, %v165_v23  ;;  %v7791_v31 = vadd.f32 %v485_v27, %v7759_v20 }
 0x13d   :  { %v416_v9 = vpop.f32.mrf.mxu0  ;;  %v489_v44 = vpop.f32.mrf.mxu1 }
 0x13e   :  { %8761 = vst [vmem:[#allocation27_spill] sm:$0xff] %v7788_v30  ;;  %8762 = vst [vmem:[#allocation28_spill] sm:$0xff] %v7791_v31  ;;  %v7793_v11 = vadd.f32 %v416_v9, %v161_v19  ;;  %v7796_v53 = vadd.f32 %v489_v44, %v7748_v15 }
 0x13f   :  { %v418_v16 = vpop.f32.mrf.mxu0  ;;  %v491_v7 = vpop.f32.mrf.mxu1 }
 0x140   :  { %8763 = vst [vmem:[#allocation29_spill] sm:$0xff] %v7793_v11  ;;  %8764 = vst [vmem:[#allocation30_spill] sm:$0xff] %v7796_v53  ;;  %v7798_v10 = vadd.f32 %v418_v16, %v165_v23  ;;  %v7801_v12 = vadd.f32 %v491_v7, %v7759_v20 }
 0x141   :  { %v420_v0 = vpop.f32.mrf.mxu0  ;;  %v493_v26 = vpop.f32.mrf.mxu1 }
 0x142   :  { %8765 = vst [vmem:[#allocation31_spill] sm:$0xff] %v7798_v10  ;;  %8766 = vst [vmem:[#allocation32_spill] sm:$0xff] %v7801_v12  ;;  %v7803_v8 = vadd.f32 %v420_v0, %v161_v19  ;;  %v7806_v27 = vadd.f32 %v493_v26, %v7748_v15 }
 0x143   :  { %v422_v22 = vpop.f32.mrf.mxu0  ;;  %v495_v9 = vpop.f32.mrf.mxu1 }
 0x144   :  { %8767 = vst [vmem:[#allocation33_spill] sm:$0xff] %v7803_v8  ;;  %8768 = vst [vmem:[#allocation34_spill] sm:$0xff] %v7806_v27  ;;  %v7808_v11 = vadd.f32 %v422_v22, %v165_v23  ;;  %v7811_v44 = vadd.f32 %v495_v9, %v7759_v20 }
 0x145   :  { %v426_v53 = vpop.f32.mrf.mxu0  ;;  %v499_v16 = vpop.f32.mrf.mxu1 }
 0x146   :  { %8769 = vst [vmem:[#allocation35_spill] sm:$0xff] %v7808_v11  ;;  %8770 = vst [vmem:[#allocation36_spill] sm:$0xff] %v7811_v44  ;;  %v7813_v10 = vadd.f32 %v426_v53, %v161_v19  ;;  %v7816_v7 = vadd.f32 %v499_v16, %v7748_v15 }
 0x147   :  { %v428_v12 = vpop.f32.mrf.mxu0  ;;  %v501_v0 = vpop.f32.mrf.mxu1 }
 0x148   :  { %8771 = vst [vmem:[#allocation37_spill] sm:$0xff] %v7813_v10  ;;  %8772 = vst [vmem:[#allocation38_spill] sm:$0xff] %v7816_v7  ;;  %v7818_v8 = vadd.f32 %v428_v12, %v165_v23  ;;  %v7821_v26 = vadd.f32 %v501_v0, %v7759_v20  ;;  %v397_v10 = vadd.f32 %v7742_v13, %v161_v19 }
 0x149   :  { %v430_v27 = vpop.f32.mrf.mxu0  ;;  %v503_v22 = vpop.f32.mrf.mxu1  ;;  %v399_v0 = vadd.f32 %v7751_v17, %v165_v23 }
 0x14a   :  { %8773 = vst [vmem:[#allocation39_spill] sm:$0xff] %v7818_v8  ;;  %8774 = vst [vmem:[#allocation40_spill] sm:$0xff] %v7821_v26  ;;  %v7823_v11 = vadd.f32 %v430_v27, %v161_v19  ;;  %v7826_v9 = vadd.f32 %v503_v22, %v7748_v15  ;;  %v472_v19 = vadd.f32 %v7753_v18, %v7759_v20 }
 0x14b   :  { %v432_v44 = vpop.f32.mrf.mxu0  ;;  %v505_v53 = vpop.f32.mrf.mxu1 }
 0x14c   :  { %8775 = vst [vmem:[#allocation41_spill] sm:$0xff] %v7823_v11  ;;  %8776 = vst [vmem:[#allocation42_spill] sm:$0xff] %v7826_v9  ;;  %v7829_v16 = vadd.f32 %v432_v44, %v165_v23  ;;  %v7832_v7 = vadd.f32 %v505_v53, %v7759_v20  ;;  %v470_v53 = vadd.f32 %v7744_v14, %v7748_v15 }
 0x14d   :  { %v774_v12 = vpop.f32.mrf.mxu0  ;;  %v815_v8 = vpop.f32.mrf.mxu1 }
 0x14e   :  { %v822_v26 = vadd.f32 %v774_v12, %v397_v10  ;;  %v824_v23 = vadd.f32 %v815_v8, %v470_v53 }
 0x14f   :  { %v776_v31 = vpop.f32.mrf.mxu0  ;;  %v817_v27 = vpop.f32.mrf.mxu1 }
 0x150   :  { %v6165_v11 = vmul.f32 -1.442695, %v822_v26  ;;  %v823_v30 = vadd.f32 %v776_v31, %v399_v0  ;;  %v825_v44 = vadd.f32 %v817_v27, %v472_v19 }
 0x151   :  { %v778_v22 = vpop.f32.mrf.mxu0  ;;  %v819_v9 = vpop.f32.mrf.mxu1 }
 0x152   :  { %7085 = vpow2.f32 %v6165_v11  ;;  %v6166_v21 = vmul.f32 -1.442695, %v823_v30  ;;  %v6167_v17 = vmul.f32 -1.442695, %v825_v44 }
 0x153   :  { %v779_v35 = vpop.f32.mrf.mxu0  ;;  %v820_v13 = vpop.f32.mrf.mxu1 }
 0x154   :  { %7087 = vpow2.f32 %v6166_v21  ;;  %v8777_v13 = vmov 0  }
 0x155   :  { %7089 = vpow2.f32 %v6167_v17 }
 0x15f   :  { %v7086_v10 = vpop.eup %7085 }
 0x160   :  { %v829_v12 = vadd.f32 1.0, %v7086_v10 }
 0x161   :  { %v7088_v26 = vpop.eup %7087 }
 0x162   :  { %7091 = vrcp.f32 %v829_v12  ;;  %v835_v31 = vadd.f32 1.0, %v7088_v26  ;;  %v7090_v11 = vpop.eup %7089 }
 0x163   :  { %7093 = vtanh.f32 %v824_v23  ;;  %v842_v9 = vadd.f32 1.0, %v7090_v11 }
 0x164   :  { %7095 = vrcp.f32 %v835_v31 }
 0x165   :  { %7097 = vrcp.f32 %v842_v9 }
 0x16f   :  { %v7092_v35 = vpop.eup %7091 }
 0x170   :  { %v7094_v21 = vpop.eup %7093 }
 0x171   :  { %v7096_v30 = vpop.eup %7095  ;;  %v846_v20 = vmul.f32 %v7094_v21, %v7092_v35 }
 0x172   :  { %v845_v18 = vmul.f32 0.0, %v7096_v30  ;;  %v7098_v8 = vpop.eup %7097 }
 0x174   :  { %v7839_v0 = vadd.f32 %v846_v20, %v845_v18 }
 0x176   :  { %7099 = vtanh.f32 %v7839_v0 }
 0x183   :  { %v7100_v14 = vpop.eup %7099 }
 0x184   :  { %v849_v15 = vmul.f32 %v7100_v14, %v7098_v8 }
 0x186   :  { %v851_v27 = vpack.c.bf16 %v849_v15, %v849_v15 }
 0x188   :  { %852 = vst [vmem:[#allocation4] sm:$0xf] %v851_v27  ;;  %853 = vst [vmem:[#allocation2] sm:$0xf] %v851_v27 }
 0x18f   :  { %v854_v22 = vld [vmem:[#allocation4] sm:$0xf] }
 0x190   :  { %1086 = vmatmul.mubr.bf16.vlgmr.msra.gmra.mxu0 %v854_v22  ;;  %1127 = vmatmul.mubr.bf16.vlgmr.msra.gmra.mxu1 %v854_v22 }
 0x191   :  { %1368 = vmatpush1.bf16.msra.mxu0 %v7598_v36  ;;  %1409 = vmatpush1.bf16.msra.mxu1 %v7600_v37 }
 0x192   :  { %1369 = vmatprep.subr.bf16.mxu0 %v7604_v38  ;;  %1410 = vmatprep.subr.bf16.mxu1 %v7606_v39 }
 0x193   :  { %1399 = vmatprep.mubr.bf16.mxu0 %v8777_v13  ;;  %1440 = vmatprep.mubr.bf16.mxu1 %v8777_v13 }
 0x195   :  { %1370 = vmatpush1.bf16.msra.mxu0 %v7608_v40  ;;  %1411 = vmatpush1.bf16.msra.mxu1 %v7612_v41 }
 0x196   :  { %1371 = vmatprep.subr.bf16.mxu0 %v7616_v42  ;;  %1412 = vmatprep.subr.bf16.mxu1 %v7618_v43 }
 0x199   :  { %1372 = vmatpush1.bf16.msra.mxu0 %v7622_v45  ;;  %1413 = vmatpush1.bf16.msra.mxu1 %v7624_v46 }
 0x19a   :  { %1373 = vmatprep.subr.bf16.mxu0 %v7628_v47  ;;  %1414 = vmatprep.subr.bf16.mxu1 %v7632_v48 }
 0x19d   :  { %1374 = vmatpush1.bf16.msra.mxu0 %v7634_v49  ;;  %1415 = vmatpush1.bf16.msra.mxu1 %v7636_v50 }
 0x19e   :  { %1375 = vmatprep.subr.bf16.mxu0 %v7640_v51  ;;  %1416 = vmatprep.subr.bf16.mxu1 %v7644_v52 }
 0x1a1   :  { %1376 = vmatpush1.bf16.msra.mxu0 %v7648_v54  ;;  %1417 = vmatpush1.bf16.msra.mxu1 %v7650_v55 }
 0x1a2   :  { %1377 = vmatprep.subr.bf16.mxu0 %v7652_v56  ;;  %1418 = vmatprep.subr.bf16.mxu1 %v7654_v57 }
 0x1a5   :  { %1378 = vmatpush1.bf16.msra.mxu0 %v7660_v58  ;;  %1419 = vmatpush1.bf16.msra.mxu1 %v7662_v59 }
 0x1a6   :  { %1379 = vmatprep.subr.bf16.mxu0 %v7664_v60  ;;  %1420 = vmatprep.subr.bf16.mxu1 %v7666_v61 }
 0x1a9   :  { %1380 = vmatpush1.bf16.msra.mxu0 %v7674_v63  ;;  %1421 = vmatpush1.bf16.msra.mxu1 %v7676_v1 }
 0x1aa   :  { %1381 = vmatprep.subr.bf16.mxu0 %v7678_v2  ;;  %1422 = vmatprep.subr.bf16.mxu1 %v7680_v3 }
 0x1ad   :  { %1382 = vmatpush1.bf16.msra.mxu0 %v7686_v4  ;;  %1423 = vmatpush1.bf16.msra.mxu1 %v7688_v5 }
 0x1ae   :  { %1681 = vmatprep.subr.bf16.mxu0 %v7594_v33  ;;  %1722 = vmatprep.subr.bf16.mxu1 %v7596_v34 }
 0x250   :  { %v1087_v19 = vpop.f32.mrf.mxu0  ;;  %v1128_v44 = vpop.f32.mrf.mxu1 }
 0x251   :  { %v1135_v53 = vadd.f32 %v1087_v19, %v7763_v24  ;;  %v1137_v34 = vadd.f32 %v1128_v44, %v7766_v25 }
 0x252   :  { %v1089_v17 = vpop.f32.mrf.mxu0  ;;  %v1130_v10 = vpop.f32.mrf.mxu1 }
 0x253   :  { %v6200_v23 = vmul.f32 -1.442695, %v1135_v53  ;;  %v1136_v12 = vadd.f32 %v1089_v17, %v7768_v28  ;;  %v1138_v33 = vadd.f32 %v1130_v10, %v7771_v29 }
 0x254   :  { %v1091_v26 = vpop.f32.mrf.mxu0  ;;  %v1132_v31 = vpop.f32.mrf.mxu1 }
 0x255   :  { %7101 = vpow2.f32 %v6200_v23  ;;  %v6201_v11 = vmul.f32 -1.442695, %v1136_v12  ;;  %v6202_v30 = vmul.f32 -1.442695, %v1138_v33  ;;  %v7928_v23 = vld [vmem:[#allocation11 + $0xec] ss:$16 sps:$4 sm:$0xff]  }
 0x256   :  { %v1092_v35 = vpop.f32.mrf.mxu0  ;;  %v1133_v21 = vpop.f32.mrf.mxu1  ;;  %v7930_v12 = vld [vmem:[#allocation11 + $0xe0] ss:$16 sps:$4 sm:$0xff]   ;;  %v7932_v26 = vld [vmem:[#allocation11 + $0xe8] ss:$16 sps:$4 sm:$0xff]   ;;  %v7938_v31 = vld [vmem:[#allocation11 + $0xc4] ss:$16 sps:$4 sm:$0xff]  }
 0x257   :  { %7103 = vpow2.f32 %v6201_v11  ;;  %v7940_v11 = vld [vmem:[#allocation11 + $0xcc] ss:$16 sps:$4 sm:$0xff]   ;;  %v7942_v35 = vld [vmem:[#allocation11 + $0xc0] ss:$16 sps:$4 sm:$0xff]   ;;  %v7944_v21 = vld [vmem:[#allocation11 + $0xc8] ss:$16 sps:$4 sm:$0xff]  }
 0x258   :  { %7105 = vtanh.f32 %v1137_v34  ;;  %v7950_v33 = vld [vmem:[#allocation11 + $0xa4] ss:$16 sps:$4 sm:$0xff]   ;;  %v7952_v34 = vld [vmem:[#allocation11 + $0xac] ss:$16 sps:$4 sm:$0xff]  }
 0x259   :  { %7107 = vpow2.f32 %v6202_v30  ;;  %v7954_v30 = vld [vmem:[#allocation11 + $0xa0] ss:$16 sps:$4 sm:$0xff]  }
 0x262   :  { %v7102_v9 = vpop.eup %7101 }
 0x263   :  { %v1142_v18 = vadd.f32 1.0, %v7102_v9  ;;  %v7956_v9 = vld [vmem:[#allocation11 + $0xa8] ss:$16 sps:$4 sm:$0xff]  }
 0x264   :  { %v7104_v24 = vpop.eup %7103 }
 0x265   :  { %7109 = vrcp.f32 %v1142_v18  ;;  %v1148_v20 = vadd.f32 1.0, %v7104_v24  ;;  %v7106_v28 = vpop.eup %7105  ;;  %v7962_v18 = vld [vmem:[#allocation11 + $0x84] ss:$16 sps:$4 sm:$0xff]   ;;  %v7964_v24 = vld [vmem:[#allocation11 + $0x8c] ss:$16 sps:$4 sm:$0xff]  }
 0x266   :  { %v7108_v8 = vpop.eup %7107 }
 0x267   :  { %7111 = vrcp.f32 %v1148_v20  ;;  %v1155_v22 = vadd.f32 1.0, %v7108_v8  ;;  %v7966_v20 = vld [vmem:[#allocation11 + $0x80] ss:$16 sps:$4 sm:$0xff]   ;;  %v7974_v8 = vld [vmem:[#allocation11 + $0x64] ss:$16 sps:$4 sm:$0xff]  }
 0x269   :  { %7113 = vrcp.f32 %v1155_v22  ;;  %v7986_v22 = vld [vmem:[#allocation11 + $0x44] ss:$16 sps:$4 sm:$0xff]  }
 0x272   :  { %v7110_v14 = vpop.eup %7109 }
 0x273   :  { %v1159_v15 = vmul.f32 %v7110_v14, %v7106_v28  ;;  %v7968_v28 = vld [vmem:[#allocation11 + $0x88] ss:$16 sps:$4 sm:$0xff]   ;;  %v7976_v14 = vld [vmem:[#allocation11 + $0x6c] ss:$16 sps:$4 sm:$0xff]  }
 0x274   :  { %v7112_v27 = vpop.eup %7111 }
 0x275   :  { %v1158_v19 = vmul.f32 %v7112_v27, %v7839_v0  ;;  %v7926_v0 = vld [vmem:[#allocation11 + $0xe4] ss:$16 sps:$4 sm:$0xff]   ;;  %v7980_v27 = vld [vmem:[#allocation11 + $0x68] ss:$16 sps:$4 sm:$0xff]  }
 0x276   :  { %v7114_v25 = vpop.eup %7113 }
 0x277   :  { %v7881_v29 = vadd.f32 %v1159_v15, %v1158_v19  ;;  %v7978_v15 = vld [vmem:[#allocation11 + $0x60] ss:$16 sps:$4 sm:$0xff]   ;;  %v7988_v19 = vld [vmem:[#allocation11 + $0x4c] ss:$16 sps:$4 sm:$0xff]  }
 0x279   :  { %7115 = vtanh.f32 %v7881_v29 }
 0x286   :  { %v7116_v44 = vpop.eup %7115 }
 0x287   :  { %v1162_v53 = vmul.f32 %v7116_v44, %v7114_v25  ;;  %v7992_v25 = vld [vmem:[#allocation11 + $0x48] ss:$16 sps:$4 sm:$0xff]   ;;  %v7998_v44 = vld [vmem:[#allocation11 + $0x24] ss:$16 sps:$4 sm:$0xff]  }
 0x289   :  { %v1164_v17 = vpack.c.bf16 %v1162_v53, %v1162_v53  ;;  %v8000_v53 = vld [vmem:[#allocation11 + $0x2c] ss:$16 sps:$4 sm:$0xff]  }
 0x28b   :  { %1165 = vst [vmem:[#allocation4] sm:$0xf] %v1164_v17  ;;  %1167 = vst [vmem:[#allocation2 + $0x4] sm:$0xf] %v1164_v17  ;;  %v8002_v17 = vld [vmem:[#allocation11 + $0x20] ss:$16 sps:$4 sm:$0xff]  }
 0x292   :  { %v1168_v10 = vld [vmem:[#allocation4] sm:$0xf] }
 0x293   :  { %1400 = vmatmul.mubr.bf16.vlgmr.msra.gmra.mxu0 %v1168_v10  ;;  %1441 = vmatmul.mubr.bf16.vlgmr.msra.gmra.mxu1 %v1168_v10  ;;  %v8004_v10 = vld [vmem:[#allocation11 + $0x28] ss:$16 sps:$4 sm:$0xff]  }
 0x294   :  { %1682 = vmatpush1.bf16.msra.mxu0 %v7598_v36  ;;  %1723 = vmatpush1.bf16.msra.mxu1 %v7600_v37 }
 0x295   :  { %1683 = vmatprep.subr.bf16.mxu0 %v7604_v38  ;;  %1724 = vmatprep.subr.bf16.mxu1 %v7606_v39 }
 0x296   :  { %1713 = vmatprep.mubr.bf16.mxu0 %v8777_v13  ;;  %1754 = vmatprep.mubr.bf16.mxu1 %v8777_v13 }
 0x298   :  { %1684 = vmatpush1.bf16.msra.mxu0 %v7608_v40  ;;  %1725 = vmatpush1.bf16.msra.mxu1 %v7612_v41 }
 0x299   :  { %1685 = vmatprep.subr.bf16.mxu0 %v7616_v42  ;;  %1726 = vmatprep.subr.bf16.mxu1 %v7618_v43 }
 0x29c   :  { %1686 = vmatpush1.bf16.msra.mxu0 %v7622_v45  ;;  %1727 = vmatpush1.bf16.msra.mxu1 %v7624_v46 }
 0x29d   :  { %1687 = vmatprep.subr.bf16.mxu0 %v7628_v47  ;;  %1728 = vmatprep.subr.bf16.mxu1 %v7632_v48 }
 0x2a0   :  { %1688 = vmatpush1.bf16.msra.mxu0 %v7634_v49  ;;  %1729 = vmatpush1.bf16.msra.mxu1 %v7636_v50  ;;  %v8778_v50 = vld [vmem:[#allocation24_spill] sm:$0xff] }
 0x2a1   :  { %1689 = vmatprep.subr.bf16.mxu0 %v7640_v51  ;;  %1730 = vmatprep.subr.bf16.mxu1 %v7644_v52 }
 0x2a4   :  { %1690 = vmatpush1.bf16.msra.mxu0 %v7648_v54  ;;  %1731 = vmatpush1.bf16.msra.mxu1 %v7650_v55 }
 0x2a5   :  { %1691 = vmatprep.subr.bf16.mxu0 %v7652_v56  ;;  %1732 = vmatprep.subr.bf16.mxu1 %v7654_v57 }
 0x2a8   :  { %1692 = vmatpush1.bf16.msra.mxu0 %v7660_v58  ;;  %1733 = vmatpush1.bf16.msra.mxu1 %v7662_v59 }
 0x2a9   :  { %1693 = vmatprep.subr.bf16.mxu0 %v7664_v60  ;;  %1734 = vmatprep.subr.bf16.mxu1 %v7666_v61 }
 0x2ac   :  { %1694 = vmatpush1.bf16.msra.mxu0 %v7674_v63  ;;  %1735 = vmatpush1.bf16.msra.mxu1 %v7676_v1 }
 0x2ad   :  { %1695 = vmatprep.subr.bf16.mxu0 %v7678_v2  ;;  %1736 = vmatprep.subr.bf16.mxu1 %v7680_v3 }
 0x2b0   :  { %1696 = vmatpush1.bf16.msra.mxu0 %v7686_v4  ;;  %1737 = vmatpush1.bf16.msra.mxu1 %v7688_v5 }
 0x2b1   :  { %1995 = vmatprep.subr.bf16.mxu0 %v7926_v0  ;;  %2036 = vmatprep.subr.bf16.mxu1 %v7928_v23 }
 0x353   :  { %v1401_v36 = vpop.f32.mrf.mxu0  ;;  %v1442_v37 = vpop.f32.mrf.mxu1 }
 0x354   :  { %v1449_v38 = vadd.f32 %v1401_v36, %v7773_v32  ;;  %v1451_v51 = vadd.f32 %v1442_v37, %v8778_v50  ;;  %v8008_v36 = vld [vmem:[#allocation11 + $0x4] ss:$16 sps:$4 sm:$0xff]   ;;  %v8010_v37 = vld [vmem:[#allocation11 + $0xc] ss:$16 sps:$4 sm:$0xff]  }
 0x355   :  { %v1403_v39 = vpop.f32.mrf.mxu0  ;;  %v1444_v40 = vpop.f32.mrf.mxu1 }
 0x356   :  { %v6235_v41 = vmul.f32 -1.442695, %v1449_v38  ;;  %v1450_v42 = vadd.f32 %v1403_v39, %v7778_v62  ;;  %v1452_v49 = vadd.f32 %v1444_v40, %v7781_v6  ;;  %v8014_v38 = vld [vmem:[#allocation11] ss:$16 sps:$4 sm:$0xff]   ;;  %v8016_v39 = vld [vmem:[#allocation11 + $0x8] ss:$16 sps:$4 sm:$0xff]  }
 0x357   :  { %v1405_v43 = vpop.f32.mrf.mxu0  ;;  %v1446_v45 = vpop.f32.mrf.mxu1 }
 0x358   :  { %7117 = vpow2.f32 %v6235_v41  ;;  %v6236_v46 = vmul.f32 -1.442695, %v1450_v42  ;;  %v6237_v52 = vmul.f32 -1.442695, %v1452_v49  ;;  %v8779_v42 = vld [vmem:[#allocation25_spill] sm:$0xff] }
 0x359   :  { %v1406_v47 = vpop.f32.mrf.mxu0  ;;  %v1447_v48 = vpop.f32.mrf.mxu1 }
 0x35a   :  { %7119 = vpow2.f32 %v6236_v46  ;;  %v8780_v48 = vld [vmem:[#allocation27_spill] sm:$0xff] }
 0x35b   :  { %7121 = vtanh.f32 %v1451_v51 }
 0x35c   :  { %7123 = vpow2.f32 %v6237_v52 }
 0x365   :  { %v7118_v54 = vpop.eup %7117 }
 0x366   :  { %v1456_v55 = vadd.f32 1.0, %v7118_v54 }
 0x367   :  { %v7120_v56 = vpop.eup %7119 }
 0x368   :  { %7125 = vrcp.f32 %v1456_v55  ;;  %v1462_v57 = vadd.f32 1.0, %v7120_v56  ;;  %v7122_v58 = vpop.eup %7121  ;;  %v8781_v56 = vld [vmem:[#allocation28_spill] sm:$0xff] }
 0x369   :  { %v7124_v59 = vpop.eup %7123 }
 0x36a   :  { %7127 = vrcp.f32 %v1462_v57  ;;  %v1469_v1 = vadd.f32 1.0, %v7124_v59 }
 0x36c   :  { %7129 = vrcp.f32 %v1469_v1 }
 0x375   :  { %v7126_v60 = vpop.eup %7125 }
 0x376   :  { %v1473_v61 = vmul.f32 %v7126_v60, %v7122_v58  ;;  %v8782_v58 = vld [vmem:[#allocation26_spill] sm:$0xff] }
 0x377   :  { %v7128_v63 = vpop.eup %7127 }
 0x378   :  { %v1472_v2 = vmul.f32 %v7128_v63, %v7881_v29  ;;  %v7990_v29 = vld [vmem:[#allocation11 + $0x40] ss:$16 sps:$4 sm:$0xff]  }
 0x379   :  { %v7130_v4 = vpop.eup %7129 }
 0x37a   :  { %v7921_v3 = vadd.f32 %v1473_v61, %v1472_v2 }
 0x37c   :  { %7131 = vtanh.f32 %v7921_v3 }
 0x389   :  { %v7132_v5 = vpop.eup %7131 }
 0x38a   :  { %v1476_v32 = vmul.f32 %v7132_v5, %v7130_v4 }
 0x38c   :  { %v1478_v62 = vpack.c.bf16 %v1476_v32, %v1476_v32 }
 0x38e   :  { %1479 = vst [vmem:[#allocation4] sm:$0xf] %v1478_v62  ;;  %1481 = vst [vmem:[#allocation2 + $0x8] sm:$0xf] %v1478_v62 }
 0x395   :  { %v1482_v6 = vld [vmem:[#allocation4] sm:$0xf] }
 0x396   :  { %1714 = vmatmul.mubr.bf16.vlgmr.msra.gmra.mxu0 %v1482_v6  ;;  %1755 = vmatmul.mubr.bf16.vlgmr.msra.gmra.mxu1 %v1482_v6 }
 0x397   :  { %2027 = vmatprep.mubr.bf16.mxu0 %v8777_v13  ;;  %2068 = vmatprep.mubr.bf16.mxu1 %v8777_v13 }
 0x398   :  { %1996 = vmatpush1.bf16.msra.mxu0 %v7930_v12  ;;  %2037 = vmatpush1.bf16.msra.mxu1 %v7932_v26 }
 0x399   :  { %1997 = vmatprep.subr.bf16.mxu0 %v7938_v31  ;;  %2038 = vmatprep.subr.bf16.mxu1 %v7940_v11 }
 0x39c   :  { %1998 = vmatpush1.bf16.msra.mxu0 %v7942_v35  ;;  %2039 = vmatpush1.bf16.msra.mxu1 %v7944_v21 }
 0x39d   :  { %1999 = vmatprep.subr.bf16.mxu0 %v7950_v33  ;;  %2040 = vmatprep.subr.bf16.mxu1 %v7952_v34 }
 0x3a0   :  { %2000 = vmatpush1.bf16.msra.mxu0 %v7954_v30  ;;  %2041 = vmatpush1.bf16.msra.mxu1 %v7956_v9 }
 0x3a1   :  { %2001 = vmatprep.subr.bf16.mxu0 %v7962_v18  ;;  %2042 = vmatprep.subr.bf16.mxu1 %v7964_v24 }
 0x3a4   :  { %2002 = vmatpush1.bf16.msra.mxu0 %v7966_v20  ;;  %2043 = vmatpush1.bf16.msra.mxu1 %v7968_v28 }
 0x3a5   :  { %2003 = vmatprep.subr.bf16.mxu0 %v7974_v8  ;;  %2044 = vmatprep.subr.bf16.mxu1 %v7976_v14 }
 0x3a8   :  { %2004 = vmatpush1.bf16.msra.mxu0 %v7978_v15  ;;  %2045 = vmatpush1.bf16.msra.mxu1 %v7980_v27 }
 0x3a9   :  { %2005 = vmatprep.subr.bf16.mxu0 %v7986_v22  ;;  %2046 = vmatprep.subr.bf16.mxu1 %v7988_v19 }
 0x3ac   :  { %2006 = vmatpush1.bf16.msra.mxu0 %v7990_v29  ;;  %2047 = vmatpush1.bf16.msra.mxu1 %v7992_v25 }
 0x3ad   :  { %2007 = vmatprep.subr.bf16.mxu0 %v7998_v44  ;;  %2048 = vmatprep.subr.bf16.mxu1 %v8000_v53 }
 0x3b0   :  { %2008 = vmatpush1.bf16.msra.mxu0 %v8002_v17  ;;  %2049 = vmatpush1.bf16.msra.mxu1 %v8004_v10 }
 0x3b1   :  { %2009 = vmatprep.subr.bf16.mxu0 %v8008_v36  ;;  %2050 = vmatprep.subr.bf16.mxu1 %v8010_v37 }
 0x3b4   :  { %2010 = vmatpush1.bf16.msra.mxu0 %v8014_v38  ;;  %2051 = vmatpush1.bf16.msra.mxu1 %v8016_v39 }
 0x3b5   :  { %2309 = vmatprep.subr.bf16.mxu0 %v7926_v0  ;;  %2350 = vmatprep.subr.bf16.mxu1 %v7928_v23 }
 0x456   :  { %v1715_v40 = vpop.f32.mrf.mxu0  ;;  %v1756_v41 = vpop.f32.mrf.mxu1 }
 0x457   :  { %v1763_v43 = vadd.f32 %v1715_v40, %v8779_v42  ;;  %v1765_v59 = vadd.f32 %v1756_v41, %v8782_v58 }
 0x458   :  { %v1717_v45 = vpop.f32.mrf.mxu0  ;;  %v1758_v46 = vpop.f32.mrf.mxu1 }
 0x459   :  { %v6270_v47 = vmul.f32 -1.442695, %v1763_v43  ;;  %v1764_v49 = vadd.f32 %v1717_v45, %v8780_v48  ;;  %v1766_v57 = vadd.f32 %v1758_v46, %v8781_v56  ;;  %v8784_v56 = vld [vmem:[#allocation31_spill] sm:$0xff] }
 0x45a   :  { %v1719_v50 = vpop.f32.mrf.mxu0  ;;  %v1760_v51 = vpop.f32.mrf.mxu1 }
 0x45b   :  { %7133 = vpow2.f32 %v6270_v47  ;;  %v6271_v52 = vmul.f32 -1.442695, %v1764_v49  ;;  %v6272_v60 = vmul.f32 -1.442695, %v1766_v57  ;;  %v8783_v50 = vld [vmem:[#allocation29_spill] sm:$0xff] }
 0x45c   :  { %v1720_v54 = vpop.f32.mrf.mxu0  ;;  %v1761_v55 = vpop.f32.mrf.mxu1 }
 0x45d   :  { %7135 = vpow2.f32 %v6271_v52 }
 0x45e   :  { %7137 = vtanh.f32 %v1765_v59 }
 0x45f   :  { %7139 = vpow2.f32 %v6272_v60 }
 0x468   :  { %v7134_v61 = vpop.eup %7133 }
 0x469   :  { %v1770_v63 = vadd.f32 1.0, %v7134_v61 }
 0x46a   :  { %v7136_v1 = vpop.eup %7135 }
 0x46b   :  { %7141 = vrcp.f32 %v1770_v63  ;;  %v1776_v2 = vadd.f32 1.0, %v7136_v1  ;;  %v7138_v4 = vpop.eup %7137  ;;  %v8785_v1 = vld [vmem:[#allocation32_spill] sm:$0xff] }
 0x46c   :  { %v7140_v5 = vpop.eup %7139 }
 0x46d   :  { %7143 = vrcp.f32 %v1776_v2  ;;  %v1783_v40 = vadd.f32 1.0, %v7140_v5 }
 0x46f   :  { %7145 = vrcp.f32 %v1783_v40 }
 0x478   :  { %v7142_v32 = vpop.eup %7141 }
 0x479   :  { %v1787_v62 = vmul.f32 %v7142_v32, %v7138_v4  ;;  %v8786_v4 = vld [vmem:[#allocation30_spill] sm:$0xff] }
 0x47a   :  { %v7144_v6 = vpop.eup %7143 }
 0x47b   :  { %v1786_v42 = vmul.f32 %v7144_v6, %v7921_v3 }
 0x47c   :  { %v7146_v41 = vpop.eup %7145 }
 0x47d   :  { %v8029_v43 = vadd.f32 %v1787_v62, %v1786_v42 }
 0x47f   :  { %7147 = vtanh.f32 %v8029_v43 }
 0x48c   :  { %v7148_v45 = vpop.eup %7147 }
 0x48d   :  { %v1790_v46 = vmul.f32 %v7148_v45, %v7146_v41 }
 0x48f   :  { %v1792_v47 = vpack.c.bf16 %v1790_v46, %v1790_v46 }
 0x491   :  { %1793 = vst [vmem:[#allocation4] sm:$0xf] %v1792_v47  ;;  %1795 = vst [vmem:[#allocation2 + $0xc] sm:$0xf] %v1792_v47 }
 0x498   :  { %v1796_v48 = vld [vmem:[#allocation4] sm:$0xf] }
 0x499   :  { %2028 = vmatmul.mubr.bf16.vlgmr.msra.gmra.mxu0 %v1796_v48  ;;  %2069 = vmatmul.mubr.bf16.vlgmr.msra.gmra.mxu1 %v1796_v48 }
 0x49a   :  { %2310 = vmatpush1.bf16.msra.mxu0 %v7930_v12  ;;  %2351 = vmatpush1.bf16.msra.mxu1 %v7932_v26 }
 0x49b   :  { %2311 = vmatprep.subr.bf16.mxu0 %v7938_v31  ;;  %2352 = vmatprep.subr.bf16.mxu1 %v7940_v11 }
 0x49c   :  { %2341 = vmatprep.mubr.bf16.mxu0 %v8777_v13  ;;  %2382 = vmatprep.mubr.bf16.mxu1 %v8777_v13 }
 0x49e   :  { %2312 = vmatpush1.bf16.msra.mxu0 %v7942_v35  ;;  %2353 = vmatpush1.bf16.msra.mxu1 %v7944_v21 }
 0x49f   :  { %2313 = vmatprep.subr.bf16.mxu0 %v7950_v33  ;;  %2354 = vmatprep.subr.bf16.mxu1 %v7952_v34 }
 0x4a2   :  { %2314 = vmatpush1.bf16.msra.mxu0 %v7954_v30  ;;  %2355 = vmatpush1.bf16.msra.mxu1 %v7956_v9 }
 0x4a3   :  { %2315 = vmatprep.subr.bf16.mxu0 %v7962_v18  ;;  %2356 = vmatprep.subr.bf16.mxu1 %v7964_v24 }
 0x4a6   :  { %2316 = vmatpush1.bf16.msra.mxu0 %v7966_v20  ;;  %2357 = vmatpush1.bf16.msra.mxu1 %v7968_v28 }
 0x4a7   :  { %2317 = vmatprep.subr.bf16.mxu0 %v7974_v8  ;;  %2358 = vmatprep.subr.bf16.mxu1 %v7976_v14 }
 0x4aa   :  { %2318 = vmatpush1.bf16.msra.mxu0 %v7978_v15  ;;  %2359 = vmatpush1.bf16.msra.mxu1 %v7980_v27 }
 0x4ab   :  { %2319 = vmatprep.subr.bf16.mxu0 %v7986_v22  ;;  %2360 = vmatprep.subr.bf16.mxu1 %v7988_v19 }
 0x4ae   :  { %2320 = vmatpush1.bf16.msra.mxu0 %v7990_v29  ;;  %2361 = vmatpush1.bf16.msra.mxu1 %v7992_v25 }
 0x4af   :  { %2321 = vmatprep.subr.bf16.mxu0 %v7998_v44  ;;  %2362 = vmatprep.subr.bf16.mxu1 %v8000_v53 }
 0x4b2   :  { %2322 = vmatpush1.bf16.msra.mxu0 %v8002_v17  ;;  %2363 = vmatpush1.bf16.msra.mxu1 %v8004_v10 }
 0x4b3   :  { %2323 = vmatprep.subr.bf16.mxu0 %v8008_v36  ;;  %2364 = vmatprep.subr.bf16.mxu1 %v8010_v37 }
 0x4b6   :  { %2324 = vmatpush1.bf16.msra.mxu0 %v8014_v38  ;;  %2365 = vmatpush1.bf16.msra.mxu1 %v8016_v39 }
 0x4b7   :  { %2623 = vmatprep.subr.bf16.mxu0 %v7926_v0  ;;  %2664 = vmatprep.subr.bf16.mxu1 %v7928_v23 }
 0x559   :  { %v2029_v3 = vpop.f32.mrf.mxu0  ;;  %v2070_v49 = vpop.f32.mrf.mxu1 }
 0x55a   :  { %v2077_v51 = vadd.f32 %v2029_v3, %v8783_v50  ;;  %v2079_v5 = vadd.f32 %v2070_v49, %v8786_v4 }
 0x55b   :  { %v2031_v52 = vpop.f32.mrf.mxu0  ;;  %v2072_v54 = vpop.f32.mrf.mxu1 }
 0x55c   :  { %v6305_v55 = vmul.f32 -1.442695, %v2077_v51  ;;  %v2078_v57 = vadd.f32 %v2031_v52, %v8784_v56  ;;  %v2080_v2 = vadd.f32 %v2072_v54, %v8785_v1  ;;  %v8788_v1 = vld [vmem:[#allocation35_spill] sm:$0xff] }
 0x55d   :  { %v2033_v58 = vpop.f32.mrf.mxu0  ;;  %v2074_v59 = vpop.f32.mrf.mxu1 }
 0x55e   :  { %7149 = vpow2.f32 %v6305_v55  ;;  %v6306_v60 = vmul.f32 -1.442695, %v2078_v57  ;;  %v6307_v32 = vmul.f32 -1.442695, %v2080_v2  ;;  %v8787_v58 = vld [vmem:[#allocation33_spill] sm:$0xff] }
 0x55f   :  { %v2034_v61 = vpop.f32.mrf.mxu0  ;;  %v2075_v63 = vpop.f32.mrf.mxu1 }
 0x560   :  { %7151 = vpow2.f32 %v6306_v60 }
 0x561   :  { %7153 = vtanh.f32 %v2079_v5 }
 0x562   :  { %7155 = vpow2.f32 %v6307_v32 }
 0x56b   :  { %v7150_v62 = vpop.eup %7149 }
 0x56c   :  { %v2084_v6 = vadd.f32 1.0, %v7150_v62 }
 0x56d   :  { %v7152_v40 = vpop.eup %7151 }
 0x56e   :  { %7157 = vrcp.f32 %v2084_v6  ;;  %v2090_v42 = vadd.f32 1.0, %v7152_v40  ;;  %v7154_v41 = vpop.eup %7153  ;;  %v8789_v40 = vld [vmem:[#allocation36_spill] sm:$0xff] }
 0x56f   :  { %v7156_v45 = vpop.eup %7155 }
 0x570   :  { %7159 = vrcp.f32 %v2090_v42  ;;  %v2097_v3 = vadd.f32 1.0, %v7156_v45  ;;  %v8790_v42 = vld [vmem:[#allocation34_spill] sm:$0xff] }
 0x572   :  { %7161 = vrcp.f32 %v2097_v3 }
 0x57b   :  { %v7158_v46 = vpop.eup %7157 }
 0x57c   :  { %v2101_v47 = vmul.f32 %v7158_v46, %v7154_v41 }
 0x57d   :  { %v7160_v48 = vpop.eup %7159 }
 0x57e   :  { %v2100_v50 = vmul.f32 %v7160_v48, %v8029_v43 }
 0x57f   :  { %v7162_v49 = vpop.eup %7161 }
 0x580   :  { %v8071_v51 = vadd.f32 %v2101_v47, %v2100_v50 }
 0x582   :  { %7163 = vtanh.f32 %v8071_v51 }
 0x58f   :  { %v7164_v52 = vpop.eup %7163 }
 0x590   :  { %v2104_v54 = vmul.f32 %v7164_v52, %v7162_v49 }
 0x592   :  { %v2106_v55 = vpack.c.bf16 %v2104_v54, %v2104_v54 }
 0x594   :  { %2107 = vst [vmem:[#allocation4] sm:$0xf] %v2106_v55  ;;  %2109 = vst [vmem:[#allocation2 + $0x10] sm:$0xf] %v2106_v55 }
 0x59b   :  { %v2110_v56 = vld [vmem:[#allocation4] sm:$0xf] }
 0x59c   :  { %2342 = vmatmul.mubr.bf16.vlgmr.msra.gmra.mxu0 %v2110_v56  ;;  %2383 = vmatmul.mubr.bf16.vlgmr.msra.gmra.mxu1 %v2110_v56 }
 0x59d   :  { %2624 = vmatpush1.bf16.msra.mxu0 %v7930_v12  ;;  %2665 = vmatpush1.bf16.msra.mxu1 %v7932_v26 }
 0x59e   :  { %2625 = vmatprep.subr.bf16.mxu0 %v7938_v31  ;;  %2666 = vmatprep.subr.bf16.mxu1 %v7940_v11 }
 0x59f   :  { %2655 = vmatprep.mubr.bf16.mxu0 %v8777_v13  ;;  %2696 = vmatprep.mubr.bf16.mxu1 %v8777_v13 }
 0x5a1   :  { %2626 = vmatpush1.bf16.msra.mxu0 %v7942_v35  ;;  %2667 = vmatpush1.bf16.msra.mxu1 %v7944_v21 }
 0x5a2   :  { %2627 = vmatprep.subr.bf16.mxu0 %v7950_v33  ;;  %2668 = vmatprep.subr.bf16.mxu1 %v7952_v34 }
 0x5a5   :  { %2628 = vmatpush1.bf16.msra.mxu0 %v7954_v30  ;;  %2669 = vmatpush1.bf16.msra.mxu1 %v7956_v9 }
 0x5a6   :  { %2629 = vmatprep.subr.bf16.mxu0 %v7962_v18  ;;  %2670 = vmatprep.subr.bf16.mxu1 %v7964_v24 }
 0x5a9   :  { %2630 = vmatpush1.bf16.msra.mxu0 %v7966_v20  ;;  %2671 = vmatpush1.bf16.msra.mxu1 %v7968_v28 }
 0x5aa   :  { %2631 = vmatprep.subr.bf16.mxu0 %v7974_v8  ;;  %2672 = vmatprep.subr.bf16.mxu1 %v7976_v14 }
 0x5ad   :  { %2632 = vmatpush1.bf16.msra.mxu0 %v7978_v15  ;;  %2673 = vmatpush1.bf16.msra.mxu1 %v7980_v27 }
 0x5ae   :  { %2633 = vmatprep.subr.bf16.mxu0 %v7986_v22  ;;  %2674 = vmatprep.subr.bf16.mxu1 %v7988_v19 }
 0x5b1   :  { %2634 = vmatpush1.bf16.msra.mxu0 %v7990_v29  ;;  %2675 = vmatpush1.bf16.msra.mxu1 %v7992_v25 }
 0x5b2   :  { %2635 = vmatprep.subr.bf16.mxu0 %v7998_v44  ;;  %2676 = vmatprep.subr.bf16.mxu1 %v8000_v53 }
 0x5b5   :  { %2636 = vmatpush1.bf16.msra.mxu0 %v8002_v17  ;;  %2677 = vmatpush1.bf16.msra.mxu1 %v8004_v10 }
 0x5b6   :  { %2637 = vmatprep.subr.bf16.mxu0 %v8008_v36  ;;  %2678 = vmatprep.subr.bf16.mxu1 %v8010_v37 }
 0x5b9   :  { %2638 = vmatpush1.bf16.msra.mxu0 %v8014_v38  ;;  %2679 = vmatpush1.bf16.msra.mxu1 %v8016_v39 }
 0x5ba   :  { %2937 = vmatprep.subr.bf16.mxu0 %v7926_v0  ;;  %2978 = vmatprep.subr.bf16.mxu1 %v7928_v23 }
 0x65c   :  { %v2343_v43 = vpop.f32.mrf.mxu0  ;;  %v2384_v57 = vpop.f32.mrf.mxu1 }
 0x65d   :  { %v2391_v59 = vadd.f32 %v2343_v43, %v8787_v58  ;;  %v2393_v23 = vadd.f32 %v2384_v57, %v8790_v42 }
 0x65e   :  { %v2345_v60 = vpop.f32.mrf.mxu0  ;;  %v2386_v61 = vpop.f32.mrf.mxu1 }
 0x65f   :  { %v6340_v63 = vmul.f32 -1.442695, %v2391_v59  ;;  %v2392_v2 = vadd.f32 %v2345_v60, %v8788_v1  ;;  %v2394_v0 = vadd.f32 %v2386_v61, %v8789_v40  ;;  %v6937_v40 = vld [vmem:[#allocation12 + $0xc4] ss:$16 sps:$4 sm:$0xff]  }
 0x660   :  { %v2347_v4 = vpop.f32.mrf.mxu0  ;;  %v2388_v5 = vpop.f32.mrf.mxu1 }
 0x661   :  { %7165 = vpow2.f32 %v6340_v63  ;;  %v6341_v32 = vmul.f32 -1.442695, %v2392_v2  ;;  %v6342_v41 = vmul.f32 -1.442695, %v2394_v0  ;;  %v6940_v0 = vld [vmem:[#allocation12 + $0xcc] ss:$16 sps:$4 sm:$0xff]  }
 0x662   :  { %v2348_v62 = vpop.f32.mrf.mxu0  ;;  %v2389_v6 = vpop.f32.mrf.mxu1 }
 0x663   :  { %7167 = vpow2.f32 %v6341_v32  ;;  %v6929_v62 = vld [vmem:[#allocation12 + $0xe0] ss:$16 sps:$4 sm:$0xff]   ;;  %v6932_v6 = vld [vmem:[#allocation12 + $0xe8] ss:$16 sps:$4 sm:$0xff]  }
 0x664   :  { %7169 = vtanh.f32 %v2393_v23  ;;  %v6935_v23 = vld [vmem:[#allocation12 + $0xc0] ss:$16 sps:$4 sm:$0xff]  }
 0x665   :  { %7171 = vpow2.f32 %v6342_v41  ;;  %v6938_v41 = vld [vmem:[#allocation12 + $0xc8] ss:$16 sps:$4 sm:$0xff]  }
 0x66e   :  { %v7166_v45 = vpop.eup %7165 }
 0x66f   :  { %v2398_v46 = vadd.f32 1.0, %v7166_v45  ;;  %v6943_v45 = vld [vmem:[#allocation12 + $0xa4] ss:$16 sps:$4 sm:$0xff]  }
 0x670   :  { %v7168_v47 = vpop.eup %7167 }
 0x671   :  { %7173 = vrcp.f32 %v2398_v46  ;;  %v2404_v48 = vadd.f32 1.0, %v7168_v47  ;;  %v7170_v3 = vpop.eup %7169  ;;  %v6946_v46 = vld [vmem:[#allocation12 + $0xac] ss:$16 sps:$4 sm:$0xff]   ;;  %v6941_v47 = vld [vmem:[#allocation12 + $0xa0] ss:$16 sps:$4 sm:$0xff]  }
 0x672   :  { %v7172_v50 = vpop.eup %7171 }
 0x673   :  { %7175 = vrcp.f32 %v2404_v48  ;;  %v2411_v55 = vadd.f32 1.0, %v7172_v50  ;;  %v6944_v48 = vld [vmem:[#allocation12 + $0xa8] ss:$16 sps:$4 sm:$0xff]   ;;  %v6952_v50 = vld [vmem:[#allocation12 + $0x8c] ss:$16 sps:$4 sm:$0xff]  }
 0x675   :  { %7177 = vrcp.f32 %v2411_v55  ;;  %v6958_v55 = vld [vmem:[#allocation12 + $0x6c] ss:$16 sps:$4 sm:$0xff]  }
 0x67e   :  { %v7174_v49 = vpop.eup %7173 }
 0x67f   :  { %v2415_v52 = vmul.f32 %v7174_v49, %v7170_v3  ;;  %v6949_v3 = vld [vmem:[#allocation12 + $0x84] ss:$16 sps:$4 sm:$0xff]   ;;  %v6947_v49 = vld [vmem:[#allocation12 + $0x80] ss:$16 sps:$4 sm:$0xff]  }
 0x680   :  { %v7176_v54 = vpop.eup %7175 }
 0x681   :  { %v2414_v56 = vmul.f32 %v7176_v54, %v8071_v51  ;;  %v6955_v54 = vld [vmem:[#allocation12 + $0x64] ss:$16 sps:$4 sm:$0xff]  }
 0x682   :  { %v7178_v57 = vpop.eup %7177 }
 0x683   :  { %v8113_v43 = vadd.f32 %v2415_v52, %v2414_v56  ;;  %v6950_v52 = vld [vmem:[#allocation12 + $0x88] ss:$16 sps:$4 sm:$0xff]   ;;  %v6953_v56 = vld [vmem:[#allocation12 + $0x60] ss:$16 sps:$4 sm:$0xff]  }
 0x685   :  { %7179 = vtanh.f32 %v8113_v43 }
 0x692   :  { %v7180_v58 = vpop.eup %7179 }
 0x693   :  { %v2418_v59 = vmul.f32 %v7180_v58, %v7178_v57  ;;  %v6961_v57 = vld [vmem:[#allocation12 + $0x44] ss:$16 sps:$4 sm:$0xff]   ;;  %v6964_v58 = vld [vmem:[#allocation12 + $0x4c] ss:$16 sps:$4 sm:$0xff]  }
 0x695   :  { %v2420_v60 = vpack.c.bf16 %v2418_v59, %v2418_v59  ;;  %v6959_v59 = vld [vmem:[#allocation12 + $0x40] ss:$16 sps:$4 sm:$0xff]  }
 0x697   :  { %2421 = vst [vmem:[#allocation4] sm:$0xf] %v2420_v60  ;;  %2423 = vst [vmem:[#allocation2 + $0x14] sm:$0xf] %v2420_v60  ;;  %v6962_v60 = vld [vmem:[#allocation12 + $0x48] ss:$16 sps:$4 sm:$0xff]  }
 0x69e   :  { %v2424_v61 = vld [vmem:[#allocation4] sm:$0xf] }
 0x69f   :  { %2656 = vmatmul.mubr.bf16.vlgmr.msra.gmra.mxu0 %v2424_v61  ;;  %2697 = vmatmul.mubr.bf16.vlgmr.msra.gmra.mxu1 %v2424_v61  ;;  %v6967_v61 = vld [vmem:[#allocation12 + $0x24] ss:$16 sps:$4 sm:$0xff]  }
 0x6a0   :  { %2938 = vmatpush1.bf16.msra.mxu0 %v7930_v12  ;;  %2979 = vmatpush1.bf16.msra.mxu1 %v7932_v26  ;;  %v6931_v12 = vld [vmem:[#allocation12 + $0xe4] ss:$16 sps:$4 sm:$0xff]   ;;  %v6934_v26 = vld [vmem:[#allocation12 + $0xec] ss:$16 sps:$4 sm:$0xff]  }
 0x6a1   :  { %2939 = vmatprep.subr.bf16.mxu0 %v7938_v31  ;;  %2980 = vmatprep.subr.bf16.mxu1 %v7940_v11 }
 0x6a2   :  { %2969 = vmatprep.mubr.bf16.mxu0 %v8777_v13  ;;  %3010 = vmatprep.mubr.bf16.mxu1 %v8777_v13 }
 0x6a4   :  { %2940 = vmatpush1.bf16.msra.mxu0 %v7942_v35  ;;  %2981 = vmatpush1.bf16.msra.mxu1 %v7944_v21  ;;  %v8791_v35 = vld [vmem:[#allocation37_spill] sm:$0xff] }
 0x6a5   :  { %2941 = vmatprep.subr.bf16.mxu0 %v7950_v33  ;;  %2982 = vmatprep.subr.bf16.mxu1 %v7952_v34 }
 0x6a8   :  { %2942 = vmatpush1.bf16.msra.mxu0 %v7954_v30  ;;  %2983 = vmatpush1.bf16.msra.mxu1 %v7956_v9  ;;  %v8792_v9 = vld [vmem:[#allocation39_spill] sm:$0xff] }
 0x6a9   :  { %2943 = vmatprep.subr.bf16.mxu0 %v7962_v18  ;;  %2984 = vmatprep.subr.bf16.mxu1 %v7964_v24 }
 0x6ac   :  { %2944 = vmatpush1.bf16.msra.mxu0 %v7966_v20  ;;  %2985 = vmatpush1.bf16.msra.mxu1 %v7968_v28 }
 0x6ad   :  { %2945 = vmatprep.subr.bf16.mxu0 %v7974_v8  ;;  %2986 = vmatprep.subr.bf16.mxu1 %v7976_v14 }
 0x6b0   :  { %2946 = vmatpush1.bf16.msra.mxu0 %v7978_v15  ;;  %2987 = vmatpush1.bf16.msra.mxu1 %v7980_v27  ;;  %v8793_v15 = vld [vmem:[#allocation40_spill] sm:$0xff] }
 0x6b1   :  { %2947 = vmatprep.subr.bf16.mxu0 %v7986_v22  ;;  %2988 = vmatprep.subr.bf16.mxu1 %v7988_v19  ;;  %v8794_v22 = vld [vmem:[#allocation38_spill] sm:$0xff] }
 0x6b4   :  { %2948 = vmatpush1.bf16.msra.mxu0 %v7990_v29  ;;  %2989 = vmatpush1.bf16.msra.mxu1 %v7992_v25 }
 0x6b5   :  { %2949 = vmatprep.subr.bf16.mxu0 %v7998_v44  ;;  %2990 = vmatprep.subr.bf16.mxu1 %v8000_v53 }
 0x6b8   :  { %2950 = vmatpush1.bf16.msra.mxu0 %v8002_v17  ;;  %2991 = vmatpush1.bf16.msra.mxu1 %v8004_v10 }
 0x6b9   :  { %2951 = vmatprep.subr.bf16.mxu0 %v8008_v36  ;;  %2992 = vmatprep.subr.bf16.mxu1 %v8010_v37 }
 0x6bc   :  { %2952 = vmatpush1.bf16.msra.mxu0 %v8014_v38  ;;  %2993 = vmatpush1.bf16.msra.mxu1 %v8016_v39 }
 0x6bd   :  { %3298 = vmatprep.subr.bf16.mxu0 %v6931_v12  ;;  %3371 = vmatprep.subr.bf16.mxu1 %v6934_v26  ;;  %v6970_v12 = vld [vmem:[#allocation12 + $0x2c] ss:$16 sps:$4 sm:$0xff]   ;;  %v6965_v26 = vld [vmem:[#allocation12 + $0x20] ss:$16 sps:$4 sm:$0xff]  }
 0x75f   :  { %v2657_v31 = vpop.f32.mrf.mxu0  ;;  %v2698_v11 = vpop.f32.mrf.mxu1 }
 0x760   :  { %v2705_v21 = vadd.f32 %v2657_v31, %v8791_v35  ;;  %v2707_v19 = vadd.f32 %v2698_v11, %v8794_v22  ;;  %v6968_v31 = vld [vmem:[#allocation12 + $0x28] ss:$16 sps:$4 sm:$0xff]   ;;  %v6973_v11 = vld [vmem:[#allocation12 + $0x4] ss:$16 sps:$4 sm:$0xff]   ;;  %v6976_v35 = vld [vmem:[#allocation12 + $0xc] ss:$16 sps:$4 sm:$0xff]  }
 0x761   :  { %v2659_v33 = vpop.f32.mrf.mxu0  ;;  %v2700_v34 = vpop.f32.mrf.mxu1  ;;  %v8188_v22 = vld [vmem:[#allocation14 + $0xa4] ss:$16 sps:$4 sm:$0xff]  }
 0x762   :  { %v6375_v30 = vmul.f32 -1.442695, %v2705_v21  ;;  %v2706_v18 = vadd.f32 %v2659_v33, %v8792_v9  ;;  %v2708_v27 = vadd.f32 %v2700_v34, %v8793_v15  ;;  %v6971_v21 = vld [vmem:[#allocation12] ss:$16 sps:$4 sm:$0xff]   ;;  %v6974_v33 = vld [vmem:[#allocation12 + $0x8] ss:$16 sps:$4 sm:$0xff]  }
 0x763   :  { %v2661_v24 = vpop.f32.mrf.mxu0  ;;  %v2702_v20 = vpop.f32.mrf.mxu1  ;;  %v6977_v34 = vld [vmem:[#allocation2] sm:$0xff]   ;;  %v6979_v9 = vld [vmem:[#allocation2 + $0x10] sm:$0xff]  }
 0x764   :  { %7181 = vpow2.f32 %v6375_v30  ;;  %v6376_v28 = vmul.f32 -1.442695, %v2706_v18  ;;  %v6377_v29 = vmul.f32 -1.442695, %v2708_v27  ;;  %v6978_v30 = vld [vmem:[#allocation2 + $0x8] sm:$0xff]  }
 0x765   :  { %v2662_v8 = vpop.f32.mrf.mxu0  ;;  %v2703_v14 = vpop.f32.mrf.mxu1  ;;  %v8164_v18 = vld [vmem:[#allocation14 + $0xe4] ss:$16 sps:$4 sm:$0xff]   ;;  %v8166_v24 = vld [vmem:[#allocation14 + $0xec] ss:$16 sps:$4 sm:$0xff]   ;;  %v8168_v20 = vld [vmem:[#allocation14 + $0xe0] ss:$16 sps:$4 sm:$0xff]  }
 0x766   :  { %7183 = vpow2.f32 %v6376_v28  ;;  %v8170_v28 = vld [vmem:[#allocation14 + $0xe8] ss:$16 sps:$4 sm:$0xff]   ;;  %v8176_v8 = vld [vmem:[#allocation14 + $0xc4] ss:$16 sps:$4 sm:$0xff]   ;;  %v8178_v14 = vld [vmem:[#allocation14 + $0xcc] ss:$16 sps:$4 sm:$0xff]  }
 0x767   :  { %7185 = vtanh.f32 %v2707_v19  ;;  %v8180_v15 = vld [vmem:[#allocation14 + $0xc0] ss:$16 sps:$4 sm:$0xff]   ;;  %v8182_v27 = vld [vmem:[#allocation14 + $0xc8] ss:$16 sps:$4 sm:$0xff]   ;;  %v8190_v19 = vld [vmem:[#allocation14 + $0xac] ss:$16 sps:$4 sm:$0xff]  }
 0x768   :  { %7187 = vpow2.f32 %v6377_v29  ;;  %v8192_v29 = vld [vmem:[#allocation14 + $0xa0] ss:$16 sps:$4 sm:$0xff]  }
 0x771   :  { %v7182_v25 = vpop.eup %7181 }
 0x772   :  { %v2712_v44 = vadd.f32 1.0, %v7182_v25  ;;  %v8194_v25 = vld [vmem:[#allocation14 + $0xa8] ss:$16 sps:$4 sm:$0xff]  }
 0x773   :  { %v7184_v53 = vpop.eup %7183 }
 0x774   :  { %7189 = vrcp.f32 %v2712_v44  ;;  %v2718_v17 = vadd.f32 1.0, %v7184_v53  ;;  %v7186_v10 = vpop.eup %7185  ;;  %v8200_v44 = vld [vmem:[#allocation14 + $0x84] ss:$16 sps:$4 sm:$0xff]   ;;  %v8202_v53 = vld [vmem:[#allocation14 + $0x8c] ss:$16 sps:$4 sm:$0xff]  }
 0x775   :  { %v7188_v36 = vpop.eup %7187 }
 0x776   :  { %7191 = vrcp.f32 %v2718_v17  ;;  %v2725_v51 = vadd.f32 1.0, %v7188_v36  ;;  %v8204_v17 = vld [vmem:[#allocation14 + $0x80] ss:$16 sps:$4 sm:$0xff]   ;;  %v8212_v36 = vld [vmem:[#allocation14 + $0x64] ss:$16 sps:$4 sm:$0xff]  }
 0x778   :  { %7193 = vrcp.f32 %v2725_v51  ;;  %v8222_v51 = vld [vmem:[#allocation14 + $0x44] ss:$16 sps:$4 sm:$0xff]  }
 0x781   :  { %v7190_v37 = vpop.eup %7189 }
 0x782   :  { %v2729_v38 = vmul.f32 %v7190_v37, %v7186_v10  ;;  %v8206_v10 = vld [vmem:[#allocation14 + $0x88] ss:$16 sps:$4 sm:$0xff]   ;;  %v8214_v37 = vld [vmem:[#allocation14 + $0x6c] ss:$16 sps:$4 sm:$0xff]  }
 0x783   :  { %v7192_v39 = vpop.eup %7191 }
 0x784   :  { %v2728_v63 = vmul.f32 %v7192_v39, %v8113_v43  ;;  %v6956_v43 = vld [vmem:[#allocation12 + $0x68] ss:$16 sps:$4 sm:$0xff]  }
 0x785   :  { %v7194_v2 = vpop.eup %7193  ;;  %v8218_v39 = vld [vmem:[#allocation14 + $0x68] ss:$16 sps:$4 sm:$0xff]  }
 0x786   :  { %v8153_v1 = vadd.f32 %v2729_v38, %v2728_v63  ;;  %v8216_v38 = vld [vmem:[#allocation14 + $0x60] ss:$16 sps:$4 sm:$0xff]   ;;  %v8224_v63 = vld [vmem:[#allocation14 + $0x4c] ss:$16 sps:$4 sm:$0xff]  }
 0x788   :  { %7195 = vtanh.f32 %v8153_v1 }
 0x795   :  { %v7196_v4 = vpop.eup %7195 }
 0x796   :  { %v2732_v5 = vmul.f32 %v7196_v4, %v7194_v2  ;;  %v8228_v2 = vld [vmem:[#allocation14 + $0x40] ss:$16 sps:$4 sm:$0xff]   ;;  %v8230_v4 = vld [vmem:[#allocation14 + $0x48] ss:$16 sps:$4 sm:$0xff]  }
 0x798   :  { %v2734_v32 = vpack.c.bf16 %v2732_v5, %v2732_v5  ;;  %v8236_v5 = vld [vmem:[#allocation14 + $0x24] ss:$16 sps:$4 sm:$0xff]  }
 0x79a   :  { %2737 = vst [vmem:[#allocation2 + $0x18] sm:$0xf] %v2734_v32  ;;  %2735 = vst [vmem:[#allocation4] sm:$0xf] %v2734_v32  ;;  %v8238_v32 = vld [vmem:[#allocation14 + $0x2c] ss:$16 sps:$4 sm:$0xff]  }
 0x7a1   :  { %v2738_v42 = vld [vmem:[#allocation4] sm:$0xf] }
 0x7a2   :  { %2970 = vmatmul.mubr.bf16.vlgmr.msra.gmra.mxu0 %v2738_v42  ;;  %3011 = vmatmul.mubr.bf16.vlgmr.msra.gmra.mxu1 %v2738_v42  ;;  %v8252_v42 = vld [vmem:[#allocation14] ss:$16 sps:$4 sm:$0xff]  }
 0x7a3   :  { %3299 = vmatpush1.bf16.msra.mxu0 %v6929_v62  ;;  %3372 = vmatpush1.bf16.msra.mxu1 %v6932_v6  ;;  %v8240_v62 = vld [vmem:[#allocation14 + $0x20] ss:$16 sps:$4 sm:$0xff]   ;;  %v8242_v6 = vld [vmem:[#allocation14 + $0x28] ss:$16 sps:$4 sm:$0xff]  }
 0x7a4   :  { %3300 = vmatprep.subr.bf16.mxu0 %v6937_v40  ;;  %3373 = vmatprep.subr.bf16.mxu1 %v6940_v0  ;;  %v8246_v40 = vld [vmem:[#allocation14 + $0x4] ss:$16 sps:$4 sm:$0xff]   ;;  %v8248_v0 = vld [vmem:[#allocation14 + $0xc] ss:$16 sps:$4 sm:$0xff]  }
 0x7a5   :  { %3330 = vmatprep.mubr.bf16.mxu0 %v8777_v13  ;;  %3403 = vmatprep.mubr.bf16.mxu1 %v8777_v13 }
 0x7a7   :  { %3301 = vmatpush1.bf16.msra.mxu0 %v6935_v23  ;;  %3374 = vmatpush1.bf16.msra.mxu1 %v6938_v41  ;;  %v8254_v23 = vld [vmem:[#allocation14 + $0x8] ss:$16 sps:$4 sm:$0xff]  }
 0x7a8   :  { %3302 = vmatprep.subr.bf16.mxu0 %v6943_v45  ;;  %3375 = vmatprep.subr.bf16.mxu1 %v6946_v46  ;;  %v8795_v46 = vld [vmem:[#allocation41_spill] sm:$0xff] }
 0x7ab   :  { %3303 = vmatpush1.bf16.msra.mxu0 %v6941_v47  ;;  %3376 = vmatpush1.bf16.msra.mxu1 %v6944_v48 }
 0x7ac   :  { %3304 = vmatprep.subr.bf16.mxu0 %v6949_v3  ;;  %3377 = vmatprep.subr.bf16.mxu1 %v6952_v50 }
 0x7af   :  { %3305 = vmatpush1.bf16.msra.mxu0 %v6947_v49  ;;  %3378 = vmatpush1.bf16.msra.mxu1 %v6950_v52 }
 0x7b0   :  { %3306 = vmatprep.subr.bf16.mxu0 %v6955_v54  ;;  %3379 = vmatprep.subr.bf16.mxu1 %v6958_v55 }
 0x7b3   :  { %3307 = vmatpush1.bf16.msra.mxu0 %v6953_v56  ;;  %3380 = vmatpush1.bf16.msra.mxu1 %v6956_v43 }
 0x7b4   :  { %3308 = vmatprep.subr.bf16.mxu0 %v6961_v57  ;;  %3381 = vmatprep.subr.bf16.mxu1 %v6964_v58  ;;  %v8796_v58 = vld [vmem:[#allocation42_spill] sm:$0xff] }
 0x7b7   :  { %3309 = vmatpush1.bf16.msra.mxu0 %v6959_v59  ;;  %3382 = vmatpush1.bf16.msra.mxu1 %v6962_v60 }
 0x7b8   :  { %3310 = vmatprep.subr.bf16.mxu0 %v6967_v61  ;;  %3383 = vmatprep.subr.bf16.mxu1 %v6970_v12 }
 0x7bb   :  { %3311 = vmatpush1.bf16.msra.mxu0 %v6965_v26  ;;  %3384 = vmatpush1.bf16.msra.mxu1 %v6968_v31 }
 0x7bc   :  { %3312 = vmatprep.subr.bf16.mxu0 %v6973_v11  ;;  %3385 = vmatprep.subr.bf16.mxu1 %v6976_v35 }
 0x7bf   :  { %3313 = vmatpush1.bf16.msra.mxu0 %v6971_v21  ;;  %3386 = vmatpush1.bf16.msra.mxu1 %v6974_v33 }
 0x7c0   :  { %3676 = vmatprep.subr.bf16.mxu0 %v8164_v18  ;;  %3717 = vmatprep.subr.bf16.mxu1 %v8166_v24 }
 0x7c2   :  { %3331 = vmatmul.mubr.bf16.vlgmr.msra.gmra.mxu0 %v6977_v34  ;;  %3404 = vmatmul.mubr.bf16.vlgmr.msra.gmra.mxu1 %v6977_v34 }
 0x7c3   :  { %3340 = vmatprep.mubr.bf16.mxu0 %v8777_v13  ;;  %3413 = vmatprep.mubr.bf16.mxu1 %v8777_v13 }
 0x7c4   :  { %3677 = vmatpush1.bf16.msra.mxu0 %v8168_v20  ;;  %3718 = vmatpush1.bf16.msra.mxu1 %v8170_v28 }
 0x7c5   :  { %3678 = vmatprep.subr.bf16.mxu0 %v8176_v8  ;;  %3719 = vmatprep.subr.bf16.mxu1 %v8178_v14 }
 0x7c8   :  { %3679 = vmatpush1.bf16.msra.mxu0 %v8180_v15  ;;  %3720 = vmatpush1.bf16.msra.mxu1 %v8182_v27 }
 0x7c9   :  { %3680 = vmatprep.subr.bf16.mxu0 %v8188_v22  ;;  %3721 = vmatprep.subr.bf16.mxu1 %v8190_v19 }
 0x7ca   :  { %3341 = vmatmul.mubr.bf16.gmra.mxu0 %v6978_v30  ;;  %3414 = vmatmul.mubr.bf16.gmra.mxu1 %v6978_v30 }
 0x7cb   :  { %3350 = vmatprep.mubr.bf16.mxu0 %v8777_v13  ;;  %3423 = vmatprep.mubr.bf16.mxu1 %v8777_v13 }
 0x7cc   :  { %3681 = vmatpush1.bf16.msra.mxu0 %v8192_v29  ;;  %3722 = vmatpush1.bf16.msra.mxu1 %v8194_v25 }
 0x7cd   :  { %3682 = vmatprep.subr.bf16.mxu0 %v8200_v44  ;;  %3723 = vmatprep.subr.bf16.mxu1 %v8202_v53 }
 0x7d0   :  { %3683 = vmatpush1.bf16.msra.mxu0 %v8204_v17  ;;  %3724 = vmatpush1.bf16.msra.mxu1 %v8206_v10 }
 0x7d1   :  { %3684 = vmatprep.subr.bf16.mxu0 %v8212_v36  ;;  %3725 = vmatprep.subr.bf16.mxu1 %v8214_v37 }
 0x7d2   :  { %3351 = vmatmul.mubr.bf16.gmra.mxu0 %v6979_v9  ;;  %3424 = vmatmul.mubr.bf16.gmra.mxu1 %v6979_v9 }
 0x7d3   :  { %3360 = vmatprep.mubr.bf16.mxu0 %v8777_v13  ;;  %3433 = vmatprep.mubr.bf16.mxu1 %v8777_v13 }
 0x7d4   :  { %3685 = vmatpush1.bf16.msra.mxu0 %v8216_v38  ;;  %3726 = vmatpush1.bf16.msra.mxu1 %v8218_v39 }
 0x7d5   :  { %3686 = vmatprep.subr.bf16.mxu0 %v8222_v51  ;;  %3727 = vmatprep.subr.bf16.mxu1 %v8224_v63 }
 0x7d8   :  { %3687 = vmatpush1.bf16.msra.mxu0 %v8228_v2  ;;  %3728 = vmatpush1.bf16.msra.mxu1 %v8230_v4 }
 0x7d9   :  { %3688 = vmatprep.subr.bf16.mxu0 %v8236_v5  ;;  %3729 = vmatprep.subr.bf16.mxu1 %v8238_v32 }
 0x7dc   :  { %3689 = vmatpush1.bf16.msra.mxu0 %v8240_v62  ;;  %3730 = vmatpush1.bf16.msra.mxu1 %v8242_v6 }
 0x7dd   :  { %3690 = vmatprep.subr.bf16.mxu0 %v8246_v40  ;;  %3731 = vmatprep.subr.bf16.mxu1 %v8248_v0 }
 0x7e0   :  { %3691 = vmatpush1.bf16.msra.mxu0 %v8252_v42  ;;  %3732 = vmatpush1.bf16.msra.mxu1 %v8254_v23 }
 0x7e1   :  { %3987 = vmatprep.subr.bf16.mxu0 %v8164_v18  ;;  %4028 = vmatprep.subr.bf16.mxu1 %v8166_v24 }
 0x862   :  { %v2971_v41 = vpop.f32.mrf.mxu0  ;;  %v3012_v45 = vpop.f32.mrf.mxu1 }
 0x863   :  { %v3019_v47 = vadd.f32 %v2971_v41, %v8795_v46  ;;  %v3021_v59 = vadd.f32 %v3012_v45, %v8796_v58 }
 0x864   :  { %v2973_v48 = vpop.f32.mrf.mxu0  ;;  %v3014_v3 = vpop.f32.mrf.mxu1 }
 0x865   :  { %v6410_v50 = vmul.f32 -1.442695, %v3019_v47  ;;  %v3020_v49 = vadd.f32 %v2973_v48, %v7829_v16  ;;  %v3022_v57 = vadd.f32 %v3014_v3, %v7832_v7 }
 0x866   :  { %v2975_v52 = vpop.f32.mrf.mxu0  ;;  %v3016_v54 = vpop.f32.mrf.mxu1 }
 0x867   :  { %7197 = vpow2.f32 %v6410_v50  ;;  %v6411_v55 = vmul.f32 -1.442695, %v3020_v49  ;;  %v6412_v60 = vmul.f32 -1.442695, %v3022_v57 }
 0x868   :  { %v2976_v56 = vpop.f32.mrf.mxu0  ;;  %v3017_v43 = vpop.f32.mrf.mxu1 }
 0x869   :  { %7199 = vpow2.f32 %v6411_v55 }
 0x86a   :  { %7201 = vtanh.f32 %v3021_v59 }
 0x86b   :  { %7203 = vpow2.f32 %v6412_v60 }
 0x874   :  { %v7198_v61 = vpop.eup %7197 }
 0x875   :  { %v3026_v12 = vadd.f32 1.0, %v7198_v61 }
 0x876   :  { %v7200_v26 = vpop.eup %7199 }
 0x877   :  { %7205 = vrcp.f32 %v3026_v12  ;;  %v3032_v31 = vadd.f32 1.0, %v7200_v26  ;;  %v7202_v16 = vpop.eup %7201 }
 0x878   :  { %v7204_v11 = vpop.eup %7203 }
 0x879   :  { %7207 = vrcp.f32 %v3032_v31  ;;  %v3039_v34 = vadd.f32 1.0, %v7204_v11 }
 0x87b   :  { %7209 = vrcp.f32 %v3039_v34 }
 0x882   :  { %v3405_v3 = vpop.f32.mrf.mxu1 }
 0x884   :  { %v7206_v35 = vpop.eup %7205  ;;  %v3407_v49 = vpop.f32.mrf.mxu1 }
 0x885   :  { %v3043_v21 = vmul.f32 %v7206_v35, %v7202_v16 }
 0x886   :  { %v7208_v33 = vpop.eup %7207  ;;  %v8306_v54 = vpop.f32.mrf.mxu1 }
 0x887   :  { %v3042_v30 = vmul.f32 %v7208_v33, %v8153_v1  ;;  %v3332_v1 = vpop.f32.mrf.mxu0 }
 0x888   :  { %v7210_v9 = vpop.eup %7209  ;;  %v8310_v56 = vpop.f32.mrf.mxu1 }
 0x889   :  { %v3044_v7 = vadd.f32 %v3043_v21, %v3042_v30  ;;  %v3334_v50 = vpop.f32.mrf.mxu0 }
 0x88a   :  { %v8314_v57 = vpop.f32.mrf.mxu1 }
 0x88b   :  { %7211 = vtanh.f32 %v3044_v7  ;;  %v8304_v52 = vpop.f32.mrf.mxu0  ;;  %8797 = vst [vmem:[#allocation24_spill] sm:$0xff] %v8314_v57  ;;  %v3092_v7 = vld [vmem:[%s8745_s6] sm:$0xf] }
 0x88c   :  { %v8318_v59 = vpop.f32.mrf.mxu1 }
 0x88d   :  { %v8308_v55 = vpop.f32.mrf.mxu0 }
 0x88e   :  { %v8322_v61 = vpop.f32.mrf.mxu1 }
 0x88f   :  { %v8312_v43 = vpop.f32.mrf.mxu0  ;;  %8799 = vst [vmem:[#allocation27_spill] sm:$0xff] %v8322_v61 }
 0x890   :  { %v8326_v26 = vpop.f32.mrf.mxu1 }
 0x891   :  { %v8316_v58 = vpop.f32.mrf.mxu0  ;;  %8801 = vst [vmem:[#allocation26_spill] sm:$0xff] %v8326_v26 }
 0x892   :  { %v8330_v16 = vpop.f32.mrf.mxu1 }
 0x893   :  { %v8320_v60 = vpop.f32.mrf.mxu0  ;;  %8803 = vst [vmem:[#allocation31_spill] sm:$0xff] %v8330_v16 }
 0x894   :  { %8798 = vst [vmem:[#allocation25_spill] sm:$0xff] %v8320_v60  ;;  %v8334_v35 = vpop.f32.mrf.mxu1 }
 0x895   :  { %v8324_v12 = vpop.f32.mrf.mxu0  ;;  %8805 = vst [vmem:[#allocation30_spill] sm:$0xff] %v8334_v35 }
 0x896   :  { %8800 = vst [vmem:[#allocation28_spill] sm:$0xff] %v8324_v12  ;;  %v8338_v33 = vpop.f32.mrf.mxu1 }
 0x897   :  { %v8328_v31 = vpop.f32.mrf.mxu0  ;;  %8807 = vst [vmem:[#allocation35_spill] sm:$0xff] %v8338_v33 }
 0x898   :  { %v7212_v41 = vpop.eup %7211  ;;  %8802 = vst [vmem:[#allocation29_spill] sm:$0xff] %v8328_v31  ;;  %v8342_v30 = vpop.f32.mrf.mxu1 }
 0x899   :  { %v3046_v45 = vmul.f32 %v7212_v41, %v7210_v9  ;;  %v8332_v11 = vpop.f32.mrf.mxu0  ;;  %8809 = vst [vmem:[#allocation34_spill] sm:$0xff] %v8342_v30 }
 0x89a   :  { %8804 = vst [vmem:[#allocation32_spill] sm:$0xff] %v8332_v11 }
 0x89b   :  { %v3048_v46 = vpack.c.bf16 %v3046_v45, %v3046_v45  ;;  %v8336_v21 = vpop.f32.mrf.mxu0 }
 0x89c   :  { %8806 = vst [vmem:[#allocation33_spill] sm:$0xff] %v8336_v21 }
 0x89d   :  { %3049 = vst [vmem:[#allocation4] sm:$0xf] %v3048_v46  ;;  %3051 = vst [vmem:[#allocation2 + $0x1c] sm:$0xf] %v3048_v46  ;;  %v8340_v34 = vpop.f32.mrf.mxu0 }
 0x89e   :  { %3476 = vst [vmem:[#allocation4] sm:$0xf] %v8777_v13  ;;  %8808 = vst [vmem:[#allocation36_spill] sm:$0xff] %v8340_v34 }
 0x8a4   :  { %v7016_v47 = vld [vmem:[#allocation2 + $0x18] sm:$0xff]  }
 0x8a5   :  { %3361 = vmatmul.mubr.bf16.gmra.mxu0 %v7016_v47  ;;  %3434 = vmatmul.mubr.bf16.gmra.mxu1 %v7016_v47  ;;  %v3478_v48 = vld [vmem:[#allocation4] sm:$0xf]  ;;  %v8814_v47 = vld [vmem:[#allocation23_spill] sm:$0xff] }
 0x8a6   :  { %3708 = vmatprep.mubr.bf16.mxu0 %v8777_v13  ;;  %3749 = vmatprep.mubr.bf16.mxu1 %v8777_v13  ;;  %v8818_v30 = vsub.s32 1, %v8814_v47  ;;  %v8821_v60 = vsub.s32 3, %v8814_v47 }
 0x8a8   :  { %v8365_v16 = vrot.slane %v3092_v7, %v8818_v30 }
 0x8aa   :  { %v3335_v11 = vadd.f32 %v3334_v50, %v8365_v16  ;;  %v8822_v50 = vsub.s32 2, %v8814_v47 }
 0x8ad   :  { %3709 = vmatmul.mubr.bf16.vlgmr.msra.gmra.mxu0 %v3478_v48  ;;  %3750 = vmatmul.mubr.bf16.vlgmr.msra.gmra.mxu1 %v3478_v48  ;;  %v8815_v48 = vsub.s32 0, %v8814_v47 }
 0x8ae   :  { %3988 = vmatpush1.bf16.msra.mxu0 %v8168_v20  ;;  %4029 = vmatpush1.bf16.msra.mxu1 %v8170_v28 }
 0x8af   :  { %3989 = vmatprep.subr.bf16.mxu0 %v8176_v8  ;;  %4030 = vmatprep.subr.bf16.mxu1 %v8178_v14  ;;  %v8357_v21 = vrot.slane %v3092_v7, %v8815_v48 }
 0x8b0   :  { %4019 = vmatprep.mubr.bf16.mxu0 %v8777_v13  ;;  %4060 = vmatprep.mubr.bf16.mxu1 %v8777_v13 }
 0x8b2   :  { %3990 = vmatpush1.bf16.msra.mxu0 %v8180_v15  ;;  %4031 = vmatpush1.bf16.msra.mxu1 %v8182_v27 }
 0x8b3   :  { %3991 = vmatprep.subr.bf16.mxu0 %v8188_v22  ;;  %4032 = vmatprep.subr.bf16.mxu1 %v8190_v19 }
 0x8b6   :  { %3992 = vmatpush1.bf16.msra.mxu0 %v8192_v29  ;;  %4033 = vmatpush1.bf16.msra.mxu1 %v8194_v25 }
 0x8b7   :  { %3993 = vmatprep.subr.bf16.mxu0 %v8200_v44  ;;  %4034 = vmatprep.subr.bf16.mxu1 %v8202_v53 }
 0x8ba   :  { %3994 = vmatpush1.bf16.msra.mxu0 %v8204_v17  ;;  %4035 = vmatpush1.bf16.msra.mxu1 %v8206_v10 }
 0x8bb   :  { %3995 = vmatprep.subr.bf16.mxu0 %v8212_v36  ;;  %4036 = vmatprep.subr.bf16.mxu1 %v8214_v37 }
 0x8be   :  { %3996 = vmatpush1.bf16.msra.mxu0 %v8216_v38  ;;  %4037 = vmatpush1.bf16.msra.mxu1 %v8218_v39 }
 0x8bf   :  { %3997 = vmatprep.subr.bf16.mxu0 %v8222_v51  ;;  %4038 = vmatprep.subr.bf16.mxu1 %v8224_v63 }
 0x8c2   :  { %3998 = vmatpush1.bf16.msra.mxu0 %v8228_v2  ;;  %4039 = vmatpush1.bf16.msra.mxu1 %v8230_v4 }
 0x8c3   :  { %3999 = vmatprep.subr.bf16.mxu0 %v8236_v5  ;;  %4040 = vmatprep.subr.bf16.mxu1 %v8238_v32 }
 0x8c6   :  { %4000 = vmatpush1.bf16.msra.mxu0 %v8240_v62  ;;  %4041 = vmatpush1.bf16.msra.mxu1 %v8242_v6 }
 0x8c7   :  { %4001 = vmatprep.subr.bf16.mxu0 %v8246_v40  ;;  %4042 = vmatprep.subr.bf16.mxu1 %v8248_v0 }
 0x8ca   :  { %4002 = vmatpush1.bf16.msra.mxu0 %v8252_v42  ;;  %4043 = vmatpush1.bf16.msra.mxu1 %v8254_v23 }
 0x8cb   :  { %4298 = vmatprep.subr.bf16.mxu0 %v8164_v18  ;;  %4339 = vmatprep.subr.bf16.mxu1 %v8166_v24 }
 0x965   :  { %v8347_v9 = vpop.f32.mrf.mxu0  ;;  %v8349_v41 = vpop.f32.mrf.mxu1 }
 0x966   :  { %8810 = vst [vmem:[#allocation37_spill] sm:$0xff] %v8347_v9  ;;  %8811 = vst [vmem:[#allocation39_spill] sm:$0xff] %v8349_v41  ;;  %v3333_v41 = vadd.f32 %v3332_v1, %v8357_v21 }
 0x967   :  { %v8351_v45 = vpop.f32.mrf.mxu0  ;;  %v8353_v46 = vpop.f32.mrf.mxu1 }
 0x968   :  { %8812 = vst [vmem:[#allocation40_spill] sm:$0xff] %v8351_v45  ;;  %8813 = vst [vmem:[#allocation38_spill] sm:$0xff] %v8353_v46 }
 0x969   :  { %v8359_v33 = vpop.f32.mrf.mxu0  ;;  %v8361_v34 = vpop.f32.mrf.mxu1 }
 0x96a   :  { %8816 = vst [vmem:[#allocation41_spill] sm:$0xff] %v8359_v33  ;;  %8817 = vst [vmem:[#allocation42_spill] sm:$0xff] %v8361_v34 }
 0x96b   :  { %v8367_v35 = vpop.f32.mrf.mxu0  ;;  %v8369_v9 = vpop.f32.mrf.mxu1 }
 0x96c   :  { %8819 = vst [vmem:[#allocation23_spill] sm:$0xff] %v8367_v35  ;;  %8820 = vst [vmem:[#allocation43_spill] sm:$0xff] %v8369_v9  ;;  %v8375_v35 = vrot.slane %v3092_v7, %v8821_v60 }
 0x96d   :  { %v3710_v45 = vpop.f32.mrf.mxu0  ;;  %v3751_v46 = vpop.f32.mrf.mxu1 }
 0x96e   :  { %v3758_v48 = vadd.f32 %v3710_v45, %v3333_v41  ;;  %v3408_v1 = vadd.f32 %v3407_v49, %v8375_v35  ;;  %v8380_v41 = vrot.slane %v3092_v7, %v8822_v50 }
 0x96f   :  { %v3712_v31 = vpop.f32.mrf.mxu0  ;;  %v3753_v61 = vpop.f32.mrf.mxu1 }
 0x970   :  { %v6481_v33 = vmul.f32 -1.442695, %v3758_v48  ;;  %v3759_v26 = vadd.f32 %v3712_v31, %v3335_v11  ;;  %v3761_v45 = vadd.f32 %v3753_v61, %v3408_v1  ;;  %v3406_v31 = vadd.f32 %v3405_v3, %v8380_v41 }
 0x971   :  { %v3714_v34 = vpop.f32.mrf.mxu0  ;;  %v3755_v12 = vpop.f32.mrf.mxu1 }
 0x972   :  { %7213 = vpow2.f32 %v6481_v33  ;;  %v6482_v30 = vmul.f32 -1.442695, %v3759_v26  ;;  %v6483_v11 = vmul.f32 -1.442695, %v3761_v45  ;;  %v3760_v33 = vadd.f32 %v3751_v46, %v3406_v31 }
 0x973   :  { %v3715_v9 = vpop.f32.mrf.mxu0  ;;  %v3756_v57 = vpop.f32.mrf.mxu1  ;;  %v3337_v31 = vadd.f32 %v8304_v52, %v8357_v21 }
 0x974   :  { %7215 = vpow2.f32 %v6482_v30 }
 0x975   :  { %7217 = vpow2.f32 %v6483_v11 }
 0x97f   :  { %v7214_v12 = vpop.eup %7213 }
 0x980   :  { %v3765_v26 = vadd.f32 1.0, %v7214_v12 }
 0x981   :  { %v7216_v34 = vpop.eup %7215 }
 0x982   :  { %7219 = vrcp.f32 %v3765_v26  ;;  %v3771_v60 = vadd.f32 1.0, %v7216_v34  ;;  %v7218_v57 = vpop.eup %7217 }
 0x983   :  { %7221 = vtanh.f32 %v3760_v33  ;;  %v3778_v47 = vadd.f32 1.0, %v7218_v57  ;;  %v3339_v33 = vadd.f32 %v8308_v55, %v8365_v16 }
 0x984   :  { %7223 = vrcp.f32 %v3771_v60 }
 0x985   :  { %7225 = vrcp.f32 %v3778_v47 }
 0x98f   :  { %v7220_v9 = vpop.eup %7219 }
 0x990   :  { %v7222_v49 = vpop.eup %7221 }
 0x991   :  { %v7224_v48 = vpop.eup %7223  ;;  %v3782_v30 = vmul.f32 %v7222_v49, %v7220_v9 }
 0x992   :  { %v3781_v7 = vmul.f32 0.0, %v7224_v48  ;;  %v7226_v3 = vpop.eup %7225 }
 0x994   :  { %v8383_v61 = vadd.f32 %v3782_v30, %v3781_v7  ;;  %v3410_v30 = vadd.f32 %v8306_v54, %v8380_v41 }
 0x996   :  { %7227 = vtanh.f32 %v8383_v61 }
 0x9a3   :  { %v7228_v46 = vpop.eup %7227 }
 0x9a4   :  { %v3785_v1 = vmul.f32 %v7228_v46, %v7226_v3 }
 0x9a6   :  { %v3787_v50 = vpack.c.bf16 %v3785_v1, %v3785_v1 }
 0x9a8   :  { %3788 = vst [vmem:[#allocation4] sm:$0xf] %v3787_v50 }
 0x9af   :  { %v3789_v45 = vld [vmem:[#allocation4] sm:$0xf] }
 0x9b0   :  { %4020 = vmatmul.mubr.bf16.vlgmr.msra.gmra.mxu0 %v3789_v45  ;;  %4061 = vmatmul.mubr.bf16.vlgmr.msra.gmra.mxu1 %v3789_v45 }
 0x9b1   :  { %4299 = vmatpush1.bf16.msra.mxu0 %v8168_v20  ;;  %4340 = vmatpush1.bf16.msra.mxu1 %v8170_v28 }
 0x9b2   :  { %4300 = vmatprep.subr.bf16.mxu0 %v8176_v8  ;;  %4341 = vmatprep.subr.bf16.mxu1 %v8178_v14 }
 0x9b3   :  { %4330 = vmatprep.mubr.bf16.mxu0 %v8777_v13  ;;  %4371 = vmatprep.mubr.bf16.mxu1 %v8777_v13 }
 0x9b5   :  { %4301 = vmatpush1.bf16.msra.mxu0 %v8180_v15  ;;  %4342 = vmatpush1.bf16.msra.mxu1 %v8182_v27 }
 0x9b6   :  { %4302 = vmatprep.subr.bf16.mxu0 %v8188_v22  ;;  %4343 = vmatprep.subr.bf16.mxu1 %v8190_v19 }
 0x9b9   :  { %4303 = vmatpush1.bf16.msra.mxu0 %v8192_v29  ;;  %4344 = vmatpush1.bf16.msra.mxu1 %v8194_v25 }
 0x9ba   :  { %4304 = vmatprep.subr.bf16.mxu0 %v8200_v44  ;;  %4345 = vmatprep.subr.bf16.mxu1 %v8202_v53 }
 0x9bd   :  { %4305 = vmatpush1.bf16.msra.mxu0 %v8204_v17  ;;  %4346 = vmatpush1.bf16.msra.mxu1 %v8206_v10 }
 0x9be   :  { %4306 = vmatprep.subr.bf16.mxu0 %v8212_v36  ;;  %4347 = vmatprep.subr.bf16.mxu1 %v8214_v37 }
 0x9c1   :  { %4307 = vmatpush1.bf16.msra.mxu0 %v8216_v38  ;;  %4348 = vmatpush1.bf16.msra.mxu1 %v8218_v39 }
 0x9c2   :  { %4308 = vmatprep.subr.bf16.mxu0 %v8222_v51  ;;  %4349 = vmatprep.subr.bf16.mxu1 %v8224_v63 }
 0x9c5   :  { %4309 = vmatpush1.bf16.msra.mxu0 %v8228_v2  ;;  %4350 = vmatpush1.bf16.msra.mxu1 %v8230_v4 }
 0x9c6   :  { %4310 = vmatprep.subr.bf16.mxu0 %v8236_v5  ;;  %4351 = vmatprep.subr.bf16.mxu1 %v8238_v32 }
 0x9c9   :  { %4311 = vmatpush1.bf16.msra.mxu0 %v8240_v62  ;;  %4352 = vmatpush1.bf16.msra.mxu1 %v8242_v6 }
 0x9ca   :  { %4312 = vmatprep.subr.bf16.mxu0 %v8246_v40  ;;  %4353 = vmatprep.subr.bf16.mxu1 %v8248_v0 }
 0x9cd   :  { %4313 = vmatpush1.bf16.msra.mxu0 %v8252_v42  ;;  %4354 = vmatpush1.bf16.msra.mxu1 %v8254_v23 }
 0x9ce   :  { %4609 = vmatprep.subr.bf16.mxu0 %v8164_v18  ;;  %4650 = vmatprep.subr.bf16.mxu1 %v8166_v24  ;;  %v3412_v24 = vadd.f32 %v8310_v56, %v8375_v35 }
 0xa70   :  { %v4021_v11 = vpop.f32.mrf.mxu0  ;;  %v4062_v12 = vpop.f32.mrf.mxu1 }
 0xa71   :  { %v4069_v26 = vadd.f32 %v4021_v11, %v3337_v31  ;;  %v4071_v55 = vadd.f32 %v4062_v12, %v3410_v30  ;;  %v8482_v30 = vld [vmem:[#allocation14 + $0xe0] ss:$16 sps:$4 sm:$0xff]  }
 0xa72   :  { %v4023_v34 = vpop.f32.mrf.mxu0  ;;  %v4064_v60 = vpop.f32.mrf.mxu1 }
 0xa73   :  { %v6516_v57 = vmul.f32 -1.442695, %v4069_v26  ;;  %v4070_v9 = vadd.f32 %v4023_v34, %v3339_v33  ;;  %v4072_v52 = vadd.f32 %v4064_v60, %v3412_v24  ;;  %v8478_v24 = vld [vmem:[#allocation14 + $0xe4] ss:$16 sps:$4 sm:$0xff]  }
 0xa74   :  { %v4025_v49 = vpop.f32.mrf.mxu0  ;;  %v4066_v48 = vpop.f32.mrf.mxu1 }
 0xa75   :  { %7229 = vpow2.f32 %v6516_v57  ;;  %v6517_v47 = vmul.f32 -1.442695, %v4070_v9  ;;  %v6518_v3 = vmul.f32 -1.442695, %v4072_v52  ;;  %v8480_v52 = vld [vmem:[#allocation14 + $0xec] ss:$16 sps:$4 sm:$0xff]  }
 0xa76   :  { %v4026_v18 = vpop.f32.mrf.mxu0  ;;  %v4067_v7 = vpop.f32.mrf.mxu1 }
 0xa77   :  { %7231 = vpow2.f32 %v6517_v47 }
 0xa78   :  { %7233 = vtanh.f32 %v4071_v55  ;;  %v8484_v55 = vld [vmem:[#allocation14 + $0xe8] ss:$16 sps:$4 sm:$0xff]  }
 0xa79   :  { %7235 = vpow2.f32 %v6518_v3  ;;  %v8490_v3 = vld [vmem:[#allocation14 + $0xc4] ss:$16 sps:$4 sm:$0xff]  }
 0xa82   :  { %v7230_v46 = vpop.eup %7229 }
 0xa83   :  { %v4076_v1 = vadd.f32 1.0, %v7230_v46  ;;  %v8492_v46 = vld [vmem:[#allocation14 + $0xcc] ss:$16 sps:$4 sm:$0xff]  }
 0xa84   :  { %v7232_v50 = vpop.eup %7231 }
 0xa85   :  { %7237 = vrcp.f32 %v4076_v1  ;;  %v4082_v45 = vadd.f32 1.0, %v7232_v50  ;;  %v7234_v31 = vpop.eup %7233  ;;  %v8494_v1 = vld [vmem:[#allocation14 + $0xc0] ss:$16 sps:$4 sm:$0xff]   ;;  %v8496_v50 = vld [vmem:[#allocation14 + $0xc8] ss:$16 sps:$4 sm:$0xff]  }
 0xa86   :  { %v7236_v11 = vpop.eup %7235 }
 0xa87   :  { %7239 = vrcp.f32 %v4082_v45  ;;  %v4089_v56 = vadd.f32 1.0, %v7236_v11  ;;  %v8502_v45 = vld [vmem:[#allocation14 + $0xa4] ss:$16 sps:$4 sm:$0xff]   ;;  %v8506_v11 = vld [vmem:[#allocation14 + $0xa0] ss:$16 sps:$4 sm:$0xff]  }
 0xa89   :  { %7241 = vrcp.f32 %v4089_v56  ;;  %v8518_v56 = vld [vmem:[#allocation14 + $0x80] ss:$16 sps:$4 sm:$0xff]  }
 0xa92   :  { %v7238_v33 = vpop.eup %7237 }
 0xa93   :  { %v4093_v26 = vmul.f32 %v7238_v33, %v7234_v31  ;;  %v8504_v31 = vld [vmem:[#allocation14 + $0xac] ss:$16 sps:$4 sm:$0xff]   ;;  %v8508_v33 = vld [vmem:[#allocation14 + $0xa8] ss:$16 sps:$4 sm:$0xff]  }
 0xa94   :  { %v7240_v34 = vpop.eup %7239 }
 0xa95   :  { %v4092_v60 = vmul.f32 %v7240_v34, %v8383_v61  ;;  %v8516_v34 = vld [vmem:[#allocation14 + $0x8c] ss:$16 sps:$4 sm:$0xff]  }
 0xa96   :  { %v7242_v54 = vpop.eup %7241 }
 0xa97   :  { %v8429_v57 = vadd.f32 %v4093_v26, %v4092_v60  ;;  %v8514_v26 = vld [vmem:[#allocation14 + $0x84] ss:$16 sps:$4 sm:$0xff]   ;;  %v8520_v60 = vld [vmem:[#allocation14 + $0x88] ss:$16 sps:$4 sm:$0xff]  }
 0xa99   :  { %7243 = vtanh.f32 %v8429_v57 }
 0xaa6   :  { %v7244_v12 = vpop.eup %7243 }
 0xaa7   :  { %v4096_v9 = vmul.f32 %v7244_v12, %v7242_v54  ;;  %v8528_v54 = vld [vmem:[#allocation14 + $0x6c] ss:$16 sps:$4 sm:$0xff]   ;;  %v8530_v12 = vld [vmem:[#allocation14 + $0x60] ss:$16 sps:$4 sm:$0xff]  }
 0xaa9   :  { %v4098_v49 = vpack.c.bf16 %v4096_v9, %v4096_v9  ;;  %v8532_v9 = vld [vmem:[#allocation14 + $0x68] ss:$16 sps:$4 sm:$0xff]  }
 0xaab   :  { %4099 = vst [vmem:[#allocation4] sm:$0xf] %v4098_v49  ;;  %v8538_v49 = vld [vmem:[#allocation14 + $0x44] ss:$16 sps:$4 sm:$0xff]  }
 0xab2   :  { %v4100_v48 = vld [vmem:[#allocation4] sm:$0xf] }
 0xab3   :  { %4331 = vmatmul.mubr.bf16.vlgmr.msra.gmra.mxu0 %v4100_v48  ;;  %4372 = vmatmul.mubr.bf16.vlgmr.msra.gmra.mxu1 %v4100_v48  ;;  %v8540_v48 = vld [vmem:[#allocation14 + $0x4c] ss:$16 sps:$4 sm:$0xff]  }
 0xab4   :  { %4610 = vmatpush1.bf16.msra.mxu0 %v8168_v20  ;;  %4651 = vmatpush1.bf16.msra.mxu1 %v8170_v28  ;;  %v3343_v20 = vadd.f32 %v8312_v43, %v8357_v21 }
 0xab5   :  { %4611 = vmatprep.subr.bf16.mxu0 %v8176_v8  ;;  %4652 = vmatprep.subr.bf16.mxu1 %v8178_v14  ;;  %v3345_v14 = vadd.f32 %v8316_v58, %v8365_v16 }
 0xab6   :  { %4641 = vmatprep.mubr.bf16.mxu0 %v8777_v13  ;;  %4682 = vmatprep.mubr.bf16.mxu1 %v8777_v13 }
 0xab8   :  { %4612 = vmatpush1.bf16.msra.mxu0 %v8180_v15  ;;  %4653 = vmatpush1.bf16.msra.mxu1 %v8182_v27 }
 0xab9   :  { %4613 = vmatprep.subr.bf16.mxu0 %v8188_v22  ;;  %4654 = vmatprep.subr.bf16.mxu1 %v8190_v19 }
 0xabc   :  { %4614 = vmatpush1.bf16.msra.mxu0 %v8192_v29  ;;  %4655 = vmatpush1.bf16.msra.mxu1 %v8194_v25 }
 0xabd   :  { %4615 = vmatprep.subr.bf16.mxu0 %v8200_v44  ;;  %4656 = vmatprep.subr.bf16.mxu1 %v8202_v53 }
 0xac0   :  { %4616 = vmatpush1.bf16.msra.mxu0 %v8204_v17  ;;  %4657 = vmatpush1.bf16.msra.mxu1 %v8206_v10 }
 0xac1   :  { %4617 = vmatprep.subr.bf16.mxu0 %v8212_v36  ;;  %4658 = vmatprep.subr.bf16.mxu1 %v8214_v37  ;;  %v3418_v36 = vadd.f32 %v8318_v59, %v8375_v35 }
 0xac4   :  { %4618 = vmatpush1.bf16.msra.mxu0 %v8216_v38  ;;  %4659 = vmatpush1.bf16.msra.mxu1 %v8218_v39  ;;  %v8823_v38 = vld [vmem:[#allocation24_spill] sm:$0xff] }
 0xac5   :  { %4619 = vmatprep.subr.bf16.mxu0 %v8222_v51  ;;  %4660 = vmatprep.subr.bf16.mxu1 %v8224_v63  ;;  %v3416_v39 = vadd.f32 %v8823_v38, %v8380_v41 }
 0xac8   :  { %4620 = vmatpush1.bf16.msra.mxu0 %v8228_v2  ;;  %4661 = vmatpush1.bf16.msra.mxu1 %v8230_v4 }
 0xac9   :  { %4621 = vmatprep.subr.bf16.mxu0 %v8236_v5  ;;  %4662 = vmatprep.subr.bf16.mxu1 %v8238_v32 }
 0xacc   :  { %4622 = vmatpush1.bf16.msra.mxu0 %v8240_v62  ;;  %4663 = vmatpush1.bf16.msra.mxu1 %v8242_v6 }
 0xacd   :  { %4623 = vmatprep.subr.bf16.mxu0 %v8246_v40  ;;  %4664 = vmatprep.subr.bf16.mxu1 %v8248_v0 }
 0xad0   :  { %4624 = vmatpush1.bf16.msra.mxu0 %v8252_v42  ;;  %4665 = vmatpush1.bf16.msra.mxu1 %v8254_v23 }
 0xad1   :  { %4920 = vmatprep.subr.bf16.mxu0 %v8478_v24  ;;  %4961 = vmatprep.subr.bf16.mxu1 %v8480_v52 }
 0xb73   :  { %v4332_v28 = vpop.f32.mrf.mxu0  ;;  %v4373_v8 = vpop.f32.mrf.mxu1 }
 0xb74   :  { %v4380_v15 = vadd.f32 %v4332_v28, %v3343_v20  ;;  %v4382_v51 = vadd.f32 %v4373_v8, %v3416_v39  ;;  %v8542_v20 = vld [vmem:[#allocation14 + $0x40] ss:$16 sps:$4 sm:$0xff]   ;;  %v8544_v28 = vld [vmem:[#allocation14 + $0x48] ss:$16 sps:$4 sm:$0xff]   ;;  %v8550_v8 = vld [vmem:[#allocation14 + $0x24] ss:$16 sps:$4 sm:$0xff]  }
 0xb75   :  { %v4334_v27 = vpop.f32.mrf.mxu0  ;;  %v4375_v22 = vpop.f32.mrf.mxu1 }
 0xb76   :  { %v6551_v19 = vmul.f32 -1.442695, %v4380_v15  ;;  %v4381_v29 = vadd.f32 %v4334_v27, %v3345_v14  ;;  %v4383_v37 = vadd.f32 %v4375_v22, %v3418_v36  ;;  %v8552_v14 = vld [vmem:[#allocation14 + $0x2c] ss:$16 sps:$4 sm:$0xff]   ;;  %v8554_v15 = vld [vmem:[#allocation14 + $0x20] ss:$16 sps:$4 sm:$0xff]  }
 0xb77   :  { %v4336_v25 = vpop.f32.mrf.mxu0  ;;  %v4377_v44 = vpop.f32.mrf.mxu1  ;;  %v8556_v27 = vld [vmem:[#allocation14 + $0x28] ss:$16 sps:$4 sm:$0xff]   ;;  %v8560_v22 = vld [vmem:[#allocation14 + $0x4] ss:$16 sps:$4 sm:$0xff]  }
 0xb78   :  { %7245 = vpow2.f32 %v6551_v19  ;;  %v6552_v53 = vmul.f32 -1.442695, %v4381_v29  ;;  %v6553_v63 = vmul.f32 -1.442695, %v4383_v37  ;;  %v8562_v19 = vld [vmem:[#allocation14 + $0xc] ss:$16 sps:$4 sm:$0xff]  }
 0xb79   :  { %v4337_v17 = vpop.f32.mrf.mxu0  ;;  %v4378_v10 = vpop.f32.mrf.mxu1  ;;  %v8566_v29 = vld [vmem:[#allocation14] ss:$16 sps:$4 sm:$0xff]   ;;  %v8568_v25 = vld [vmem:[#allocation14 + $0x8] ss:$16 sps:$4 sm:$0xff]  }
 0xb7a   :  { %7247 = vpow2.f32 %v6552_v53  ;;  %v8824_v44 = vld [vmem:[#allocation25_spill] sm:$0xff]  ;;  %v8825_v36 = vld [vmem:[#allocation28_spill] sm:$0xff] }
 0xb7b   :  { %7249 = vtanh.f32 %v4382_v51  ;;  %v3347_v53 = vadd.f32 %v8824_v44, %v8357_v21  ;;  %v3349_v37 = vadd.f32 %v8825_v36, %v8365_v16 }
 0xb7c   :  { %7251 = vpow2.f32 %v6553_v63 }
 0xb85   :  { %v7246_v2 = vpop.eup %7245 }
 0xb86   :  { %v4387_v4 = vadd.f32 1.0, %v7246_v2 }
 0xb87   :  { %v7248_v5 = vpop.eup %7247 }
 0xb88   :  { %7253 = vrcp.f32 %v4387_v4  ;;  %v4393_v32 = vadd.f32 1.0, %v7248_v5  ;;  %v7250_v62 = vpop.eup %7249 }
 0xb89   :  { %v7252_v6 = vpop.eup %7251 }
 0xb8a   :  { %7255 = vrcp.f32 %v4393_v32  ;;  %v4400_v23 = vadd.f32 1.0, %v7252_v6 }
 0xb8c   :  { %7257 = vrcp.f32 %v4400_v23  ;;  %v8827_v23 = vld [vmem:[#allocation27_spill] sm:$0xff] }
 0xb95   :  { %v7254_v40 = vpop.eup %7253 }
 0xb96   :  { %v4404_v0 = vmul.f32 %v7254_v40, %v7250_v62  ;;  %v8826_v40 = vld [vmem:[#allocation26_spill] sm:$0xff] }
 0xb97   :  { %v7256_v42 = vpop.eup %7255 }
 0xb98   :  { %v4403_v43 = vmul.f32 %v7256_v42, %v8429_v57  ;;  %v8526_v57 = vld [vmem:[#allocation14 + $0x64] ss:$16 sps:$4 sm:$0xff]  }
 0xb99   :  { %v7258_v59 = vpop.eup %7257 }
 0xb9a   :  { %v8473_v58 = vadd.f32 %v4404_v0, %v4403_v43  ;;  %v3422_v0 = vadd.f32 %v8826_v40, %v8375_v35  ;;  %v3420_v43 = vadd.f32 %v8827_v23, %v8380_v41 }
 0xb9c   :  { %7259 = vtanh.f32 %v8473_v58 }
 0xba9   :  { %v7260_v61 = vpop.eup %7259 }
 0xbaa   :  { %v4407_v47 = vmul.f32 %v7260_v61, %v7258_v59 }
 0xbac   :  { %v4409_v18 = vpack.c.bf16 %v4407_v47, %v4407_v47 }
 0xbae   :  { %4410 = vst [vmem:[#allocation4] sm:$0xf] %v4409_v18 }
 0xbb5   :  { %v4411_v7 = vld [vmem:[#allocation4] sm:$0xf] }
 0xbb6   :  { %4642 = vmatmul.mubr.bf16.vlgmr.msra.gmra.mxu0 %v4411_v7  ;;  %4683 = vmatmul.mubr.bf16.vlgmr.msra.gmra.mxu1 %v4411_v7 }
 0xbb7   :  { %4952 = vmatprep.mubr.bf16.mxu0 %v8777_v13  ;;  %4993 = vmatprep.mubr.bf16.mxu1 %v8777_v13 }
 0xbb8   :  { %4921 = vmatpush1.bf16.msra.mxu0 %v8482_v30  ;;  %4962 = vmatpush1.bf16.msra.mxu1 %v8484_v55 }
 0xbb9   :  { %4922 = vmatprep.subr.bf16.mxu0 %v8490_v3  ;;  %4963 = vmatprep.subr.bf16.mxu1 %v8492_v46 }
 0xbbc   :  { %4923 = vmatpush1.bf16.msra.mxu0 %v8494_v1  ;;  %4964 = vmatpush1.bf16.msra.mxu1 %v8496_v50 }
 0xbbd   :  { %4924 = vmatprep.subr.bf16.mxu0 %v8502_v45  ;;  %4965 = vmatprep.subr.bf16.mxu1 %v8504_v31 }
 0xbc0   :  { %4925 = vmatpush1.bf16.msra.mxu0 %v8506_v11  ;;  %4966 = vmatpush1.bf16.msra.mxu1 %v8508_v33 }
 0xbc1   :  { %4926 = vmatprep.subr.bf16.mxu0 %v8514_v26  ;;  %4967 = vmatprep.subr.bf16.mxu1 %v8516_v34 }
 0xbc4   :  { %4927 = vmatpush1.bf16.msra.mxu0 %v8518_v56  ;;  %4968 = vmatpush1.bf16.msra.mxu1 %v8520_v60 }
 0xbc5   :  { %4928 = vmatprep.subr.bf16.mxu0 %v8526_v57  ;;  %4969 = vmatprep.subr.bf16.mxu1 %v8528_v54 }
 0xbc8   :  { %4929 = vmatpush1.bf16.msra.mxu0 %v8530_v12  ;;  %4970 = vmatpush1.bf16.msra.mxu1 %v8532_v9 }
 0xbc9   :  { %4930 = vmatprep.subr.bf16.mxu0 %v8538_v49  ;;  %4971 = vmatprep.subr.bf16.mxu1 %v8540_v48 }
 0xbcc   :  { %4931 = vmatpush1.bf16.msra.mxu0 %v8542_v20  ;;  %4972 = vmatpush1.bf16.msra.mxu1 %v8544_v28 }
 0xbcd   :  { %4932 = vmatprep.subr.bf16.mxu0 %v8550_v8  ;;  %4973 = vmatprep.subr.bf16.mxu1 %v8552_v14 }
 0xbd0   :  { %4933 = vmatpush1.bf16.msra.mxu0 %v8554_v15  ;;  %4974 = vmatpush1.bf16.msra.mxu1 %v8556_v27 }
 0xbd1   :  { %4934 = vmatprep.subr.bf16.mxu0 %v8560_v22  ;;  %4975 = vmatprep.subr.bf16.mxu1 %v8562_v19 }
 0xbd4   :  { %4935 = vmatpush1.bf16.msra.mxu0 %v8566_v29  ;;  %4976 = vmatpush1.bf16.msra.mxu1 %v8568_v25 }
 0xbd5   :  { %5231 = vmatprep.subr.bf16.mxu0 %v8478_v24  ;;  %5272 = vmatprep.subr.bf16.mxu1 %v8480_v52 }
 0xc76   :  { %v4643_v17 = vpop.f32.mrf.mxu0  ;;  %v4684_v10 = vpop.f32.mrf.mxu1 }
 0xc77   :  { %v4691_v38 = vadd.f32 %v4643_v17, %v3347_v53  ;;  %v4693_v59 = vadd.f32 %v4684_v10, %v3420_v43 }
 0xc78   :  { %v4645_v39 = vpop.f32.mrf.mxu0  ;;  %v4686_v51 = vpop.f32.mrf.mxu1 }
 0xc79   :  { %v6586_v63 = vmul.f32 -1.442695, %v4691_v38  ;;  %v4692_v2 = vadd.f32 %v4645_v39, %v3349_v37  ;;  %v4694_v42 = vadd.f32 %v4686_v51, %v3422_v0  ;;  %v8829_v0 = vld [vmem:[#allocation32_spill] sm:$0xff] }
 0xc7a   :  { %v4647_v4 = vpop.f32.mrf.mxu0  ;;  %v4688_v5 = vpop.f32.mrf.mxu1 }
 0xc7b   :  { %7261 = vpow2.f32 %v6586_v63  ;;  %v6587_v32 = vmul.f32 -1.442695, %v4692_v2  ;;  %v6588_v61 = vmul.f32 -1.442695, %v4694_v42  ;;  %v3355_v42 = vadd.f32 %v8829_v0, %v8365_v16 }
 0xc7c   :  { %v4648_v62 = vpop.f32.mrf.mxu0  ;;  %v4689_v6 = vpop.f32.mrf.mxu1 }
 0xc7d   :  { %7263 = vpow2.f32 %v6587_v32 }
 0xc7e   :  { %7265 = vtanh.f32 %v4693_v59 }
 0xc7f   :  { %7267 = vpow2.f32 %v6588_v61 }
 0xc88   :  { %v7262_v47 = vpop.eup %7261 }
 0xc89   :  { %v4698_v18 = vadd.f32 1.0, %v7262_v47 }
 0xc8a   :  { %v7264_v7 = vpop.eup %7263 }
 0xc8b   :  { %7269 = vrcp.f32 %v4698_v18  ;;  %v4704_v44 = vadd.f32 1.0, %v7264_v7  ;;  %v7266_v53 = vpop.eup %7265 }
 0xc8c   :  { %v7268_v17 = vpop.eup %7267 }
 0xc8d   :  { %7271 = vrcp.f32 %v4704_v44  ;;  %v4711_v39 = vadd.f32 1.0, %v7268_v17 }
 0xc8f   :  { %7273 = vrcp.f32 %v4711_v39  ;;  %v8831_v39 = vld [vmem:[#allocation31_spill] sm:$0xff] }
 0xc98   :  { %v7270_v36 = vpop.eup %7269 }
 0xc99   :  { %v4715_v37 = vmul.f32 %v7270_v36, %v7266_v53  ;;  %v8830_v36 = vld [vmem:[#allocation30_spill] sm:$0xff] }
 0xc9a   :  { %v7272_v38 = vpop.eup %7271 }
 0xc9b   :  { %v4714_v51 = vmul.f32 %v7272_v38, %v8473_v58  ;;  %v8828_v58 = vld [vmem:[#allocation29_spill] sm:$0xff] }
 0xc9c   :  { %v7274_v10 = vpop.eup %7273  ;;  %v3353_v62 = vadd.f32 %v8828_v58, %v8357_v21 }
 0xc9d   :  { %v8585_v63 = vadd.f32 %v4715_v37, %v4714_v51  ;;  %v3428_v37 = vadd.f32 %v8830_v36, %v8375_v35  ;;  %v3426_v51 = vadd.f32 %v8831_v39, %v8380_v41 }
 0xc9f   :  { %7275 = vtanh.f32 %v8585_v63 }
 0xcac   :  { %v7276_v2 = vpop.eup %7275 }
 0xcad   :  { %v4718_v4 = vmul.f32 %v7276_v2, %v7274_v10 }
 0xcaf   :  { %v4720_v5 = vpack.c.bf16 %v4718_v4, %v4718_v4 }
 0xcb1   :  { %4721 = vst [vmem:[#allocation4] sm:$0xf] %v4720_v5 }
 0xcb8   :  { %v4722_v32 = vld [vmem:[#allocation4] sm:$0xf] }
 0xcb9   :  { %4953 = vmatmul.mubr.bf16.vlgmr.msra.gmra.mxu0 %v4722_v32  ;;  %4994 = vmatmul.mubr.bf16.vlgmr.msra.gmra.mxu1 %v4722_v32 }
 0xcba   :  { %5232 = vmatpush1.bf16.msra.mxu0 %v8482_v30  ;;  %5273 = vmatpush1.bf16.msra.mxu1 %v8484_v55 }
 0xcbb   :  { %5233 = vmatprep.subr.bf16.mxu0 %v8490_v3  ;;  %5274 = vmatprep.subr.bf16.mxu1 %v8492_v46 }
 0xcbc   :  { %5263 = vmatprep.mubr.bf16.mxu0 %v8777_v13  ;;  %5304 = vmatprep.mubr.bf16.mxu1 %v8777_v13 }
 0xcbe   :  { %5234 = vmatpush1.bf16.msra.mxu0 %v8494_v1  ;;  %5275 = vmatpush1.bf16.msra.mxu1 %v8496_v50 }
 0xcbf   :  { %5235 = vmatprep.subr.bf16.mxu0 %v8502_v45  ;;  %5276 = vmatprep.subr.bf16.mxu1 %v8504_v31 }
 0xcc2   :  { %5236 = vmatpush1.bf16.msra.mxu0 %v8506_v11  ;;  %5277 = vmatpush1.bf16.msra.mxu1 %v8508_v33 }
 0xcc3   :  { %5237 = vmatprep.subr.bf16.mxu0 %v8514_v26  ;;  %5278 = vmatprep.subr.bf16.mxu1 %v8516_v34 }
 0xcc6   :  { %5238 = vmatpush1.bf16.msra.mxu0 %v8518_v56  ;;  %5279 = vmatpush1.bf16.msra.mxu1 %v8520_v60 }
 0xcc7   :  { %5239 = vmatprep.subr.bf16.mxu0 %v8526_v57  ;;  %5280 = vmatprep.subr.bf16.mxu1 %v8528_v54 }
 0xcca   :  { %5240 = vmatpush1.bf16.msra.mxu0 %v8530_v12  ;;  %5281 = vmatpush1.bf16.msra.mxu1 %v8532_v9 }
 0xccb   :  { %5241 = vmatprep.subr.bf16.mxu0 %v8538_v49  ;;  %5282 = vmatprep.subr.bf16.mxu1 %v8540_v48 }
 0xcce   :  { %5242 = vmatpush1.bf16.msra.mxu0 %v8542_v20  ;;  %5283 = vmatpush1.bf16.msra.mxu1 %v8544_v28 }
 0xccf   :  { %5243 = vmatprep.subr.bf16.mxu0 %v8550_v8  ;;  %5284 = vmatprep.subr.bf16.mxu1 %v8552_v14 }
 0xcd2   :  { %5244 = vmatpush1.bf16.msra.mxu0 %v8554_v15  ;;  %5285 = vmatpush1.bf16.msra.mxu1 %v8556_v27 }
 0xcd3   :  { %5245 = vmatprep.subr.bf16.mxu0 %v8560_v22  ;;  %5286 = vmatprep.subr.bf16.mxu1 %v8562_v19 }
 0xcd6   :  { %5246 = vmatpush1.bf16.msra.mxu0 %v8566_v29  ;;  %5287 = vmatpush1.bf16.msra.mxu1 %v8568_v25 }
 0xcd7   :  { %5542 = vmatprep.subr.bf16.mxu0 %v8478_v24  ;;  %5583 = vmatprep.subr.bf16.mxu1 %v8480_v52 }
 0xd79   :  { %v4954_v6 = vpop.f32.mrf.mxu0  ;;  %v4995_v40 = vpop.f32.mrf.mxu1 }
 0xd7a   :  { %v5002_v23 = vadd.f32 %v4954_v6, %v3353_v62  ;;  %v5004_v10 = vadd.f32 %v4995_v40, %v3426_v51 }
 0xd7b   :  { %v4956_v43 = vpop.f32.mrf.mxu0  ;;  %v4997_v59 = vpop.f32.mrf.mxu1 }
 0xd7c   :  { %v6621_v61 = vmul.f32 -1.442695, %v5002_v23  ;;  %v5003_v47 = vadd.f32 %v4956_v43, %v3355_v42  ;;  %v5005_v38 = vadd.f32 %v4997_v59, %v3428_v37  ;;  %v8833_v37 = vld [vmem:[#allocation36_spill] sm:$0xff] }
 0xd7d   :  { %v4958_v18 = vpop.f32.mrf.mxu0  ;;  %v4999_v7 = vpop.f32.mrf.mxu1 }
 0xd7e   :  { %7277 = vpow2.f32 %v6621_v61  ;;  %v6622_v44 = vmul.f32 -1.442695, %v5003_v47  ;;  %v6623_v2 = vmul.f32 -1.442695, %v5005_v38  ;;  %v3359_v38 = vadd.f32 %v8833_v37, %v8365_v16 }
 0xd7f   :  { %v4959_v53 = vpop.f32.mrf.mxu0  ;;  %v5000_v17 = vpop.f32.mrf.mxu1 }
 0xd80   :  { %7279 = vpow2.f32 %v6622_v44 }
 0xd81   :  { %7281 = vtanh.f32 %v5004_v10 }
 0xd82   :  { %7283 = vpow2.f32 %v6623_v2 }
 0xd8b   :  { %v7278_v4 = vpop.eup %7277 }
 0xd8c   :  { %v5009_v5 = vadd.f32 1.0, %v7278_v4 }
 0xd8d   :  { %v7280_v32 = vpop.eup %7279 }
 0xd8e   :  { %7285 = vrcp.f32 %v5009_v5  ;;  %v5015_v58 = vadd.f32 1.0, %v7280_v32  ;;  %v7282_v62 = vpop.eup %7281 }
 0xd8f   :  { %v7284_v6 = vpop.eup %7283 }
 0xd90   :  { %7287 = vrcp.f32 %v5015_v58  ;;  %v5022_v43 = vadd.f32 1.0, %v7284_v6 }
 0xd92   :  { %7289 = vrcp.f32 %v5022_v43 }
 0xd9b   :  { %v7286_v0 = vpop.eup %7285 }
 0xd9c   :  { %v5026_v42 = vmul.f32 %v7286_v0, %v7282_v62 }
 0xd9d   :  { %v7288_v23 = vpop.eup %7287 }
 0xd9e   :  { %v5025_v59 = vmul.f32 %v7288_v23, %v8585_v63  ;;  %v8832_v63 = vld [vmem:[#allocation33_spill] sm:$0xff] }
 0xd9f   :  { %v7290_v40 = vpop.eup %7289  ;;  %v3357_v53 = vadd.f32 %v8832_v63, %v8357_v21 }
 0xda0   :  { %v8631_v61 = vadd.f32 %v5026_v42, %v5025_v59  ;;  %v8835_v42 = vld [vmem:[#allocation35_spill] sm:$0xff] }
 0xda1   :  { %v3430_v23 = vadd.f32 %v8835_v42, %v8380_v41 }
 0xda2   :  { %7291 = vtanh.f32 %v8631_v61 }
 0xdaf   :  { %v7292_v47 = vpop.eup %7291 }
 0xdb0   :  { %v5029_v18 = vmul.f32 %v7292_v47, %v7290_v40 }
 0xdb2   :  { %v5031_v7 = vpack.c.bf16 %v5029_v18, %v5029_v18 }
 0xdb4   :  { %5032 = vst [vmem:[#allocation4] sm:$0xf] %v5031_v7 }
 0xdbb   :  { %v5033_v44 = vld [vmem:[#allocation4] sm:$0xf] }
 0xdbc   :  { %5264 = vmatmul.mubr.bf16.vlgmr.msra.gmra.mxu0 %v5033_v44  ;;  %5305 = vmatmul.mubr.bf16.vlgmr.msra.gmra.mxu1 %v5033_v44 }
 0xdbd   :  { %5543 = vmatpush1.bf16.msra.mxu0 %v8482_v30  ;;  %5584 = vmatpush1.bf16.msra.mxu1 %v8484_v55 }
 0xdbe   :  { %5544 = vmatprep.subr.bf16.mxu0 %v8490_v3  ;;  %5585 = vmatprep.subr.bf16.mxu1 %v8492_v46 }
 0xdbf   :  { %5574 = vmatprep.mubr.bf16.mxu0 %v8777_v13  ;;  %5615 = vmatprep.mubr.bf16.mxu1 %v8777_v13 }
 0xdc1   :  { %5545 = vmatpush1.bf16.msra.mxu0 %v8494_v1  ;;  %5586 = vmatpush1.bf16.msra.mxu1 %v8496_v50 }
 0xdc2   :  { %5546 = vmatprep.subr.bf16.mxu0 %v8502_v45  ;;  %5587 = vmatprep.subr.bf16.mxu1 %v8504_v31 }
 0xdc5   :  { %5547 = vmatpush1.bf16.msra.mxu0 %v8506_v11  ;;  %5588 = vmatpush1.bf16.msra.mxu1 %v8508_v33 }
 0xdc6   :  { %5548 = vmatprep.subr.bf16.mxu0 %v8514_v26  ;;  %5589 = vmatprep.subr.bf16.mxu1 %v8516_v34 }
 0xdc9   :  { %5549 = vmatpush1.bf16.msra.mxu0 %v8518_v56  ;;  %5590 = vmatpush1.bf16.msra.mxu1 %v8520_v60 }
 0xdca   :  { %5550 = vmatprep.subr.bf16.mxu0 %v8526_v57  ;;  %5591 = vmatprep.subr.bf16.mxu1 %v8528_v54 }
 0xdcd   :  { %5551 = vmatpush1.bf16.msra.mxu0 %v8530_v12  ;;  %5592 = vmatpush1.bf16.msra.mxu1 %v8532_v9 }
 0xdce   :  { %5552 = vmatprep.subr.bf16.mxu0 %v8538_v49  ;;  %5593 = vmatprep.subr.bf16.mxu1 %v8540_v48 }
 0xdd1   :  { %5553 = vmatpush1.bf16.msra.mxu0 %v8542_v20  ;;  %5594 = vmatpush1.bf16.msra.mxu1 %v8544_v28 }
 0xdd2   :  { %5554 = vmatprep.subr.bf16.mxu0 %v8550_v8  ;;  %5595 = vmatprep.subr.bf16.mxu1 %v8552_v14 }
 0xdd5   :  { %5555 = vmatpush1.bf16.msra.mxu0 %v8554_v15  ;;  %5596 = vmatpush1.bf16.msra.mxu1 %v8556_v27 }
 0xdd6   :  { %5556 = vmatprep.subr.bf16.mxu0 %v8560_v22  ;;  %5597 = vmatprep.subr.bf16.mxu1 %v8562_v19 }
 0xdd9   :  { %5557 = vmatpush1.bf16.msra.mxu0 %v8566_v29  ;;  %5598 = vmatpush1.bf16.msra.mxu1 %v8568_v25 }
 0xdda   :  { %5853 = vmatprep.subr.bf16.mxu0 %v8478_v24  ;;  %5894 = vmatprep.subr.bf16.mxu1 %v8480_v52  ;;  %v8834_v52 = vld [vmem:[#allocation34_spill] sm:$0xff] }
 0xddb   :  { %v3432_v6 = vadd.f32 %v8834_v52, %v8375_v35 }
 0xe7c   :  { %v5265_v17 = vpop.f32.mrf.mxu0  ;;  %v5306_v36 = vpop.f32.mrf.mxu1 }
 0xe7d   :  { %v5313_v39 = vadd.f32 %v5265_v17, %v3357_v53  ;;  %v5315_v43 = vadd.f32 %v5306_v36, %v3430_v23  ;;  %v7077_v23 = vld [vmem:[#allocation15 + $0x38] sm:$0xff]  }
 0xe7e   :  { %v5267_v51 = vpop.f32.mrf.mxu0  ;;  %v5308_v10 = vpop.f32.mrf.mxu1 }
 0xe7f   :  { %v6656_v2 = vmul.f32 -1.442695, %v5313_v39  ;;  %v5314_v4 = vadd.f32 %v5267_v51, %v3359_v38  ;;  %v5316_v0 = vadd.f32 %v5308_v10, %v3432_v6 }
 0xe80   :  { %v5269_v5 = vpop.f32.mrf.mxu0  ;;  %v5310_v32 = vpop.f32.mrf.mxu1 }
 0xe81   :  { %7293 = vpow2.f32 %v6656_v2  ;;  %v6657_v58 = vmul.f32 -1.442695, %v5314_v4  ;;  %v6658_v59 = vmul.f32 -1.442695, %v5316_v0 }
 0xe82   :  { %v5270_v24 = vpop.f32.mrf.mxu0  ;;  %v5311_v62 = vpop.f32.mrf.mxu1 }
 0xe83   :  { %7295 = vpow2.f32 %v6657_v58 }
 0xe84   :  { %7297 = vtanh.f32 %v5315_v43  ;;  %v7502_v43 = vmov 0.0  }
 0xe85   :  { %7299 = vpow2.f32 %v6658_v59  ;;  %v7078_v59 = vld [vmem:[#allocation15 + $0x30] sm:$0xff]  }
 0xe8e   :  { %v7294_v40 = vpop.eup %7293 }
 0xe8f   :  { %v5320_v47 = vadd.f32 1.0, %v7294_v40  ;;  %v7079_v40 = vld [vmem:[#allocation15 + $0x28] sm:$0xff]  }
 0xe90   :  { %v7296_v18 = vpop.eup %7295 }
 0xe91   :  { %7301 = vrcp.f32 %v5320_v47  ;;  %v5326_v7 = vadd.f32 1.0, %v7296_v18  ;;  %v7298_v44 = vpop.eup %7297  ;;  %v7080_v47 = vld [vmem:[#allocation15 + $0x20] sm:$0xff]   ;;  %v7081_v18 = vld [vmem:[#allocation15 + $0x18] sm:$0xff]  }
 0xe92   :  { %v7300_v63 = vpop.eup %7299 }
 0xe93   :  { %7303 = vrcp.f32 %v5326_v7  ;;  %v5333_v38 = vadd.f32 1.0, %v7300_v63  ;;  %v7082_v7 = vld [vmem:[#allocation15 + $0x10] sm:$0xff]   ;;  %v7084_v63 = vld [vmem:[#allocation15] sm:$0xff]  }
 0xe95   :  { %7305 = vrcp.f32 %v5333_v38 }
 0xe9e   :  { %v7302_v53 = vpop.eup %7301 }
 0xe9f   :  { %v5337_v17 = vmul.f32 %v7302_v53, %v7298_v44  ;;  %v7083_v44 = vld [vmem:[#allocation15 + $0x8] sm:$0xff]   ;;  %v8840_v53 = vld [vmem:[#allocation41_spill] sm:$0xff] }
 0xea0   :  { %v7304_v37 = vpop.eup %7303 }
 0xea1   :  { %v5336_v39 = vmul.f32 %v7304_v37, %v8631_v61 }
 0xea2   :  { %v7306_v36 = vpop.eup %7305 }
 0xea3   :  { %v8677_v51 = vadd.f32 %v5337_v17, %v5336_v39  ;;  %v3367_v17 = vadd.f32 %v8840_v53, %v8357_v21  ;;  %v8841_v39 = vld [vmem:[#allocation23_spill] sm:$0xff] }
 0xea5   :  { %7307 = vtanh.f32 %v8677_v51 }
 0xeb2   :  { %v7308_v10 = vpop.eup %7307 }
 0xeb3   :  { %v5340_v2 = vmul.f32 %v7308_v10, %v7306_v36 }
 0xeb5   :  { %v5342_v4 = vpack.c.bf16 %v5340_v2, %v5340_v2 }
 0xeb7   :  { %5343 = vst [vmem:[#allocation4] sm:$0xf] %v5342_v4 }
 0xebe   :  { %v5344_v5 = vld [vmem:[#allocation4] sm:$0xf] }
 0xebf   :  { %5575 = vmatmul.mubr.bf16.vlgmr.msra.gmra.mxu0 %v5344_v5  ;;  %5616 = vmatmul.mubr.bf16.vlgmr.msra.gmra.mxu1 %v5344_v5 }
 0xec0   :  { %5854 = vmatpush1.bf16.msra.mxu0 %v8482_v30  ;;  %5895 = vmatpush1.bf16.msra.mxu1 %v8484_v55 }
 0xec1   :  { %5855 = vmatprep.subr.bf16.mxu0 %v8490_v3  ;;  %5896 = vmatprep.subr.bf16.mxu1 %v8492_v46  ;;  %v8837_v46 = vld [vmem:[#allocation40_spill] sm:$0xff] }
 0xec2   :  { %5885 = vmatprep.mubr.bf16.mxu0 %v8777_v13  ;;  %5926 = vmatprep.mubr.bf16.mxu1 %v8777_v13  ;;  %v8836_v13 = vld [vmem:[#allocation37_spill] sm:$0xff] }
 0xec3   :  { %v3363_v30 = vadd.f32 %v8836_v13, %v8357_v21 }
 0xec4   :  { %5856 = vmatpush1.bf16.msra.mxu0 %v8494_v1  ;;  %5897 = vmatpush1.bf16.msra.mxu1 %v8496_v50  ;;  %v3365_v1 = vadd.f32 %v8837_v46, %v8365_v16 }
 0xec5   :  { %5857 = vmatprep.subr.bf16.mxu0 %v8502_v45  ;;  %5898 = vmatprep.subr.bf16.mxu1 %v8504_v31 }
 0xec8   :  { %5858 = vmatpush1.bf16.msra.mxu0 %v8506_v11  ;;  %5899 = vmatpush1.bf16.msra.mxu1 %v8508_v33 }
 0xec9   :  { %5859 = vmatprep.subr.bf16.mxu0 %v8514_v26  ;;  %5900 = vmatprep.subr.bf16.mxu1 %v8516_v34 }
 0xecc   :  { %5860 = vmatpush1.bf16.msra.mxu0 %v8518_v56  ;;  %5901 = vmatpush1.bf16.msra.mxu1 %v8520_v60 }
 0xecd   :  { %5861 = vmatprep.subr.bf16.mxu0 %v8526_v57  ;;  %5902 = vmatprep.subr.bf16.mxu1 %v8528_v54  ;;  %v8838_v54 = vld [vmem:[#allocation38_spill] sm:$0xff] }
 0xed0   :  { %5862 = vmatpush1.bf16.msra.mxu0 %v8530_v12  ;;  %5903 = vmatpush1.bf16.msra.mxu1 %v8532_v9  ;;  %v3438_v12 = vadd.f32 %v8838_v54, %v8375_v35 }
 0xed1   :  { %5863 = vmatprep.subr.bf16.mxu0 %v8538_v49  ;;  %5904 = vmatprep.subr.bf16.mxu1 %v8540_v48  ;;  %v8839_v49 = vld [vmem:[#allocation39_spill] sm:$0xff] }
 0xed2   :  { %v3436_v48 = vadd.f32 %v8839_v49, %v8380_v41 }
 0xed4   :  { %5864 = vmatpush1.bf16.msra.mxu0 %v8542_v20  ;;  %5905 = vmatpush1.bf16.msra.mxu1 %v8544_v28 }
 0xed5   :  { %5865 = vmatprep.subr.bf16.mxu0 %v8550_v8  ;;  %5906 = vmatprep.subr.bf16.mxu1 %v8552_v14 }
 0xed8   :  { %5866 = vmatpush1.bf16.msra.mxu0 %v8554_v15  ;;  %5907 = vmatpush1.bf16.msra.mxu1 %v8556_v27 }
 0xed9   :  { %5867 = vmatprep.subr.bf16.mxu0 %v8560_v22  ;;  %5908 = vmatprep.subr.bf16.mxu1 %v8562_v19 }
 0xedc   :  { %5868 = vmatpush1.bf16.msra.mxu0 %v8566_v29  ;;  %5909 = vmatpush1.bf16.msra.mxu1 %v8568_v25 }
 0xedd   :  { %6747 = vmatprep.subr.bf16.mxu0 %v7502_v43 }
 0xf7f   :  { %v5576_v55 = vpop.f32.mrf.mxu0  ;;  %v5617_v3 = vpop.f32.mrf.mxu1 }
 0xf80   :  { %v5624_v50 = vadd.f32 %v5576_v55, %v3363_v30  ;;  %v5626_v20 = vadd.f32 %v5617_v3, %v3436_v48 }
 0xf81   :  { %v5578_v45 = vpop.f32.mrf.mxu0  ;;  %v5619_v31 = vpop.f32.mrf.mxu1 }
 0xf82   :  { %v6691_v11 = vmul.f32 -1.442695, %v5624_v50  ;;  %v5625_v33 = vadd.f32 %v5578_v45, %v3365_v1  ;;  %v5627_v9 = vadd.f32 %v5619_v31, %v3438_v12  ;;  %v8842_v1 = vld [vmem:[#allocation43_spill] sm:$0xff]  ;;  %v8843_v45 = vld [vmem:[#allocation42_spill] sm:$0xff] }
 0xf83   :  { %v5580_v26 = vpop.f32.mrf.mxu0  ;;  %v5621_v34 = vpop.f32.mrf.mxu1  ;;  %v3442_v21 = vadd.f32 %v8842_v1, %v8375_v35  ;;  %v3440_v31 = vadd.f32 %v8843_v45, %v8380_v41 }
 0xf84   :  { %7309 = vpow2.f32 %v6691_v11  ;;  %v6692_v56 = vmul.f32 -1.442695, %v5625_v33  ;;  %v6693_v28 = vmul.f32 -1.442695, %v5627_v9 }
 0xf85   :  { %v5581_v60 = vpop.f32.mrf.mxu0  ;;  %v5622_v57 = vpop.f32.mrf.mxu1 }
 0xf86   :  { %7311 = vpow2.f32 %v6692_v56 }
 0xf87   :  { %7313 = vtanh.f32 %v5626_v20 }
 0xf88   :  { %7315 = vpow2.f32 %v6693_v28 }
 0xf91   :  { %v7310_v8 = vpop.eup %7309 }
 0xf92   :  { %v5631_v14 = vadd.f32 1.0, %v7310_v8 }
 0xf93   :  { %v7312_v15 = vpop.eup %7311 }
 0xf94   :  { %7317 = vrcp.f32 %v5631_v14  ;;  %v5637_v27 = vadd.f32 1.0, %v7312_v15  ;;  %v7314_v22 = vpop.eup %7313  ;;  %v6729_v15 = vld [vmem:[%s8747_s8] ss:$0 sm:$0xff] }
 0xf95   :  { %v7316_v19 = vpop.eup %7315 }
 0xf96   :  { %7319 = vrcp.f32 %v5637_v27  ;;  %v5644_v32 = vadd.f32 1.0, %v7316_v19 }
 0xf98   :  { %7321 = vrcp.f32 %v5644_v32 }
 0xfa1   :  { %v7318_v29 = vpop.eup %7317 }
 0xfa2   :  { %v5648_v25 = vmul.f32 %v7318_v29, %v7314_v22 }
 0xfa3   :  { %v7320_v61 = vpop.eup %7319 }
 0xfa4   :  { %v5647_v58 = vmul.f32 %v7320_v61, %v8677_v51  ;;  %v3369_v51 = vadd.f32 %v8841_v39, %v8365_v16 }
 0xfa5   :  { %v7322_v62 = vpop.eup %7321 }
 0xfa6   :  { %v8721_v24 = vadd.f32 %v5648_v25, %v5647_v58 }
 0xfa8   :  { %7323 = vtanh.f32 %v8721_v24 }
 0xfb5   :  { %v7324_v52 = vpop.eup %7323 }
 0xfb6   :  { %v5651_v6 = vmul.f32 %v7324_v52, %v7322_v62 }
 0xfb8   :  { %v5653_v0 = vpack.c.bf16 %v5651_v6, %v5651_v6 }
 0xfba   :  { %5654 = vst [vmem:[#allocation4] sm:$0xf] %v5653_v0 }
 0xfc1   :  { %v5655_v42 = vld [vmem:[#allocation4] sm:$0xf] }
 0xfc2   :  { %5886 = vmatmul.mubr.bf16.vlgmr.msra.gmra.mxu0 %v5655_v42  ;;  %5927 = vmatmul.mubr.bf16.vlgmr.msra.gmra.mxu1 %v5655_v42 }
 0xfc3   :  { %6748 = vmatpush3.bf16.msra.mxu0 %v7077_v23  ;;  %6763 = vmatprep.mubr.msk.bf16.mxu0 %vm7503_vm0, %v7502_v43 }
 0xfc4   :  { %6749 = vmatprep.subr.bf16.mxu0 %v7502_v43 }
 0xfc7   :  { %6750 = vmatpush3.bf16.msra.mxu0 %v7078_v59 }
 0xfc8   :  { %6751 = vmatprep.subr.bf16.mxu0 %v7502_v43 }
 0xfcb   :  { %6752 = vmatpush3.bf16.msra.mxu0 %v7079_v40 }
 0xfcc   :  { %6753 = vmatprep.subr.bf16.mxu0 %v7502_v43 }
 0xfcf   :  { %6754 = vmatpush3.bf16.msra.mxu0 %v7080_v47 }
 0xfd0   :  { %6755 = vmatprep.subr.bf16.mxu0 %v7502_v43 }
 0xfd3   :  { %6756 = vmatpush3.bf16.msra.mxu0 %v7081_v18 }
 0xfd4   :  { %6757 = vmatprep.subr.bf16.mxu0 %v7502_v43 }
 0xfd7   :  { %6758 = vmatpush3.bf16.msra.mxu0 %v7082_v7 }
 0xfd8   :  { %6759 = vmatprep.subr.bf16.mxu0 %v7502_v43 }
 0xfdb   :  { %6760 = vmatpush3.bf16.msra.mxu0 %v7083_v44 }
 0xfdc   :  { %6761 = vmatprep.subr.bf16.mxu0 %v7502_v43 }
 0xfdf   :  { %6762 = vmatpush3.bf16.msra.mxu0 %v7084_v63 }
0x1082   :  { %v5887_v37 = vpop.f32.mrf.mxu0  ;;  %v5928_v38 = vpop.f32.mrf.mxu1 }
0x1083   :  { %v5935_v36 = vadd.f32 %v5887_v37, %v3367_v17  ;;  %v5937_v16 = vadd.f32 %v5928_v38, %v3440_v31 }
0x1084   :  { %v5889_v10 = vpop.f32.mrf.mxu0  ;;  %v5930_v2 = vpop.f32.mrf.mxu1 }
0x1085   :  { %v6726_v4 = vmul.f32 -1.442695, %v5935_v36  ;;  %v5936_v5 = vadd.f32 %v5889_v10, %v3369_v51  ;;  %v5938_v50 = vadd.f32 %v5930_v2, %v3442_v21 }
0x1086   :  { %v5891_v13 = vpop.f32.mrf.mxu0  ;;  %v5932_v30 = vpop.f32.mrf.mxu1 }
0x1087   :  { %7325 = vpow2.f32 %v6726_v4  ;;  %v6727_v55 = vmul.f32 -1.442695, %v5936_v5  ;;  %v6728_v11 = vmul.f32 -1.442695, %v5938_v50 }
0x1088   :  { %v5892_v3 = vpop.f32.mrf.mxu0  ;;  %v5933_v46 = vpop.f32.mrf.mxu1 }
0x1089   :  { %7327 = vpow2.f32 %v6727_v55 }
0x108a   :  { %7329 = vtanh.f32 %v5937_v16 }
0x108b   :  { %7331 = vpow2.f32 %v6728_v11 }
0x1094   :  { %v7326_v33 = vpop.eup %7325 }
0x1095   :  { %v5942_v26 = vadd.f32 1.0, %v7326_v33 }
0x1096   :  { %v7328_v34 = vpop.eup %7327 }
0x1097   :  { %7333 = vrcp.f32 %v5942_v26  ;;  %v5948_v56 = vadd.f32 1.0, %v7328_v34  ;;  %v7330_v60 = vpop.eup %7329 }
0x1098   :  { %v7332_v57 = vpop.eup %7331 }
0x1099   :  { %7335 = vrcp.f32 %v5948_v56  ;;  %v5955_v35 = vadd.f32 1.0, %v7332_v57 }
0x109b   :  { %7337 = vrcp.f32 %v5955_v35 }
0x10a4   :  { %v7334_v54 = vpop.eup %7333 }
0x10a5   :  { %v5959_v12 = vmul.f32 %v7334_v54, %v7330_v60 }
0x10a6   :  { %v7336_v9 = vpop.eup %7335 }
0x10a7   :  { %v5958_v49 = vmul.f32 %v7336_v9, %v8721_v24 }
0x10a8   :  { %v7338_v41 = vpop.eup %7337 }
0x10a9   :  { %v5960_v48 = vadd.f32 %v5959_v12, %v5958_v49 }
0x10ab   :  { %7339 = vtanh.f32 %v5960_v48 }
0x10b8   :  { %v7340_v20 = vpop.eup %7339 }
0x10b9   :  { %v5962_v28 = vmul.f32 %v7340_v20, %v7338_v41 }
0x10bb   :  { %v5964_v8 = vpack.c.bf16 %v5962_v28, %v5962_v28 }
0x10bd   :  { %5965 = vst [vmem:[#allocation4] sm:$0xf] %v5964_v8 }
0x10c4   :  { %v5966_v14 = vld [vmem:[#allocation4] sm:$0xf] }
0x10c5   :  { %6764 = vmatmul.mubr.bf16.vlgmr.msra.gmra.mxu0 %v5966_v14 }
0x1185   :  { %v6072_v27 = vpop.f32.mrf.mxu0 }
0x1186   :  { %v6073_v22 = vadd.f32 %v6729_v15, %v6072_v27 }
0x1187   :  { %v6765_v19 = vpop.f32.mrf.mxu0 }
0x1188   :  { %6078 = vst [vmem:[#allocation17] sm:$0xff] %v6073_v22 }
0x1189   :  { %v6075_v29 = vpop.f32.mrf.mxu0 }
0x118a   :  { %7472 = shalt.err (!%p7469_p6)
}
0x118b   :  { %6088 = dma.vmem_to_hbm [thread:$0]  %s6086_s21, 128, %s8748_s9, [#allocation8]   ;;  %v6766_v25 = vpop.f32.mrf.mxu0 }
0x118c   :  { %7489 = dma.done.wait [#allocation8], 128  }
0x118d   :  { %7490 = vsyncadd [#allocation8], 4294967168 }
0x118e   :  { %6092 = vsyncpa [#allocation7], 1 }
0x118f   :  { %6093 = vsyncpa [#allocation10], 1 }
0x1190   :  { %6094 = vsyncpa [#allocation13], 1 }
0x1191   :  { %6095 = vsyncpa [#allocation16], 1 }
0x1192   :  { %6096 = vsyncpa [#allocation8], 1 }

</bundles_post_ra>
